<compile_context>
chip_gen: v7x
topology: tpu7x:2x2x1
jax: 0.10.0
libtpu: 0.0.40
codegen_flags: <defaults>
</compile_context>

<pallas_src>
import math
from functools import partial

import jax
import jax.numpy as jnp
import numpy as np
from jax.experimental import pallas as pl
from jax.experimental.pallas import tpu as pltpu

# ---- module-consistent config (window size 7 / shift 3 are hard-coded upstream) ----
DIM = 32
NUM_HEADS = 4
HEAD_DIM = DIM // NUM_HEADS
ATTN_DIM = HEAD_DIM * NUM_HEADS
WINDOW = 7
SHIFT = 3                       # SW_MSA uses a hard-coded shift of 3
H = W = 14                      # input_resolution (must be a multiple of the window)
L = H * W
NW = (H // WINDOW) * (W // WINDOW)     # 4 windows
N_WIN = WINDOW * WINDOW                # 49 tokens per window
BATCH = 2
SCALE = HEAD_DIM ** -0.5


# ----------------------------------- fused kernel -----------------------------------
def sw_msa_kernel(x_ref, wqkv_ref, bqkv_ref, wp_ref, bp_ref, bias_ref, o_ref,
                  *, num_heads, head_dim, n_win):
    attn_dim = num_heads * head_dim
    n_tok = x_ref.shape[2]            # 49 tokens per window
    out_dim = o_ref.shape[3]          # 32 output channels

    # Grid-resident weights (bf16 MXU operands); biases stay f32.  Broadcasts are
    # hoisted out of the loops (JAX does not CSE broadcast_in_dim).
    wqkv = wqkv_ref[...]                                             # (C, 3A) bf16
    bqkv = jnp.broadcast_to(bqkv_ref[...], (n_tok, 3 * attn_dim))    # (49, 3A) f32
    bp = jnp.broadcast_to(bp_ref[...], (n_tok, out_dim))             # (49, C)  f32

    for w in range(n_win):                       # 4 static window iterations
        xw = x_ref[0, w].astype(jnp.bfloat16)    # (49, C)
        # Fused QKV projection; 1/sqrt(head_dim) is folded into the q columns of wqkv.
        qkv = jnp.dot(xw, wqkv, preferred_element_type=jnp.float32) + bqkv   # (49, 3A)
        qkv_b = qkv.astype(jnp.bfloat16)

        acc = bp                                  # proj bias added up-front, f32 acc
        for h in range(num_heads):               # 4 static head iterations
            lo = h * head_dim
            qh = qkv_b[:, lo:lo + head_dim]                               # (49, hd)
            kh = qkv_b[:, attn_dim + lo:attn_dim + lo + head_dim]         # (49, hd)
            vh = qkv_b[:, 2 * attn_dim + lo:2 * attn_dim + lo + head_dim]

            # q @ k^T contracting the last dims of both operands (MXU transposed-RHS
            # path, same pattern as the flash-attention reference -- no XLU transpose).
            s = jax.lax.dot_general(qh, kh, (((1,), (1,)), ((), ())),
                                    preferred_element_type=jnp.float32)   # (49, 49)
            s = s + bias_ref[h, w].astype(jnp.float32)   # rel-pos bias + shift mask
            s = s - jnp.max(s, axis=-1, keepdims=True)   # kept for numerical safety
            p = jnp.exp(s)                               # f32 EUP
            denom = jnp.sum(p, axis=-1, keepdims=True)   # (49, 1)

            # PV with UNNORMALIZED p; normalize the (49,hd) result afterwards
            # (~25x fewer VPU multiplies than scaling the (49,49) probability tile).
            o_h = jnp.dot(p.astype(jnp.bfloat16), vh,
                          preferred_element_type=jnp.float32)             # (49, hd)
            o_h = o_h * pl.reciprocal(denom, approx=True)                 # EUP recip

            # Fold the output projection into the head loop (no concat of head outputs).
            acc = acc + jnp.dot(o_h.astype(jnp.bfloat16),
                                wp_ref[lo:lo + head_dim, :],
                                preferred_element_type=jnp.float32)       # (49, C)

        # NOTE: the (49,32) store is 25%-lane-dense; a (49,128) lane-dense slab only
        # matters if the v5e vst slot is shown to saturate -- skipped at this size.
        o_ref[0, w] = acc.astype(o_ref.dtype)


# ----------------------------------- wrapper -----------------------------------
def sw_msa(x, params):
    """x: (B, L, C) in original (unshifted, row-major) token order."""
    B, Lx, C = x.shape
    # roll(-3,-3) + window partition folded into one static token permutation
    # (wrapper-side XLA gather, ~50 KiB); inverse perm == window-reverse + roll(3,3).
    x_perm = jnp.take(x, params["perm"], axis=1).reshape(B, NW, N_WIN, C)

    kern = partial(sw_msa_kernel, num_heads=NUM_HEADS, head_dim=HEAD_DIM, n_win=NW)
    out_perm = pl.pallas_call(
        kern,
        grid=(B,),
        in_specs=[
            pl.BlockSpec((1, NW, N_WIN, C), lambda b: (b, 0, 0, 0)),
            pl.BlockSpec(params["wqkv"].shape, lambda b: (0, 0)),
            pl.BlockSpec(params["bqkv"].shape, lambda b: (0, 0)),
            pl.BlockSpec(params["wp"].shape, lambda b: (0, 0)),
            pl.BlockSpec(params["bp"].shape, lambda b: (0, 0)),
            pl.BlockSpec(params["bias"].shape, lambda b: (0, 0, 0, 0)),
        ],
        out_specs=pl.BlockSpec((1, NW, N_WIN, C), lambda b: (b, 0, 0, 0)),
        out_shape=jax.ShapeDtypeStruct((B, NW, N_WIN, C), x.dtype),
        compiler_params=pltpu.CompilerParams(dimension_semantics=("parallel",)),
    )(x_perm, params["wqkv"], params["bqkv"], params["wp"], params["bp"], params["bias"])

    return jnp.take(out_perm.reshape(B, Lx, C), params["inv_perm"], axis=1)


# ------------------------- parameter / buffer construction -------------------------
def relative_position_index(win_h, win_w):
    coords = np.stack(np.meshgrid(np.arange(win_h), np.arange(win_w), indexing="ij"))
    coords_flatten = coords.reshape(2, -1)
    rel = coords_flatten[:, :, None] - coords_flatten[:, None, :]
    rel = rel.transpose(1, 2, 0).copy()
    rel[:, :, 0] += win_h - 1
    rel[:, :, 1] += win_w - 1
    rel[:, :, 0] *= 2 * win_w - 1
    return rel.sum(-1)                                                     # (49, 49)


def build_attn_mask(Hh, Ww, ws, shift):
    img_mask = np.zeros((1, Hh, Ww, 1), np.float32)
    cnt = 0
    for hs in (slice(0, -ws), slice(-ws, -shift), slice(-shift, None)):
        for wsl in (slice(0, -ws), slice(-ws, -shift), slice(-shift, None)):
            img_mask[:, hs, wsl, :] = cnt
            cnt += 1
    mw = (img_mask.reshape(1, Hh // ws, ws, Ww // ws, ws, 1)
                  .transpose(0, 1, 3, 2, 4, 5)
                  .reshape(-1, ws * ws))
    attn_mask = mw[:, None, :] - mw[:, :, None]
    return np.where(attn_mask != 0, -100.0, 0.0).astype(np.float32)        # (nW, 49, 49)


def build_window_permutation(Hh, Ww, ws, shift):
    """perm so that x[:, perm][:, w*49+n] is the token at (window w, position n)
    after roll(-shift,-shift) + window partition; inv undoes it."""
    ii, jj = np.meshgrid(np.arange(Hh), np.arange(Ww), indexing="ij")  # shifted coords
    wid = (ii // ws) * (Ww // ws) + (jj // ws)
    pos = (ii % ws) * ws + (jj % ws)
    dest = (wid * (ws * ws) + pos).reshape(-1)
    orig = (((ii + shift) % Hh) * Ww + ((jj + shift) % Ww)).reshape(-1)
    perm = np.empty(Hh * Ww, np.int32)
    perm[dest] = orig
    inv = np.empty_like(perm)
    inv[perm] = np.arange(Hh * Ww, dtype=np.int32)
    return perm, inv


def make_params(key):
    k_wqkv, k_bqkv, k_wp, k_bp, k_tab = jax.random.split(key, 5)

    def lin(k, fan_in, shape):
        bound = 1.0 / math.sqrt(fan_in)
        return jax.random.uniform(k, shape, jnp.float32, -bound, bound)

    # nn.Linear(dim, 3*attn_dim) / nn.Linear(attn_dim, dim), stored transposed for x @ W.
    wqkv_raw = lin(k_wqkv, DIM, (DIM, 3 * ATTN_DIM))
    bqkv_raw = lin(k_bqkv, DIM, (1, 3 * ATTN_DIM))
    wp_raw = lin(k_wp, ATTN_DIM, (ATTN_DIM, DIM))
    bp = lin(k_bp, ATTN_DIM, (1, DIM))
    table = 0.02 * jax.random.truncated_normal(
        k_tab, -2.0, 2.0, ((2 * WINDOW - 1) ** 2, NUM_HEADS), jnp.float32)

    rpi = relative_position_index(WINDOW, WINDOW).reshape(-1)
    rel_bias = (np.asarray(table)[rpi]
                .reshape(N_WIN, N_WIN, NUM_HEADS).transpose(2, 0, 1))      # (nh, 49, 49)
    attn_mask = build_attn_mask(H, W, WINDOW, SHIFT)                       # (nW, 49, 49)
    bias = (rel_bias[:, None] + attn_mask[None, :]).astype(np.float32)     # (nh,nW,49,49)

    # Fold the 1/sqrt(head_dim) query scale into the q slice of the fused QKV params.
    scale_cols = np.concatenate([np.full((ATTN_DIM,), SCALE, np.float32),
                                 np.ones((2 * ATTN_DIM,), np.float32)])
    wqkv = (wqkv_raw * scale_cols[None, :]).astype(jnp.bfloat16)   # bf16 MXU operand
    bqkv = bqkv_raw * scale_cols[None, :]                          # tiny, keep f32

    perm, inv_perm = build_window_permutation(H, W, WINDOW, SHIFT)

    return {
        # kernel parameters / buffers
        "wqkv": wqkv, "bqkv": bqkv,
        "wp": wp_raw.astype(jnp.bfloat16), "bp": bp,
        "bias": jnp.asarray(bias).astype(jnp.bfloat16),            # halves dominant DMA
        "perm": jnp.asarray(perm), "inv_perm": jnp.asarray(inv_perm),
        # raw f32 copies used only by the in-script reference check
        "wqkv_raw": wqkv_raw, "bqkv_raw": bqkv_raw, "wp_raw": wp_raw,
        "rel_bias": jnp.asarray(rel_bias), "attn_mask": jnp.asarray(attn_mask),
    }


# --------------------- pure-JAX reference (direct PyTorch port) ---------------------
def sw_msa_reference(x, params):
    B, Lx, C = x.shape
    ws = WINDOW
    h = w = int(math.isqrt(Lx))
    h_, w_ = h // ws, w // ws
    xg = x.reshape(B, h, w, C)
    xg = jnp.roll(xg, shift=(-SHIFT, -SHIFT), axis=(1, 2))
    xw = (xg.reshape(B, h_, ws, w_, ws, C).transpose(0, 1, 3, 2, 4, 5)
            .reshape(B * h_ * w_, ws * ws, C))
    qkv = xw @ params["wqkv_raw"] + params["bqkv_raw"]
    qkv = qkv.reshape(B * h_ * w_, ws * ws, 3, NUM_HEADS, HEAD_DIM).transpose(2, 0, 3, 1, 4)
    q, k, v = qkv[0] * SCALE, qkv[1], qkv[2]
    attn = jnp.einsum("bhnd,bhmd->bhnm", q, k)
    attn = attn + params["rel_bias"][None]
    attn = (attn.reshape(B, h_ * w_, NUM_HEADS, ws * ws, ws * ws)
            + params["attn_mask"][None, :, None])
    attn = jax.nn.softmax(attn.reshape(B * h_ * w_, NUM_HEADS, ws * ws, ws * ws), axis=-1)
    out = jnp.einsum("bhnm,bhmd->bhnd", attn, v)
    out = out.transpose(0, 2, 1, 3).reshape(B * h_ * w_, ws * ws, ATTN_DIM)
    out = out @ params["wp_raw"] + params["bp"]
    out = (out.reshape(B, h_, w_, ws, ws, C).transpose(0, 1, 3, 2, 4, 5)
              .reshape(B, h, w, C))
    out = jnp.roll(out, shift=(SHIFT, SHIFT), axis=(1, 2))
    return out.reshape(B, Lx, C)


if __name__ == "__main__":
    key = jax.random.PRNGKey(0)
    pkey, xkey = jax.random.split(key)
    params = make_params(pkey)
    x = jax.random.normal(xkey, (BATCH, L, DIM), jnp.float32)

    out = jax.jit(sw_msa)(x, params)
    jax.block_until_ready(out)

    ref = sw_msa_reference(x, params)
    err = float(jnp.max(jnp.abs(out - ref)))

    assert out.shape == (BATCH, L, DIM) and out.dtype == jnp.float32
    assert bool(jnp.all(jnp.isfinite(out)))
    assert err < 5e-2, f"max abs error vs reference: {err}"
    print("KERNEL_OK")
</pallas_src>

<mosaic_0001>
module attributes {stable_mosaic.version = 11 : i64} {
  func.func @sw_msa_kernel(%arg0: i32, %arg1: memref<1x4x49x32xf32, #tpu.memory_space<vmem>>, %arg2: memref<32x96xbf16, #tpu.memory_space<vmem>>, %arg3: memref<1x96xf32, #tpu.memory_space<vmem>>, %arg4: memref<32x32xbf16, #tpu.memory_space<vmem>>, %arg5: memref<1x32xf32, #tpu.memory_space<vmem>>, %arg6: memref<4x4x49x49xbf16, #tpu.memory_space<vmem>>, %arg7: memref<1x4x49x32xf32, #tpu.memory_space<vmem>>) attributes {dimension_semantics = [#tpu.dimension_semantics<parallel>], iteration_bounds = array<i64: 2>, scalar_prefetch = 0 : i64, scratch_operands = 0 : i64, tpu.core_type = #tpu.core_type<tc>, window_params = [{transform_indices = @transform_0, window_bounds = array<i64: 1, 4, 49, 32>}, {pipeline_mode = #tpu.pipeline_mode<synchronous>, transform_indices = @transform_1, window_bounds = array<i64: 32, 96>}, {pipeline_mode = #tpu.pipeline_mode<synchronous>, transform_indices = @transform_2, window_bounds = array<i64: 1, 96>}, {pipeline_mode = #tpu.pipeline_mode<synchronous>, transform_indices = @transform_3, window_bounds = array<i64: 32, 32>}, {pipeline_mode = #tpu.pipeline_mode<synchronous>, transform_indices = @transform_4, window_bounds = array<i64: 1, 32>}, {pipeline_mode = #tpu.pipeline_mode<synchronous>, transform_indices = @transform_5, window_bounds = array<i64: 4, 4, 49, 49>}, {transform_indices = @transform_6, window_bounds = array<i64: 1, 4, 49, 32>}]} {
    %c0 = arith.constant 0 : index
    %c0_0 = arith.constant 0 : index
    %0 = vector.load %arg2[%c0, %c0_0] : memref<32x96xbf16, #tpu.memory_space<vmem>>, vector<32x96xbf16>
    %c0_1 = arith.constant 0 : index
    %c0_2 = arith.constant 0 : index
    %1 = vector.load %arg3[%c0_1, %c0_2] : memref<1x96xf32, #tpu.memory_space<vmem>>, vector<1x96xf32>
    %2 = vector.shape_cast %1 : vector<1x96xf32> to vector<1x96xf32>
    %3 = vector.broadcast %2 : vector<1x96xf32> to vector<49x96xf32>
    %c0_3 = arith.constant 0 : index
    %c0_4 = arith.constant 0 : index
    %4 = vector.load %arg5[%c0_3, %c0_4] : memref<1x32xf32, #tpu.memory_space<vmem>>, vector<1x32xf32>
    %5 = vector.shape_cast %4 : vector<1x32xf32> to vector<1x32xf32>
    %6 = vector.broadcast %5 : vector<1x32xf32> to vector<49x32xf32>
    %c0_5 = arith.constant 0 : index
    %c0_6 = arith.constant 0 : index
    %c0_7 = arith.constant 0 : index
    %c0_8 = arith.constant 0 : index
    %7 = vector.load %arg1[%c0_5, %c0_6, %c0_7, %c0_8] : memref<1x4x49x32xf32, #tpu.memory_space<vmem>>, vector<1x1x49x32xf32>
    %8 = vector.shape_cast %7 : vector<1x1x49x32xf32> to vector<49x32xf32>
    %9 = arith.truncf %8 : vector<49x32xf32> to vector<49x32xbf16>
    %cst = arith.constant dense<0.000000e+00> : vector<49x96xf32>
    %10 = tpu.matmul %9, %0, %cst {dimension_numbers = #tpu.dot_dimension_numbers<[1], [0], [0], [1], [0, 0, 1, 1], [], []>} : vector<49x32xbf16>, vector<32x96xbf16>, vector<49x96xf32> -> vector<49x96xf32>
    %11 = arith.addf %10, %3 : vector<49x96xf32>
    %12 = arith.truncf %11 : vector<49x96xf32> to vector<49x96xbf16>
    %13 = vector.extract_strided_slice %12 {offsets = [0, 0], sizes = [49, 8], strides = [1, 1]} : vector<49x96xbf16> to vector<49x8xbf16>
    %14 = vector.extract_strided_slice %12 {offsets = [0, 32], sizes = [49, 8], strides = [1, 1]} : vector<49x96xbf16> to vector<49x8xbf16>
    %15 = vector.extract_strided_slice %12 {offsets = [0, 64], sizes = [49, 8], strides = [1, 1]} : vector<49x96xbf16> to vector<49x8xbf16>
    %cst_9 = arith.constant dense<0.000000e+00> : vector<49x49xf32>
    %16 = tpu.matmul %13, %14, %cst_9 {dimension_numbers = #tpu.dot_dimension_numbers<[1], [1], [0], [0], [0, 0, 1, 0], [], []>} : vector<49x8xbf16>, vector<49x8xbf16>, vector<49x49xf32> -> vector<49x49xf32>
    %c0_10 = arith.constant 0 : index
    %c0_11 = arith.constant 0 : index
    %c0_12 = arith.constant 0 : index
    %c0_13 = arith.constant 0 : index
    %17 = vector.load %arg6[%c0_10, %c0_11, %c0_12, %c0_13] : memref<4x4x49x49xbf16, #tpu.memory_space<vmem>>, vector<1x1x49x49xbf16>
    %18 = vector.shape_cast %17 : vector<1x1x49x49xbf16> to vector<49x49xbf16>
    %19 = arith.extf %18 : vector<49x49xbf16> to vector<49x49xf32>
    %20 = arith.addf %16, %19 : vector<49x49xf32>
    %cst_14 = arith.constant dense<0xFF800000> : vector<49xf32>
    %21 = vector.multi_reduction <maximumf>, %20, %cst_14 [1] : vector<49x49xf32> to vector<49xf32>
    %22 = vector.shape_cast %21 : vector<49xf32> to vector<49x1xf32>
    %23 = vector.broadcast %22 : vector<49x1xf32> to vector<49x49xf32>
    %24 = arith.subf %20, %23 : vector<49x49xf32>
    %25 = math.exp %24 : vector<49x49xf32>
    %cst_15 = arith.constant dense<0.000000e+00> : vector<49xf32>
    %26 = vector.multi_reduction <add>, %25, %cst_15 [1] : vector<49x49xf32> to vector<49xf32>
    %27 = vector.shape_cast %26 : vector<49xf32> to vector<49x1xf32>
    %28 = arith.truncf %25 : vector<49x49xf32> to vector<49x49xbf16>
    %cst_16 = arith.constant dense<0.000000e+00> : vector<49x8xf32>
    %29 = tpu.matmul %28, %15, %cst_16 {dimension_numbers = #tpu.dot_dimension_numbers<[1], [0], [0], [1], [0, 0, 1, 1], [], []>} : vector<49x49xbf16>, vector<49x8xbf16>, vector<49x8xf32> -> vector<49x8xf32>
    %30 = tpu.reciprocal %27 {approx = true} : vector<49x1xf32> -> vector<49x1xf32>
    %31 = vector.broadcast %30 : vector<49x1xf32> to vector<49x8xf32>
    %32 = arith.mulf %29, %31 : vector<49x8xf32>
    %33 = arith.truncf %32 : vector<49x8xf32> to vector<49x8xbf16>
    %c0_17 = arith.constant 0 : index
    %c0_18 = arith.constant 0 : index
    %34 = vector.load %arg4[%c0_17, %c0_18] : memref<32x32xbf16, #tpu.memory_space<vmem>>, vector<8x32xbf16>
    %cst_19 = arith.constant dense<0.000000e+00> : vector<49x32xf32>
    %35 = tpu.matmul %33, %34, %cst_19 {dimension_numbers = #tpu.dot_dimension_numbers<[1], [0], [0], [1], [0, 0, 1, 1], [], []>} : vector<49x8xbf16>, vector<8x32xbf16>, vector<49x32xf32> -> vector<49x32xf32>
    %36 = arith.addf %6, %35 : vector<49x32xf32>
    %37 = vector.extract_strided_slice %12 {offsets = [0, 8], sizes = [49, 8], strides = [1, 1]} : vector<49x96xbf16> to vector<49x8xbf16>
    %38 = vector.extract_strided_slice %12 {offsets = [0, 40], sizes = [49, 8], strides = [1, 1]} : vector<49x96xbf16> to vector<49x8xbf16>
    %39 = vector.extract_strided_slice %12 {offsets = [0, 72], sizes = [49, 8], strides = [1, 1]} : vector<49x96xbf16> to vector<49x8xbf16>
    %cst_20 = arith.constant dense<0.000000e+00> : vector<49x49xf32>
    %40 = tpu.matmul %37, %38, %cst_20 {dimension_numbers = #tpu.dot_dimension_numbers<[1], [1], [0], [0], [0, 0, 1, 0], [], []>} : vector<49x8xbf16>, vector<49x8xbf16>, vector<49x49xf32> -> vector<49x49xf32>
    %c1 = arith.constant 1 : index
    %c0_21 = arith.constant 0 : index
    %c0_22 = arith.constant 0 : index
    %c0_23 = arith.constant 0 : index
    %41 = vector.load %arg6[%c1, %c0_21, %c0_22, %c0_23] : memref<4x4x49x49xbf16, #tpu.memory_space<vmem>>, vector<1x1x49x49xbf16>
    %42 = vector.shape_cast %41 : vector<1x1x49x49xbf16> to vector<49x49xbf16>
    %43 = arith.extf %42 : vector<49x49xbf16> to vector<49x49xf32>
    %44 = arith.addf %40, %43 : vector<49x49xf32>
    %cst_24 = arith.constant dense<0xFF800000> : vector<49xf32>
    %45 = vector.multi_reduction <maximumf>, %44, %cst_24 [1] : vector<49x49xf32> to vector<49xf32>
    %46 = vector.shape_cast %45 : vector<49xf32> to vector<49x1xf32>
    %47 = vector.broadcast %46 : vector<49x1xf32> to vector<49x49xf32>
    %48 = arith.subf %44, %47 : vector<49x49xf32>
    %49 = math.exp %48 : vector<49x49xf32>
    %cst_25 = arith.constant dense<0.000000e+00> : vector<49xf32>
    %50 = vector.multi_reduction <add>, %49, %cst_25 [1] : vector<49x49xf32> to vector<49xf32>
    %51 = vector.shape_cast %50 : vector<49xf32> to vector<49x1xf32>
    %52 = arith.truncf %49 : vector<49x49xf32> to vector<49x49xbf16>
    %cst_26 = arith.constant dense<0.000000e+00> : vector<49x8xf32>
    %53 = tpu.matmul %52, %39, %cst_26 {dimension_numbers = #tpu.dot_dimension_numbers<[1], [0], [0], [1], [0, 0, 1, 1], [], []>} : vector<49x49xbf16>, vector<49x8xbf16>, vector<49x8xf32> -> vector<49x8xf32>
    %54 = tpu.reciprocal %51 {approx = true} : vector<49x1xf32> -> vector<49x1xf32>
    %55 = vector.broadcast %54 : vector<49x1xf32> to vector<49x8xf32>
    %56 = arith.mulf %53, %55 : vector<49x8xf32>
    %57 = arith.truncf %56 : vector<49x8xf32> to vector<49x8xbf16>
    %c8 = arith.constant 8 : index
    %c0_27 = arith.constant 0 : index
    %58 = vector.load %arg4[%c8, %c0_27] : memref<32x32xbf16, #tpu.memory_space<vmem>>, vector<8x32xbf16>
    %cst_28 = arith.constant dense<0.000000e+00> : vector<49x32xf32>
    %59 = tpu.matmul %57, %58, %cst_28 {dimension_numbers = #tpu.dot_dimension_numbers<[1], [0], [0], [1], [0, 0, 1, 1], [], []>} : vector<49x8xbf16>, vector<8x32xbf16>, vector<49x32xf32> -> vector<49x32xf32>
    %60 = arith.addf %36, %59 : vector<49x32xf32>
    %61 = vector.extract_strided_slice %12 {offsets = [0, 16], sizes = [49, 8], strides = [1, 1]} : vector<49x96xbf16> to vector<49x8xbf16>
    %62 = vector.extract_strided_slice %12 {offsets = [0, 48], sizes = [49, 8], strides = [1, 1]} : vector<49x96xbf16> to vector<49x8xbf16>
    %63 = vector.extract_strided_slice %12 {offsets = [0, 80], sizes = [49, 8], strides = [1, 1]} : vector<49x96xbf16> to vector<49x8xbf16>
    %cst_29 = arith.constant dense<0.000000e+00> : vector<49x49xf32>
    %64 = tpu.matmul %61, %62, %cst_29 {dimension_numbers = #tpu.dot_dimension_numbers<[1], [1], [0], [0], [0, 0, 1, 0], [], []>} : vector<49x8xbf16>, vector<49x8xbf16>, vector<49x49xf32> -> vector<49x49xf32>
    %c2 = arith.constant 2 : index
    %c0_30 = arith.constant 0 : index
    %c0_31 = arith.constant 0 : index
    %c0_32 = arith.constant 0 : index
    %65 = vector.load %arg6[%c2, %c0_30, %c0_31, %c0_32] : memref<4x4x49x49xbf16, #tpu.memory_space<vmem>>, vector<1x1x49x49xbf16>
    %66 = vector.shape_cast %65 : vector<1x1x49x49xbf16> to vector<49x49xbf16>
    %67 = arith.extf %66 : vector<49x49xbf16> to vector<49x49xf32>
    %68 = arith.addf %64, %67 : vector<49x49xf32>
    %cst_33 = arith.constant dense<0xFF800000> : vector<49xf32>
    %69 = vector.multi_reduction <maximumf>, %68, %cst_33 [1] : vector<49x49xf32> to vector<49xf32>
    %70 = vector.shape_cast %69 : vector<49xf32> to vector<49x1xf32>
    %71 = vector.broadcast %70 : vector<49x1xf32> to vector<49x49xf32>
    %72 = arith.subf %68, %71 : vector<49x49xf32>
    %73 = math.exp %72 : vector<49x49xf32>
    %cst_34 = arith.constant dense<0.000000e+00> : vector<49xf32>
    %74 = vector.multi_reduction <add>, %73, %cst_34 [1] : vector<49x49xf32> to vector<49xf32>
    %75 = vector.shape_cast %74 : vector<49xf32> to vector<49x1xf32>
    %76 = arith.truncf %73 : vector<49x49xf32> to vector<49x49xbf16>
    %cst_35 = arith.constant dense<0.000000e+00> : vector<49x8xf32>
    %77 = tpu.matmul %76, %63, %cst_35 {dimension_numbers = #tpu.dot_dimension_numbers<[1], [0], [0], [1], [0, 0, 1, 1], [], []>} : vector<49x49xbf16>, vector<49x8xbf16>, vector<49x8xf32> -> vector<49x8xf32>
    %78 = tpu.reciprocal %75 {approx = true} : vector<49x1xf32> -> vector<49x1xf32>
    %79 = vector.broadcast %78 : vector<49x1xf32> to vector<49x8xf32>
    %80 = arith.mulf %77, %79 : vector<49x8xf32>
    %81 = arith.truncf %80 : vector<49x8xf32> to vector<49x8xbf16>
    %c16 = arith.constant 16 : index
    %c0_36 = arith.constant 0 : index
    %82 = vector.load %arg4[%c16, %c0_36] : memref<32x32xbf16, #tpu.memory_space<vmem>>, vector<8x32xbf16>
    %cst_37 = arith.constant dense<0.000000e+00> : vector<49x32xf32>
    %83 = tpu.matmul %81, %82, %cst_37 {dimension_numbers = #tpu.dot_dimension_numbers<[1], [0], [0], [1], [0, 0, 1, 1], [], []>} : vector<49x8xbf16>, vector<8x32xbf16>, vector<49x32xf32> -> vector<49x32xf32>
    %84 = arith.addf %60, %83 : vector<49x32xf32>
    %85 = vector.extract_strided_slice %12 {offsets = [0, 24], sizes = [49, 8], strides = [1, 1]} : vector<49x96xbf16> to vector<49x8xbf16>
    %86 = vector.extract_strided_slice %12 {offsets = [0, 56], sizes = [49, 8], strides = [1, 1]} : vector<49x96xbf16> to vector<49x8xbf16>
    %87 = vector.extract_strided_slice %12 {offsets = [0, 88], sizes = [49, 8], strides = [1, 1]} : vector<49x96xbf16> to vector<49x8xbf16>
    %cst_38 = arith.constant dense<0.000000e+00> : vector<49x49xf32>
    %88 = tpu.matmul %85, %86, %cst_38 {dimension_numbers = #tpu.dot_dimension_numbers<[1], [1], [0], [0], [0, 0, 1, 0], [], []>} : vector<49x8xbf16>, vector<49x8xbf16>, vector<49x49xf32> -> vector<49x49xf32>
    %c3 = arith.constant 3 : index
    %c0_39 = arith.constant 0 : index
    %c0_40 = arith.constant 0 : index
    %c0_41 = arith.constant 0 : index
    %89 = vector.load %arg6[%c3, %c0_39, %c0_40, %c0_41] : memref<4x4x49x49xbf16, #tpu.memory_space<vmem>>, vector<1x1x49x49xbf16>
    %90 = vector.shape_cast %89 : vector<1x1x49x49xbf16> to vector<49x49xbf16>
    %91 = arith.extf %90 : vector<49x49xbf16> to vector<49x49xf32>
    %92 = arith.addf %88, %91 : vector<49x49xf32>
    %cst_42 = arith.constant dense<0xFF800000> : vector<49xf32>
    %93 = vector.multi_reduction <maximumf>, %92, %cst_42 [1] : vector<49x49xf32> to vector<49xf32>
    %94 = vector.shape_cast %93 : vector<49xf32> to vector<49x1xf32>
    %95 = vector.broadcast %94 : vector<49x1xf32> to vector<49x49xf32>
    %96 = arith.subf %92, %95 : vector<49x49xf32>
    %97 = math.exp %96 : vector<49x49xf32>
    %cst_43 = arith.constant dense<0.000000e+00> : vector<49xf32>
    %98 = vector.multi_reduction <add>, %97, %cst_43 [1] : vector<49x49xf32> to vector<49xf32>
    %99 = vector.shape_cast %98 : vector<49xf32> to vector<49x1xf32>
    %100 = arith.truncf %97 : vector<49x49xf32> to vector<49x49xbf16>
    %cst_44 = arith.constant dense<0.000000e+00> : vector<49x8xf32>
    %101 = tpu.matmul %100, %87, %cst_44 {dimension_numbers = #tpu.dot_dimension_numbers<[1], [0], [0], [1], [0, 0, 1, 1], [], []>} : vector<49x49xbf16>, vector<49x8xbf16>, vector<49x8xf32> -> vector<49x8xf32>
    %102 = tpu.reciprocal %99 {approx = true} : vector<49x1xf32> -> vector<49x1xf32>
    %103 = vector.broadcast %102 : vector<49x1xf32> to vector<49x8xf32>
    %104 = arith.mulf %101, %103 : vector<49x8xf32>
    %105 = arith.truncf %104 : vector<49x8xf32> to vector<49x8xbf16>
    %c24 = arith.constant 24 : index
    %c0_45 = arith.constant 0 : index
    %106 = vector.load %arg4[%c24, %c0_45] : memref<32x32xbf16, #tpu.memory_space<vmem>>, vector<8x32xbf16>
    %cst_46 = arith.constant dense<0.000000e+00> : vector<49x32xf32>
    %107 = tpu.matmul %105, %106, %cst_46 {dimension_numbers = #tpu.dot_dimension_numbers<[1], [0], [0], [1], [0, 0, 1, 1], [], []>} : vector<49x8xbf16>, vector<8x32xbf16>, vector<49x32xf32> -> vector<49x32xf32>
    %108 = arith.addf %84, %107 : vector<49x32xf32>
    %c0_47 = arith.constant 0 : index
    %c0_48 = arith.constant 0 : index
    %c0_49 = arith.constant 0 : index
    %c0_50 = arith.constant 0 : index
    %109 = vector.load %arg7[%c0_47, %c0_48, %c0_49, %c0_50] : memref<1x4x49x32xf32, #tpu.memory_space<vmem>>, vector<1x1x49x32xf32>
    %110 = vector.shape_cast %109 : vector<1x1x49x32xf32> to vector<49x32xf32>
    %111 = vector.shape_cast %108 : vector<49x32xf32> to vector<1x1x49x32xf32>
    tpu.vector_store %arg7[%c0_47, %c0_48, %c0_49, %c0_50], %111 {strides = array<i32>} : memref<1x4x49x32xf32, #tpu.memory_space<vmem>>, vector<1x1x49x32xf32>,
    %c0_51 = arith.constant 0 : index
    %c1_52 = arith.constant 1 : index
    %c0_53 = arith.constant 0 : index
    %c0_54 = arith.constant 0 : index
    %112 = vector.load %arg1[%c0_51, %c1_52, %c0_53, %c0_54] : memref<1x4x49x32xf32, #tpu.memory_space<vmem>>, vector<1x1x49x32xf32>
    %113 = vector.shape_cast %112 : vector<1x1x49x32xf32> to vector<49x32xf32>
    %114 = arith.truncf %113 : vector<49x32xf32> to vector<49x32xbf16>
    %cst_55 = arith.constant dense<0.000000e+00> : vector<49x96xf32>
    %115 = tpu.matmul %114, %0, %cst_55 {dimension_numbers = #tpu.dot_dimension_numbers<[1], [0], [0], [1], [0, 0, 1, 1], [], []>} : vector<49x32xbf16>, vector<32x96xbf16>, vector<49x96xf32> -> vector<49x96xf32>
    %116 = arith.addf %115, %3 : vector<49x96xf32>
    %117 = arith.truncf %116 : vector<49x96xf32> to vector<49x96xbf16>
    %118 = vector.extract_strided_slice %117 {offsets = [0, 0], sizes = [49, 8], strides = [1, 1]} : vector<49x96xbf16> to vector<49x8xbf16>
    %119 = vector.extract_strided_slice %117 {offsets = [0, 32], sizes = [49, 8], strides = [1, 1]} : vector<49x96xbf16> to vector<49x8xbf16>
    %120 = vector.extract_strided_slice %117 {offsets = [0, 64], sizes = [49, 8], strides = [1, 1]} : vector<49x96xbf16> to vector<49x8xbf16>
    %cst_56 = arith.constant dense<0.000000e+00> : vector<49x49xf32>
    %121 = tpu.matmul %118, %119, %cst_56 {dimension_numbers = #tpu.dot_dimension_numbers<[1], [1], [0], [0], [0, 0, 1, 0], [], []>} : vector<49x8xbf16>, vector<49x8xbf16>, vector<49x49xf32> -> vector<49x49xf32>
    %c0_57 = arith.constant 0 : index
    %c1_58 = arith.constant 1 : index
    %c0_59 = arith.constant 0 : index
    %c0_60 = arith.constant 0 : index
    %122 = vector.load %arg6[%c0_57, %c1_58, %c0_59, %c0_60] : memref<4x4x49x49xbf16, #tpu.memory_space<vmem>>, vector<1x1x49x49xbf16>
    %123 = vector.shape_cast %122 : vector<1x1x49x49xbf16> to vector<49x49xbf16>
    %124 = arith.extf %123 : vector<49x49xbf16> to vector<49x49xf32>
    %125 = arith.addf %121, %124 : vector<49x49xf32>
    %cst_61 = arith.constant dense<0xFF800000> : vector<49xf32>
    %126 = vector.multi_reduction <maximumf>, %125, %cst_61 [1] : vector<49x49xf32> to vector<49xf32>
    %127 = vector.shape_cast %126 : vector<49xf32> to vector<49x1xf32>
    %128 = vector.broadcast %127 : vector<49x1xf32> to vector<49x49xf32>
    %129 = arith.subf %125, %128 : vector<49x49xf32>
    %130 = math.exp %129 : vector<49x49xf32>
    %cst_62 = arith.constant dense<0.000000e+00> : vector<49xf32>
    %131 = vector.multi_reduction <add>, %130, %cst_62 [1] : vector<49x49xf32> to vector<49xf32>
    %132 = vector.shape_cast %131 : vector<49xf32> to vector<49x1xf32>
    %133 = arith.truncf %130 : vector<49x49xf32> to vector<49x49xbf16>
    %cst_63 = arith.constant dense<0.000000e+00> : vector<49x8xf32>
    %134 = tpu.matmul %133, %120, %cst_63 {dimension_numbers = #tpu.dot_dimension_numbers<[1], [0], [0], [1], [0, 0, 1, 1], [], []>} : vector<49x49xbf16>, vector<49x8xbf16>, vector<49x8xf32> -> vector<49x8xf32>
    %135 = tpu.reciprocal %132 {approx = true} : vector<49x1xf32> -> vector<49x1xf32>
    %136 = vector.broadcast %135 : vector<49x1xf32> to vector<49x8xf32>
    %137 = arith.mulf %134, %136 : vector<49x8xf32>
    %138 = arith.truncf %137 : vector<49x8xf32> to vector<49x8xbf16>
    %c0_64 = arith.constant 0 : index
    %c0_65 = arith.constant 0 : index
    %139 = vector.load %arg4[%c0_64, %c0_65] : memref<32x32xbf16, #tpu.memory_space<vmem>>, vector<8x32xbf16>
    %cst_66 = arith.constant dense<0.000000e+00> : vector<49x32xf32>
    %140 = tpu.matmul %138, %139, %cst_66 {dimension_numbers = #tpu.dot_dimension_numbers<[1], [0], [0], [1], [0, 0, 1, 1], [], []>} : vector<49x8xbf16>, vector<8x32xbf16>, vector<49x32xf32> -> vector<49x32xf32>
    %141 = arith.addf %6, %140 : vector<49x32xf32>
    %142 = vector.extract_strided_slice %117 {offsets = [0, 8], sizes = [49, 8], strides = [1, 1]} : vector<49x96xbf16> to vector<49x8xbf16>
    %143 = vector.extract_strided_slice %117 {offsets = [0, 40], sizes = [49, 8], strides = [1, 1]} : vector<49x96xbf16> to vector<49x8xbf16>
    %144 = vector.extract_strided_slice %117 {offsets = [0, 72], sizes = [49, 8], strides = [1, 1]} : vector<49x96xbf16> to vector<49x8xbf16>
    %cst_67 = arith.constant dense<0.000000e+00> : vector<49x49xf32>
    %145 = tpu.matmul %142, %143, %cst_67 {dimension_numbers = #tpu.dot_dimension_numbers<[1], [1], [0], [0], [0, 0, 1, 0], [], []>} : vector<49x8xbf16>, vector<49x8xbf16>, vector<49x49xf32> -> vector<49x49xf32>
    %c1_68 = arith.constant 1 : index
    %c1_69 = arith.constant 1 : index
    %c0_70 = arith.constant 0 : index
    %c0_71 = arith.constant 0 : index
    %146 = vector.load %arg6[%c1_68, %c1_69, %c0_70, %c0_71] : memref<4x4x49x49xbf16, #tpu.memory_space<vmem>>, vector<1x1x49x49xbf16>
    %147 = vector.shape_cast %146 : vector<1x1x49x49xbf16> to vector<49x49xbf16>
    %148 = arith.extf %147 : vector<49x49xbf16> to vector<49x49xf32>
    %149 = arith.addf %145, %148 : vector<49x49xf32>
    %cst_72 = arith.constant dense<0xFF800000> : vector<49xf32>
    %150 = vector.multi_reduction <maximumf>, %149, %cst_72 [1] : vector<49x49xf32> to vector<49xf32>
    %151 = vector.shape_cast %150 : vector<49xf32> to vector<49x1xf32>
    %152 = vector.broadcast %151 : vector<49x1xf32> to vector<49x49xf32>
    %153 = arith.subf %149, %152 : vector<49x49xf32>
    %154 = math.exp %153 : vector<49x49xf32>
    %cst_73 = arith.constant dense<0.000000e+00> : vector<49xf32>
    %155 = vector.multi_reduction <add>, %154, %cst_73 [1] : vector<49x49xf32> to vector<49xf32>
    %156 = vector.shape_cast %155 : vector<49xf32> to vector<49x1xf32>
    %157 = arith.truncf %154 : vector<49x49xf32> to vector<49x49xbf16>
    %cst_74 = arith.constant dense<0.000000e+00> : vector<49x8xf32>
    %158 = tpu.matmul %157, %144, %cst_74 {dimension_numbers = #tpu.dot_dimension_numbers<[1], [0], [0], [1], [0, 0, 1, 1], [], []>} : vector<49x49xbf16>, vector<49x8xbf16>, vector<49x8xf32> -> vector<49x8xf32>
    %159 = tpu.reciprocal %156 {approx = true} : vector<49x1xf32> -> vector<49x1xf32>
    %160 = vector.broadcast %159 : vector<49x1xf32> to vector<49x8xf32>
    %161 = arith.mulf %158, %160 : vector<49x8xf32>
    %162 = arith.truncf %161 : vector<49x8xf32> to vector<49x8xbf16>
    %c8_75 = arith.constant 8 : index
    %c0_76 = arith.constant 0 : index
    %163 = vector.load %arg4[%c8_75, %c0_76] : memref<32x32xbf16, #tpu.memory_space<vmem>>, vector<8x32xbf16>
    %cst_77 = arith.constant dense<0.000000e+00> : vector<49x32xf32>
    %164 = tpu.matmul %162, %163, %cst_77 {dimension_numbers = #tpu.dot_dimension_numbers<[1], [0], [0], [1], [0, 0, 1, 1], [], []>} : vector<49x8xbf16>, vector<8x32xbf16>, vector<49x32xf32> -> vector<49x32xf32>
    %165 = arith.addf %141, %164 : vector<49x32xf32>
    %166 = vector.extract_strided_slice %117 {offsets = [0, 16], sizes = [49, 8], strides = [1, 1]} : vector<49x96xbf16> to vector<49x8xbf16>
    %167 = vector.extract_strided_slice %117 {offsets = [0, 48], sizes = [49, 8], strides = [1, 1]} : vector<49x96xbf16> to vector<49x8xbf16>
    %168 = vector.extract_strided_slice %117 {offsets = [0, 80], sizes = [49, 8], strides = [1, 1]} : vector<49x96xbf16> to vector<49x8xbf16>
    %cst_78 = arith.constant dense<0.000000e+00> : vector<49x49xf32>
    %169 = tpu.matmul %166, %167, %cst_78 {dimension_numbers = #tpu.dot_dimension_numbers<[1], [1], [0], [0], [0, 0, 1, 0], [], []>} : vector<49x8xbf16>, vector<49x8xbf16>, vector<49x49xf32> -> vector<49x49xf32>
    %c2_79 = arith.constant 2 : index
    %c1_80 = arith.constant 1 : index
    %c0_81 = arith.constant 0 : index
    %c0_82 = arith.constant 0 : index
    %170 = vector.load %arg6[%c2_79, %c1_80, %c0_81, %c0_82] : memref<4x4x49x49xbf16, #tpu.memory_space<vmem>>, vector<1x1x49x49xbf16>
    %171 = vector.shape_cast %170 : vector<1x1x49x49xbf16> to vector<49x49xbf16>
    %172 = arith.extf %171 : vector<49x49xbf16> to vector<49x49xf32>
    %173 = arith.addf %169, %172 : vector<49x49xf32>
    %cst_83 = arith.constant dense<0xFF800000> : vector<49xf32>
    %174 = vector.multi_reduction <maximumf>, %173, %cst_83 [1] : vector<49x49xf32> to vector<49xf32>
    %175 = vector.shape_cast %174 : vector<49xf32> to vector<49x1xf32>
    %176 = vector.broadcast %175 : vector<49x1xf32> to vector<49x49xf32>
    %177 = arith.subf %173, %176 : vector<49x49xf32>
    %178 = math.exp %177 : vector<49x49xf32>
    %cst_84 = arith.constant dense<0.000000e+00> : vector<49xf32>
    %179 = vector.multi_reduction <add>, %178, %cst_84 [1] : vector<49x49xf32> to vector<49xf32>
    %180 = vector.shape_cast %179 : vector<49xf32> to vector<49x1xf32>
    %181 = arith.truncf %178 : vector<49x49xf32> to vector<49x49xbf16>
    %cst_85 = arith.constant dense<0.000000e+00> : vector<49x8xf32>
    %182 = tpu.matmul %181, %168, %cst_85 {dimension_numbers = #tpu.dot_dimension_numbers<[1], [0], [0], [1], [0, 0, 1, 1], [], []>} : vector<49x49xbf16>, vector<49x8xbf16>, vector<49x8xf32> -> vector<49x8xf32>
    %183 = tpu.reciprocal %180 {approx = true} : vector<49x1xf32> -> vector<49x1xf32>
    %184 = vector.broadcast %183 : vector<49x1xf32> to vector<49x8xf32>
    %185 = arith.mulf %182, %184 : vector<49x8xf32>
    %186 = arith.truncf %185 : vector<49x8xf32> to vector<49x8xbf16>
    %c16_86 = arith.constant 16 : index
    %c0_87 = arith.constant 0 : index
    %187 = vector.load %arg4[%c16_86, %c0_87] : memref<32x32xbf16, #tpu.memory_space<vmem>>, vector<8x32xbf16>
    %cst_88 = arith.constant dense<0.000000e+00> : vector<49x32xf32>
    %188 = tpu.matmul %186, %187, %cst_88 {dimension_numbers = #tpu.dot_dimension_numbers<[1], [0], [0], [1], [0, 0, 1, 1], [], []>} : vector<49x8xbf16>, vector<8x32xbf16>, vector<49x32xf32> -> vector<49x32xf32>
    %189 = arith.addf %165, %188 : vector<49x32xf32>
    %190 = vector.extract_strided_slice %117 {offsets = [0, 24], sizes = [49, 8], strides = [1, 1]} : vector<49x96xbf16> to vector<49x8xbf16>
    %191 = vector.extract_strided_slice %117 {offsets = [0, 56], sizes = [49, 8], strides = [1, 1]} : vector<49x96xbf16> to vector<49x8xbf16>
    %192 = vector.extract_strided_slice %117 {offsets = [0, 88], sizes = [49, 8], strides = [1, 1]} : vector<49x96xbf16> to vector<49x8xbf16>
    %cst_89 = arith.constant dense<0.000000e+00> : vector<49x49xf32>
    %193 = tpu.matmul %190, %191, %cst_89 {dimension_numbers = #tpu.dot_dimension_numbers<[1], [1], [0], [0], [0, 0, 1, 0], [], []>} : vector<49x8xbf16>, vector<49x8xbf16>, vector<49x49xf32> -> vector<49x49xf32>
    %c3_90 = arith.constant 3 : index
    %c1_91 = arith.constant 1 : index
    %c0_92 = arith.constant 0 : index
    %c0_93 = arith.constant 0 : index
    %194 = vector.load %arg6[%c3_90, %c1_91, %c0_92, %c0_93] : memref<4x4x49x49xbf16, #tpu.memory_space<vmem>>, vector<1x1x49x49xbf16>
    %195 = vector.shape_cast %194 : vector<1x1x49x49xbf16> to vector<49x49xbf16>
    %196 = arith.extf %195 : vector<49x49xbf16> to vector<49x49xf32>
    %197 = arith.addf %193, %196 : vector<49x49xf32>
    %cst_94 = arith.constant dense<0xFF800000> : vector<49xf32>
    %198 = vector.multi_reduction <maximumf>, %197, %cst_94 [1] : vector<49x49xf32> to vector<49xf32>
    %199 = vector.shape_cast %198 : vector<49xf32> to vector<49x1xf32>
    %200 = vector.broadcast %199 : vector<49x1xf32> to vector<49x49xf32>
    %201 = arith.subf %197, %200 : vector<49x49xf32>
    %202 = math.exp %201 : vector<49x49xf32>
    %cst_95 = arith.constant dense<0.000000e+00> : vector<49xf32>
    %203 = vector.multi_reduction <add>, %202, %cst_95 [1] : vector<49x49xf32> to vector<49xf32>
    %204 = vector.shape_cast %203 : vector<49xf32> to vector<49x1xf32>
    %205 = arith.truncf %202 : vector<49x49xf32> to vector<49x49xbf16>
    %cst_96 = arith.constant dense<0.000000e+00> : vector<49x8xf32>
    %206 = tpu.matmul %205, %192, %cst_96 {dimension_numbers = #tpu.dot_dimension_numbers<[1], [0], [0], [1], [0, 0, 1, 1], [], []>} : vector<49x49xbf16>, vector<49x8xbf16>, vector<49x8xf32> -> vector<49x8xf32>
    %207 = tpu.reciprocal %204 {approx = true} : vector<49x1xf32> -> vector<49x1xf32>
    %208 = vector.broadcast %207 : vector<49x1xf32> to vector<49x8xf32>
    %209 = arith.mulf %206, %208 : vector<49x8xf32>
    %210 = arith.truncf %209 : vector<49x8xf32> to vector<49x8xbf16>
    %c24_97 = arith.constant 24 : index
    %c0_98 = arith.constant 0 : index
    %211 = vector.load %arg4[%c24_97, %c0_98] : memref<32x32xbf16, #tpu.memory_space<vmem>>, vector<8x32xbf16>
    %cst_99 = arith.constant dense<0.000000e+00> : vector<49x32xf32>
    %212 = tpu.matmul %210, %211, %cst_99 {dimension_numbers = #tpu.dot_dimension_numbers<[1], [0], [0], [1], [0, 0, 1, 1], [], []>} : vector<49x8xbf16>, vector<8x32xbf16>, vector<49x32xf32> -> vector<49x32xf32>
    %213 = arith.addf %189, %212 : vector<49x32xf32>
    %c0_100 = arith.constant 0 : index
    %c1_101 = arith.constant 1 : index
    %c0_102 = arith.constant 0 : index
    %c0_103 = arith.constant 0 : index
    %214 = vector.load %arg7[%c0_100, %c1_101, %c0_102, %c0_103] : memref<1x4x49x32xf32, #tpu.memory_space<vmem>>, vector<1x1x49x32xf32>
    %215 = vector.shape_cast %214 : vector<1x1x49x32xf32> to vector<49x32xf32>
    %216 = vector.shape_cast %213 : vector<49x32xf32> to vector<1x1x49x32xf32>
    tpu.vector_store %arg7[%c0_100, %c1_101, %c0_102, %c0_103], %216 {strides = array<i32>} : memref<1x4x49x32xf32, #tpu.memory_space<vmem>>, vector<1x1x49x32xf32>,
    %c0_104 = arith.constant 0 : index
    %c2_105 = arith.constant 2 : index
    %c0_106 = arith.constant 0 : index
    %c0_107 = arith.constant 0 : index
    %217 = vector.load %arg1[%c0_104, %c2_105, %c0_106, %c0_107] : memref<1x4x49x32xf32, #tpu.memory_space<vmem>>, vector<1x1x49x32xf32>
    %218 = vector.shape_cast %217 : vector<1x1x49x32xf32> to vector<49x32xf32>
    %219 = arith.truncf %218 : vector<49x32xf32> to vector<49x32xbf16>
    %cst_108 = arith.constant dense<0.000000e+00> : vector<49x96xf32>
    %220 = tpu.matmul %219, %0, %cst_108 {dimension_numbers = #tpu.dot_dimension_numbers<[1], [0], [0], [1], [0, 0, 1, 1], [], []>} : vector<49x32xbf16>, vector<32x96xbf16>, vector<49x96xf32> -> vector<49x96xf32>
    %221 = arith.addf %220, %3 : vector<49x96xf32>
    %222 = arith.truncf %221 : vector<49x96xf32> to vector<49x96xbf16>
    %223 = vector.extract_strided_slice %222 {offsets = [0, 0], sizes = [49, 8], strides = [1, 1]} : vector<49x96xbf16> to vector<49x8xbf16>
    %224 = vector.extract_strided_slice %222 {offsets = [0, 32], sizes = [49, 8], strides = [1, 1]} : vector<49x96xbf16> to vector<49x8xbf16>
    %225 = vector.extract_strided_slice %222 {offsets = [0, 64], sizes = [49, 8], strides = [1, 1]} : vector<49x96xbf16> to vector<49x8xbf16>
    %cst_109 = arith.constant dense<0.000000e+00> : vector<49x49xf32>
    %226 = tpu.matmul %223, %224, %cst_109 {dimension_numbers = #tpu.dot_dimension_numbers<[1], [1], [0], [0], [0, 0, 1, 0], [], []>} : vector<49x8xbf16>, vector<49x8xbf16>, vector<49x49xf32> -> vector<49x49xf32>
    %c0_110 = arith.constant 0 : index
    %c2_111 = arith.constant 2 : index
    %c0_112 = arith.constant 0 : index
    %c0_113 = arith.constant 0 : index
    %227 = vector.load %arg6[%c0_110, %c2_111, %c0_112, %c0_113] : memref<4x4x49x49xbf16, #tpu.memory_space<vmem>>, vector<1x1x49x49xbf16>
    %228 = vector.shape_cast %227 : vector<1x1x49x49xbf16> to vector<49x49xbf16>
    %229 = arith.extf %228 : vector<49x49xbf16> to vector<49x49xf32>
    %230 = arith.addf %226, %229 : vector<49x49xf32>
    %cst_114 = arith.constant dense<0xFF800000> : vector<49xf32>
    %231 = vector.multi_reduction <maximumf>, %230, %cst_114 [1] : vector<49x49xf32> to vector<49xf32>
    %232 = vector.shape_cast %231 : vector<49xf32> to vector<49x1xf32>
    %233 = vector.broadcast %232 : vector<49x1xf32> to vector<49x49xf32>
    %234 = arith.subf %230, %233 : vector<49x49xf32>
    %235 = math.exp %234 : vector<49x49xf32>
    %cst_115 = arith.constant dense<0.000000e+00> : vector<49xf32>
    %236 = vector.multi_reduction <add>, %235, %cst_115 [1] : vector<49x49xf32> to vector<49xf32>
    %237 = vector.shape_cast %236 : vector<49xf32> to vector<49x1xf32>
    %238 = arith.truncf %235 : vector<49x49xf32> to vector<49x49xbf16>
    %cst_116 = arith.constant dense<0.000000e+00> : vector<49x8xf32>
    %239 = tpu.matmul %238, %225, %cst_116 {dimension_numbers = #tpu.dot_dimension_numbers<[1], [0], [0], [1], [0, 0, 1, 1], [], []>} : vector<49x49xbf16>, vector<49x8xbf16>, vector<49x8xf32> -> vector<49x8xf32>
    %240 = tpu.reciprocal %237 {approx = true} : vector<49x1xf32> -> vector<49x1xf32>
    %241 = vector.broadcast %240 : vector<49x1xf32> to vector<49x8xf32>
    %242 = arith.mulf %239, %241 : vector<49x8xf32>
    %243 = arith.truncf %242 : vector<49x8xf32> to vector<49x8xbf16>
    %c0_117 = arith.constant 0 : index
    %c0_118 = arith.constant 0 : index
    %244 = vector.load %arg4[%c0_117, %c0_118] : memref<32x32xbf16, #tpu.memory_space<vmem>>, vector<8x32xbf16>
    %cst_119 = arith.constant dense<0.000000e+00> : vector<49x32xf32>
    %245 = tpu.matmul %243, %244, %cst_119 {dimension_numbers = #tpu.dot_dimension_numbers<[1], [0], [0], [1], [0, 0, 1, 1], [], []>} : vector<49x8xbf16>, vector<8x32xbf16>, vector<49x32xf32> -> vector<49x32xf32>
    %246 = arith.addf %6, %245 : vector<49x32xf32>
    %247 = vector.extract_strided_slice %222 {offsets = [0, 8], sizes = [49, 8], strides = [1, 1]} : vector<49x96xbf16> to vector<49x8xbf16>
    %248 = vector.extract_strided_slice %222 {offsets = [0, 40], sizes = [49, 8], strides = [1, 1]} : vector<49x96xbf16> to vector<49x8xbf16>
    %249 = vector.extract_strided_slice %222 {offsets = [0, 72], sizes = [49, 8], strides = [1, 1]} : vector<49x96xbf16> to vector<49x8xbf16>
    %cst_120 = arith.constant dense<0.000000e+00> : vector<49x49xf32>
    %250 = tpu.matmul %247, %248, %cst_120 {dimension_numbers = #tpu.dot_dimension_numbers<[1], [1], [0], [0], [0, 0, 1, 0], [], []>} : vector<49x8xbf16>, vector<49x8xbf16>, vector<49x49xf32> -> vector<49x49xf32>
    %c1_121 = arith.constant 1 : index
    %c2_122 = arith.constant 2 : index
    %c0_123 = arith.constant 0 : index
    %c0_124 = arith.constant 0 : index
    %251 = vector.load %arg6[%c1_121, %c2_122, %c0_123, %c0_124] : memref<4x4x49x49xbf16, #tpu.memory_space<vmem>>, vector<1x1x49x49xbf16>
    %252 = vector.shape_cast %251 : vector<1x1x49x49xbf16> to vector<49x49xbf16>
    %253 = arith.extf %252 : vector<49x49xbf16> to vector<49x49xf32>
    %254 = arith.addf %250, %253 : vector<49x49xf32>
    %cst_125 = arith.constant dense<0xFF800000> : vector<49xf32>
    %255 = vector.multi_reduction <maximumf>, %254, %cst_125 [1] : vector<49x49xf32> to vector<49xf32>
    %256 = vector.shape_cast %255 : vector<49xf32> to vector<49x1xf32>
    %257 = vector.broadcast %256 : vector<49x1xf32> to vector<49x49xf32>
    %258 = arith.subf %254, %257 : vector<49x49xf32>
    %259 = math.exp %258 : vector<49x49xf32>
    %cst_126 = arith.constant dense<0.000000e+00> : vector<49xf32>
    %260 = vector.multi_reduction <add>, %259, %cst_126 [1] : vector<49x49xf32> to vector<49xf32>
    %261 = vector.shape_cast %260 : vector<49xf32> to vector<49x1xf32>
    %262 = arith.truncf %259 : vector<49x49xf32> to vector<49x49xbf16>
    %cst_127 = arith.constant dense<0.000000e+00> : vector<49x8xf32>
    %263 = tpu.matmul %262, %249, %cst_127 {dimension_numbers = #tpu.dot_dimension_numbers<[1], [0], [0], [1], [0, 0, 1, 1], [], []>} : vector<49x49xbf16>, vector<49x8xbf16>, vector<49x8xf32> -> vector<49x8xf32>
    %264 = tpu.reciprocal %261 {approx = true} : vector<49x1xf32> -> vector<49x1xf32>
    %265 = vector.broadcast %264 : vector<49x1xf32> to vector<49x8xf32>
    %266 = arith.mulf %263, %265 : vector<49x8xf32>
    %267 = arith.truncf %266 : vector<49x8xf32> to vector<49x8xbf16>
    %c8_128 = arith.constant 8 : index
    %c0_129 = arith.constant 0 : index
    %268 = vector.load %arg4[%c8_128, %c0_129] : memref<32x32xbf16, #tpu.memory_space<vmem>>, vector<8x32xbf16>
    %cst_130 = arith.constant dense<0.000000e+00> : vector<49x32xf32>
    %269 = tpu.matmul %267, %268, %cst_130 {dimension_numbers = #tpu.dot_dimension_numbers<[1], [0], [0], [1], [0, 0, 1, 1], [], []>} : vector<49x8xbf16>, vector<8x32xbf16>, vector<49x32xf32> -> vector<49x32xf32>
    %270 = arith.addf %246, %269 : vector<49x32xf32>
    %271 = vector.extract_strided_slice %222 {offsets = [0, 16], sizes = [49, 8], strides = [1, 1]} : vector<49x96xbf16> to vector<49x8xbf16>
    %272 = vector.extract_strided_slice %222 {offsets = [0, 48], sizes = [49, 8], strides = [1, 1]} : vector<49x96xbf16> to vector<49x8xbf16>
    %273 = vector.extract_strided_slice %222 {offsets = [0, 80], sizes = [49, 8], strides = [1, 1]} : vector<49x96xbf16> to vector<49x8xbf16>
    %cst_131 = arith.constant dense<0.000000e+00> : vector<49x49xf32>
    %274 = tpu.matmul %271, %272, %cst_131 {dimension_numbers = #tpu.dot_dimension_numbers<[1], [1], [0], [0], [0, 0, 1, 0], [], []>} : vector<49x8xbf16>, vector<49x8xbf16>, vector<49x49xf32> -> vector<49x49xf32>
    %c2_132 = arith.constant 2 : index
    %c2_133 = arith.constant 2 : index
    %c0_134 = arith.constant 0 : index
    %c0_135 = arith.constant 0 : index
    %275 = vector.load %arg6[%c2_132, %c2_133, %c0_134, %c0_135] : memref<4x4x49x49xbf16, #tpu.memory_space<vmem>>, vector<1x1x49x49xbf16>
    %276 = vector.shape_cast %275 : vector<1x1x49x49xbf16> to vector<49x49xbf16>
    %277 = arith.extf %276 : vector<49x49xbf16> to vector<49x49xf32>
    %278 = arith.addf %274, %277 : vector<49x49xf32>
    %cst_136 = arith.constant dense<0xFF800000> : vector<49xf32>
    %279 = vector.multi_reduction <maximumf>, %278, %cst_136 [1] : vector<49x49xf32> to vector<49xf32>
    %280 = vector.shape_cast %279 : vector<49xf32> to vector<49x1xf32>
    %281 = vector.broadcast %280 : vector<49x1xf32> to vector<49x49xf32>
    %282 = arith.subf %278, %281 : vector<49x49xf32>
    %283 = math.exp %282 : vector<49x49xf32>
    %cst_137 = arith.constant dense<0.000000e+00> : vector<49xf32>
    %284 = vector.multi_reduction <add>, %283, %cst_137 [1] : vector<49x49xf32> to vector<49xf32>
    %285 = vector.shape_cast %284 : vector<49xf32> to vector<49x1xf32>
    %286 = arith.truncf %283 : vector<49x49xf32> to vector<49x49xbf16>
    %cst_138 = arith.constant dense<0.000000e+00> : vector<49x8xf32>
    %287 = tpu.matmul %286, %273, %cst_138 {dimension_numbers = #tpu.dot_dimension_numbers<[1], [0], [0], [1], [0, 0, 1, 1], [], []>} : vector<49x49xbf16>, vector<49x8xbf16>, vector<49x8xf32> -> vector<49x8xf32>
    %288 = tpu.reciprocal %285 {approx = true} : vector<49x1xf32> -> vector<49x1xf32>
    %289 = vector.broadcast %288 : vector<49x1xf32> to vector<49x8xf32>
    %290 = arith.mulf %287, %289 : vector<49x8xf32>
    %291 = arith.truncf %290 : vector<49x8xf32> to vector<49x8xbf16>
    %c16_139 = arith.constant 16 : index
    %c0_140 = arith.constant 0 : index
    %292 = vector.load %arg4[%c16_139, %c0_140] : memref<32x32xbf16, #tpu.memory_space<vmem>>, vector<8x32xbf16>
    %cst_141 = arith.constant dense<0.000000e+00> : vector<49x32xf32>
    %293 = tpu.matmul %291, %292, %cst_141 {dimension_numbers = #tpu.dot_dimension_numbers<[1], [0], [0], [1], [0, 0, 1, 1], [], []>} : vector<49x8xbf16>, vector<8x32xbf16>, vector<49x32xf32> -> vector<49x32xf32>
    %294 = arith.addf %270, %293 : vector<49x32xf32>
    %295 = vector.extract_strided_slice %222 {offsets = [0, 24], sizes = [49, 8], strides = [1, 1]} : vector<49x96xbf16> to vector<49x8xbf16>
    %296 = vector.extract_strided_slice %222 {offsets = [0, 56], sizes = [49, 8], strides = [1, 1]} : vector<49x96xbf16> to vector<49x8xbf16>
    %297 = vector.extract_strided_slice %222 {offsets = [0, 88], sizes = [49, 8], strides = [1, 1]} : vector<49x96xbf16> to vector<49x8xbf16>
    %cst_142 = arith.constant dense<0.000000e+00> : vector<49x49xf32>
    %298 = tpu.matmul %295, %296, %cst_142 {dimension_numbers = #tpu.dot_dimension_numbers<[1], [1], [0], [0], [0, 0, 1, 0], [], []>} : vector<49x8xbf16>, vector<49x8xbf16>, vector<49x49xf32> -> vector<49x49xf32>
    %c3_143 = arith.constant 3 : index
    %c2_144 = arith.constant 2 : index
    %c0_145 = arith.constant 0 : index
    %c0_146 = arith.constant 0 : index
    %299 = vector.load %arg6[%c3_143, %c2_144, %c0_145, %c0_146] : memref<4x4x49x49xbf16, #tpu.memory_space<vmem>>, vector<1x1x49x49xbf16>
    %300 = vector.shape_cast %299 : vector<1x1x49x49xbf16> to vector<49x49xbf16>
    %301 = arith.extf %300 : vector<49x49xbf16> to vector<49x49xf32>
    %302 = arith.addf %298, %301 : vector<49x49xf32>
    %cst_147 = arith.constant dense<0xFF800000> : vector<49xf32>
    %303 = vector.multi_reduction <maximumf>, %302, %cst_147 [1] : vector<49x49xf32> to vector<49xf32>
    %304 = vector.shape_cast %303 : vector<49xf32> to vector<49x1xf32>
    %305 = vector.broadcast %304 : vector<49x1xf32> to vector<49x49xf32>
    %306 = arith.subf %302, %305 : vector<49x49xf32>
    %307 = math.exp %306 : vector<49x49xf32>
    %cst_148 = arith.constant dense<0.000000e+00> : vector<49xf32>
    %308 = vector.multi_reduction <add>, %307, %cst_148 [1] : vector<49x49xf32> to vector<49xf32>
    %309 = vector.shape_cast %308 : vector<49xf32> to vector<49x1xf32>
    %310 = arith.truncf %307 : vector<49x49xf32> to vector<49x49xbf16>
    %cst_149 = arith.constant dense<0.000000e+00> : vector<49x8xf32>
    %311 = tpu.matmul %310, %297, %cst_149 {dimension_numbers = #tpu.dot_dimension_numbers<[1], [0], [0], [1], [0, 0, 1, 1], [], []>} : vector<49x49xbf16>, vector<49x8xbf16>, vector<49x8xf32> -> vector<49x8xf32>
    %312 = tpu.reciprocal %309 {approx = true} : vector<49x1xf32> -> vector<49x1xf32>
    %313 = vector.broadcast %312 : vector<49x1xf32> to vector<49x8xf32>
    %314 = arith.mulf %311, %313 : vector<49x8xf32>
    %315 = arith.truncf %314 : vector<49x8xf32> to vector<49x8xbf16>
    %c24_150 = arith.constant 24 : index
    %c0_151 = arith.constant 0 : index
    %316 = vector.load %arg4[%c24_150, %c0_151] : memref<32x32xbf16, #tpu.memory_space<vmem>>, vector<8x32xbf16>
    %cst_152 = arith.constant dense<0.000000e+00> : vector<49x32xf32>
    %317 = tpu.matmul %315, %316, %cst_152 {dimension_numbers = #tpu.dot_dimension_numbers<[1], [0], [0], [1], [0, 0, 1, 1], [], []>} : vector<49x8xbf16>, vector<8x32xbf16>, vector<49x32xf32> -> vector<49x32xf32>
    %318 = arith.addf %294, %317 : vector<49x32xf32>
    %c0_153 = arith.constant 0 : index
    %c2_154 = arith.constant 2 : index
    %c0_155 = arith.constant 0 : index
    %c0_156 = arith.constant 0 : index
    %319 = vector.load %arg7[%c0_153, %c2_154, %c0_155, %c0_156] : memref<1x4x49x32xf32, #tpu.memory_space<vmem>>, vector<1x1x49x32xf32>
    %320 = vector.shape_cast %319 : vector<1x1x49x32xf32> to vector<49x32xf32>
    %321 = vector.shape_cast %318 : vector<49x32xf32> to vector<1x1x49x32xf32>
    tpu.vector_store %arg7[%c0_153, %c2_154, %c0_155, %c0_156], %321 {strides = array<i32>} : memref<1x4x49x32xf32, #tpu.memory_space<vmem>>, vector<1x1x49x32xf32>,
    %c0_157 = arith.constant 0 : index
    %c3_158 = arith.constant 3 : index
    %c0_159 = arith.constant 0 : index
    %c0_160 = arith.constant 0 : index
    %322 = vector.load %arg1[%c0_157, %c3_158, %c0_159, %c0_160] : memref<1x4x49x32xf32, #tpu.memory_space<vmem>>, vector<1x1x49x32xf32>
    %323 = vector.shape_cast %322 : vector<1x1x49x32xf32> to vector<49x32xf32>
    %324 = arith.truncf %323 : vector<49x32xf32> to vector<49x32xbf16>
    %cst_161 = arith.constant dense<0.000000e+00> : vector<49x96xf32>
    %325 = tpu.matmul %324, %0, %cst_161 {dimension_numbers = #tpu.dot_dimension_numbers<[1], [0], [0], [1], [0, 0, 1, 1], [], []>} : vector<49x32xbf16>, vector<32x96xbf16>, vector<49x96xf32> -> vector<49x96xf32>
    %326 = arith.addf %325, %3 : vector<49x96xf32>
    %327 = arith.truncf %326 : vector<49x96xf32> to vector<49x96xbf16>
    %328 = vector.extract_strided_slice %327 {offsets = [0, 0], sizes = [49, 8], strides = [1, 1]} : vector<49x96xbf16> to vector<49x8xbf16>
    %329 = vector.extract_strided_slice %327 {offsets = [0, 32], sizes = [49, 8], strides = [1, 1]} : vector<49x96xbf16> to vector<49x8xbf16>
    %330 = vector.extract_strided_slice %327 {offsets = [0, 64], sizes = [49, 8], strides = [1, 1]} : vector<49x96xbf16> to vector<49x8xbf16>
    %cst_162 = arith.constant dense<0.000000e+00> : vector<49x49xf32>
    %331 = tpu.matmul %328, %329, %cst_162 {dimension_numbers = #tpu.dot_dimension_numbers<[1], [1], [0], [0], [0, 0, 1, 0], [], []>} : vector<49x8xbf16>, vector<49x8xbf16>, vector<49x49xf32> -> vector<49x49xf32>
    %c0_163 = arith.constant 0 : index
    %c3_164 = arith.constant 3 : index
    %c0_165 = arith.constant 0 : index
    %c0_166 = arith.constant 0 : index
    %332 = vector.load %arg6[%c0_163, %c3_164, %c0_165, %c0_166] : memref<4x4x49x49xbf16, #tpu.memory_space<vmem>>, vector<1x1x49x49xbf16>
    %333 = vector.shape_cast %332 : vector<1x1x49x49xbf16> to vector<49x49xbf16>
    %334 = arith.extf %333 : vector<49x49xbf16> to vector<49x49xf32>
    %335 = arith.addf %331, %334 : vector<49x49xf32>
    %cst_167 = arith.constant dense<0xFF800000> : vector<49xf32>
    %336 = vector.multi_reduction <maximumf>, %335, %cst_167 [1] : vector<49x49xf32> to vector<49xf32>
    %337 = vector.shape_cast %336 : vector<49xf32> to vector<49x1xf32>
    %338 = vector.broadcast %337 : vector<49x1xf32> to vector<49x49xf32>
    %339 = arith.subf %335, %338 : vector<49x49xf32>
    %340 = math.exp %339 : vector<49x49xf32>
    %cst_168 = arith.constant dense<0.000000e+00> : vector<49xf32>
    %341 = vector.multi_reduction <add>, %340, %cst_168 [1] : vector<49x49xf32> to vector<49xf32>
    %342 = vector.shape_cast %341 : vector<49xf32> to vector<49x1xf32>
    %343 = arith.truncf %340 : vector<49x49xf32> to vector<49x49xbf16>
    %cst_169 = arith.constant dense<0.000000e+00> : vector<49x8xf32>
    %344 = tpu.matmul %343, %330, %cst_169 {dimension_numbers = #tpu.dot_dimension_numbers<[1], [0], [0], [1], [0, 0, 1, 1], [], []>} : vector<49x49xbf16>, vector<49x8xbf16>, vector<49x8xf32> -> vector<49x8xf32>
    %345 = tpu.reciprocal %342 {approx = true} : vector<49x1xf32> -> vector<49x1xf32>
    %346 = vector.broadcast %345 : vector<49x1xf32> to vector<49x8xf32>
    %347 = arith.mulf %344, %346 : vector<49x8xf32>
    %348 = arith.truncf %347 : vector<49x8xf32> to vector<49x8xbf16>
    %c0_170 = arith.constant 0 : index
    %c0_171 = arith.constant 0 : index
    %349 = vector.load %arg4[%c0_170, %c0_171] : memref<32x32xbf16, #tpu.memory_space<vmem>>, vector<8x32xbf16>
    %cst_172 = arith.constant dense<0.000000e+00> : vector<49x32xf32>
    %350 = tpu.matmul %348, %349, %cst_172 {dimension_numbers = #tpu.dot_dimension_numbers<[1], [0], [0], [1], [0, 0, 1, 1], [], []>} : vector<49x8xbf16>, vector<8x32xbf16>, vector<49x32xf32> -> vector<49x32xf32>
    %351 = arith.addf %6, %350 : vector<49x32xf32>
    %352 = vector.extract_strided_slice %327 {offsets = [0, 8], sizes = [49, 8], strides = [1, 1]} : vector<49x96xbf16> to vector<49x8xbf16>
    %353 = vector.extract_strided_slice %327 {offsets = [0, 40], sizes = [49, 8], strides = [1, 1]} : vector<49x96xbf16> to vector<49x8xbf16>
    %354 = vector.extract_strided_slice %327 {offsets = [0, 72], sizes = [49, 8], strides = [1, 1]} : vector<49x96xbf16> to vector<49x8xbf16>
    %cst_173 = arith.constant dense<0.000000e+00> : vector<49x49xf32>
    %355 = tpu.matmul %352, %353, %cst_173 {dimension_numbers = #tpu.dot_dimension_numbers<[1], [1], [0], [0], [0, 0, 1, 0], [], []>} : vector<49x8xbf16>, vector<49x8xbf16>, vector<49x49xf32> -> vector<49x49xf32>
    %c1_174 = arith.constant 1 : index
    %c3_175 = arith.constant 3 : index
    %c0_176 = arith.constant 0 : index
    %c0_177 = arith.constant 0 : index
    %356 = vector.load %arg6[%c1_174, %c3_175, %c0_176, %c0_177] : memref<4x4x49x49xbf16, #tpu.memory_space<vmem>>, vector<1x1x49x49xbf16>
    %357 = vector.shape_cast %356 : vector<1x1x49x49xbf16> to vector<49x49xbf16>
    %358 = arith.extf %357 : vector<49x49xbf16> to vector<49x49xf32>
    %359 = arith.addf %355, %358 : vector<49x49xf32>
    %cst_178 = arith.constant dense<0xFF800000> : vector<49xf32>
    %360 = vector.multi_reduction <maximumf>, %359, %cst_178 [1] : vector<49x49xf32> to vector<49xf32>
    %361 = vector.shape_cast %360 : vector<49xf32> to vector<49x1xf32>
    %362 = vector.broadcast %361 : vector<49x1xf32> to vector<49x49xf32>
    %363 = arith.subf %359, %362 : vector<49x49xf32>
    %364 = math.exp %363 : vector<49x49xf32>
    %cst_179 = arith.constant dense<0.000000e+00> : vector<49xf32>
    %365 = vector.multi_reduction <add>, %364, %cst_179 [1] : vector<49x49xf32> to vector<49xf32>
    %366 = vector.shape_cast %365 : vector<49xf32> to vector<49x1xf32>
    %367 = arith.truncf %364 : vector<49x49xf32> to vector<49x49xbf16>
    %cst_180 = arith.constant dense<0.000000e+00> : vector<49x8xf32>
    %368 = tpu.matmul %367, %354, %cst_180 {dimension_numbers = #tpu.dot_dimension_numbers<[1], [0], [0], [1], [0, 0, 1, 1], [], []>} : vector<49x49xbf16>, vector<49x8xbf16>, vector<49x8xf32> -> vector<49x8xf32>
    %369 = tpu.reciprocal %366 {approx = true} : vector<49x1xf32> -> vector<49x1xf32>
    %370 = vector.broadcast %369 : vector<49x1xf32> to vector<49x8xf32>
    %371 = arith.mulf %368, %370 : vector<49x8xf32>
    %372 = arith.truncf %371 : vector<49x8xf32> to vector<49x8xbf16>
    %c8_181 = arith.constant 8 : index
    %c0_182 = arith.constant 0 : index
    %373 = vector.load %arg4[%c8_181, %c0_182] : memref<32x32xbf16, #tpu.memory_space<vmem>>, vector<8x32xbf16>
    %cst_183 = arith.constant dense<0.000000e+00> : vector<49x32xf32>
    %374 = tpu.matmul %372, %373, %cst_183 {dimension_numbers = #tpu.dot_dimension_numbers<[1], [0], [0], [1], [0, 0, 1, 1], [], []>} : vector<49x8xbf16>, vector<8x32xbf16>, vector<49x32xf32> -> vector<49x32xf32>
    %375 = arith.addf %351, %374 : vector<49x32xf32>
    %376 = vector.extract_strided_slice %327 {offsets = [0, 16], sizes = [49, 8], strides = [1, 1]} : vector<49x96xbf16> to vector<49x8xbf16>
    %377 = vector.extract_strided_slice %327 {offsets = [0, 48], sizes = [49, 8], strides = [1, 1]} : vector<49x96xbf16> to vector<49x8xbf16>
    %378 = vector.extract_strided_slice %327 {offsets = [0, 80], sizes = [49, 8], strides = [1, 1]} : vector<49x96xbf16> to vector<49x8xbf16>
    %cst_184 = arith.constant dense<0.000000e+00> : vector<49x49xf32>
    %379 = tpu.matmul %376, %377, %cst_184 {dimension_numbers = #tpu.dot_dimension_numbers<[1], [1], [0], [0], [0, 0, 1, 0], [], []>} : vector<49x8xbf16>, vector<49x8xbf16>, vector<49x49xf32> -> vector<49x49xf32>
    %c2_185 = arith.constant 2 : index
    %c3_186 = arith.constant 3 : index
    %c0_187 = arith.constant 0 : index
    %c0_188 = arith.constant 0 : index
    %380 = vector.load %arg6[%c2_185, %c3_186, %c0_187, %c0_188] : memref<4x4x49x49xbf16, #tpu.memory_space<vmem>>, vector<1x1x49x49xbf16>
    %381 = vector.shape_cast %380 : vector<1x1x49x49xbf16> to vector<49x49xbf16>
    %382 = arith.extf %381 : vector<49x49xbf16> to vector<49x49xf32>
    %383 = arith.addf %379, %382 : vector<49x49xf32>
    %cst_189 = arith.constant dense<0xFF800000> : vector<49xf32>
    %384 = vector.multi_reduction <maximumf>, %383, %cst_189 [1] : vector<49x49xf32> to vector<49xf32>
    %385 = vector.shape_cast %384 : vector<49xf32> to vector<49x1xf32>
    %386 = vector.broadcast %385 : vector<49x1xf32> to vector<49x49xf32>
    %387 = arith.subf %383, %386 : vector<49x49xf32>
    %388 = math.exp %387 : vector<49x49xf32>
    %cst_190 = arith.constant dense<0.000000e+00> : vector<49xf32>
    %389 = vector.multi_reduction <add>, %388, %cst_190 [1] : vector<49x49xf32> to vector<49xf32>
    %390 = vector.shape_cast %389 : vector<49xf32> to vector<49x1xf32>
    %391 = arith.truncf %388 : vector<49x49xf32> to vector<49x49xbf16>
    %cst_191 = arith.constant dense<0.000000e+00> : vector<49x8xf32>
    %392 = tpu.matmul %391, %378, %cst_191 {dimension_numbers = #tpu.dot_dimension_numbers<[1], [0], [0], [1], [0, 0, 1, 1], [], []>} : vector<49x49xbf16>, vector<49x8xbf16>, vector<49x8xf32> -> vector<49x8xf32>
    %393 = tpu.reciprocal %390 {approx = true} : vector<49x1xf32> -> vector<49x1xf32>
    %394 = vector.broadcast %393 : vector<49x1xf32> to vector<49x8xf32>
    %395 = arith.mulf %392, %394 : vector<49x8xf32>
    %396 = arith.truncf %395 : vector<49x8xf32> to vector<49x8xbf16>
    %c16_192 = arith.constant 16 : index
    %c0_193 = arith.constant 0 : index
    %397 = vector.load %arg4[%c16_192, %c0_193] : memref<32x32xbf16, #tpu.memory_space<vmem>>, vector<8x32xbf16>
    %cst_194 = arith.constant dense<0.000000e+00> : vector<49x32xf32>
    %398 = tpu.matmul %396, %397, %cst_194 {dimension_numbers = #tpu.dot_dimension_numbers<[1], [0], [0], [1], [0, 0, 1, 1], [], []>} : vector<49x8xbf16>, vector<8x32xbf16>, vector<49x32xf32> -> vector<49x32xf32>
    %399 = arith.addf %375, %398 : vector<49x32xf32>
    %400 = vector.extract_strided_slice %327 {offsets = [0, 24], sizes = [49, 8], strides = [1, 1]} : vector<49x96xbf16> to vector<49x8xbf16>
    %401 = vector.extract_strided_slice %327 {offsets = [0, 56], sizes = [49, 8], strides = [1, 1]} : vector<49x96xbf16> to vector<49x8xbf16>
    %402 = vector.extract_strided_slice %327 {offsets = [0, 88], sizes = [49, 8], strides = [1, 1]} : vector<49x96xbf16> to vector<49x8xbf16>
    %cst_195 = arith.constant dense<0.000000e+00> : vector<49x49xf32>
    %403 = tpu.matmul %400, %401, %cst_195 {dimension_numbers = #tpu.dot_dimension_numbers<[1], [1], [0], [0], [0, 0, 1, 0], [], []>} : vector<49x8xbf16>, vector<49x8xbf16>, vector<49x49xf32> -> vector<49x49xf32>
    %c3_196 = arith.constant 3 : index
    %c3_197 = arith.constant 3 : index
    %c0_198 = arith.constant 0 : index
    %c0_199 = arith.constant 0 : index
    %404 = vector.load %arg6[%c3_196, %c3_197, %c0_198, %c0_199] : memref<4x4x49x49xbf16, #tpu.memory_space<vmem>>, vector<1x1x49x49xbf16>
    %405 = vector.shape_cast %404 : vector<1x1x49x49xbf16> to vector<49x49xbf16>
    %406 = arith.extf %405 : vector<49x49xbf16> to vector<49x49xf32>
    %407 = arith.addf %403, %406 : vector<49x49xf32>
    %cst_200 = arith.constant dense<0xFF800000> : vector<49xf32>
    %408 = vector.multi_reduction <maximumf>, %407, %cst_200 [1] : vector<49x49xf32> to vector<49xf32>
    %409 = vector.shape_cast %408 : vector<49xf32> to vector<49x1xf32>
    %410 = vector.broadcast %409 : vector<49x1xf32> to vector<49x49xf32>
    %411 = arith.subf %407, %410 : vector<49x49xf32>
    %412 = math.exp %411 : vector<49x49xf32>
    %cst_201 = arith.constant dense<0.000000e+00> : vector<49xf32>
    %413 = vector.multi_reduction <add>, %412, %cst_201 [1] : vector<49x49xf32> to vector<49xf32>
    %414 = vector.shape_cast %413 : vector<49xf32> to vector<49x1xf32>
    %415 = arith.truncf %412 : vector<49x49xf32> to vector<49x49xbf16>
    %cst_202 = arith.constant dense<0.000000e+00> : vector<49x8xf32>
    %416 = tpu.matmul %415, %402, %cst_202 {dimension_numbers = #tpu.dot_dimension_numbers<[1], [0], [0], [1], [0, 0, 1, 1], [], []>} : vector<49x49xbf16>, vector<49x8xbf16>, vector<49x8xf32> -> vector<49x8xf32>
    %417 = tpu.reciprocal %414 {approx = true} : vector<49x1xf32> -> vector<49x1xf32>
    %418 = vector.broadcast %417 : vector<49x1xf32> to vector<49x8xf32>
    %419 = arith.mulf %416, %418 : vector<49x8xf32>
    %420 = arith.truncf %419 : vector<49x8xf32> to vector<49x8xbf16>
    %c24_203 = arith.constant 24 : index
    %c0_204 = arith.constant 0 : index
    %421 = vector.load %arg4[%c24_203, %c0_204] : memref<32x32xbf16, #tpu.memory_space<vmem>>, vector<8x32xbf16>
    %cst_205 = arith.constant dense<0.000000e+00> : vector<49x32xf32>
    %422 = tpu.matmul %420, %421, %cst_205 {dimension_numbers = #tpu.dot_dimension_numbers<[1], [0], [0], [1], [0, 0, 1, 1], [], []>} : vector<49x8xbf16>, vector<8x32xbf16>, vector<49x32xf32> -> vector<49x32xf32>
    %423 = arith.addf %399, %422 : vector<49x32xf32>
    %c0_206 = arith.constant 0 : index
    %c3_207 = arith.constant 3 : index
    %c0_208 = arith.constant 0 : index
    %c0_209 = arith.constant 0 : index
    %424 = vector.load %arg7[%c0_206, %c3_207, %c0_208, %c0_209] : memref<1x4x49x32xf32, #tpu.memory_space<vmem>>, vector<1x1x49x32xf32>
    %425 = vector.shape_cast %424 : vector<1x1x49x32xf32> to vector<49x32xf32>
    %426 = vector.shape_cast %423 : vector<49x32xf32> to vector<1x1x49x32xf32>
    tpu.vector_store %arg7[%c0_206, %c3_207, %c0_208, %c0_209], %426 {strides = array<i32>} : memref<1x4x49x32xf32, #tpu.memory_space<vmem>>, vector<1x1x49x32xf32>,
    return
  }
  func.func @transform_0(%arg0: i32) -> (i32, i32, i32, i32) {
    %c0_i32 = arith.constant 0 : i32
    %c0_i32_0 = arith.constant 0 : i32
    %c0_i32_1 = arith.constant 0 : i32
    %c0_i32_2 = arith.constant 0 : i32
    return %arg0, %c0_i32, %c0_i32_0, %c0_i32_1 : i32, i32, i32, i32
  }
  func.func @transform_1(%arg0: i32) -> (i32, i32) {
    %c0_i32 = arith.constant 0 : i32
    %c0_i32_0 = arith.constant 0 : i32
    %c0_i32_1 = arith.constant 0 : i32
    return %c0_i32, %c0_i32_0 : i32, i32
  }
  func.func @transform_2(%arg0: i32) -> (i32, i32) {
    %c0_i32 = arith.constant 0 : i32
    %c0_i32_0 = arith.constant 0 : i32
    %c0_i32_1 = arith.constant 0 : i32
    return %c0_i32, %c0_i32_0 : i32, i32
  }
  func.func @transform_3(%arg0: i32) -> (i32, i32) {
    %c0_i32 = arith.constant 0 : i32
    %c0_i32_0 = arith.constant 0 : i32
    %c0_i32_1 = arith.constant 0 : i32
    return %c0_i32, %c0_i32_0 : i32, i32
  }
  func.func @transform_4(%arg0: i32) -> (i32, i32) {
    %c0_i32 = arith.constant 0 : i32
    %c0_i32_0 = arith.constant 0 : i32
    %c0_i32_1 = arith.constant 0 : i32
    return %c0_i32, %c0_i32_0 : i32, i32
  }
  func.func @transform_5(%arg0: i32) -> (i32, i32, i32, i32) {
    %c0_i32 = arith.constant 0 : i32
    %c0_i32_0 = arith.constant 0 : i32
    %c0_i32_1 = arith.constant 0 : i32
    %c0_i32_2 = arith.constant 0 : i32
    %c0_i32_3 = arith.constant 0 : i32
    return %c0_i32, %c0_i32_0, %c0_i32_1, %c0_i32_2 : i32, i32, i32, i32
  }
  func.func @transform_6(%arg0: i32) -> (i32, i32, i32, i32) {
    %c0_i32 = arith.constant 0 : i32
    %c0_i32_0 = arith.constant 0 : i32
    %c0_i32_1 = arith.constant 0 : i32
    %c0_i32_2 = arith.constant 0 : i32
    return %arg0, %c0_i32, %c0_i32_0, %c0_i32_1 : i32, i32, i32, i32
  }
}

</mosaic_0001>

<bundles_post_ra>
// kernel: sw_msa.1
= control target key start
LH: loop header
LB: loop body
LE: loop exit
PB: predicated region body
PF: predicated region fallthrough
CT: control target
= control target key end

     0   :  { %s9211_s21 = smov 0   ;;  %s11670_s0 = inlined_call_operand.vmem [shape: f32[2,4,49,32], index: 0, kind: input, shape index: {}]   ;;  %s11671_s1 = inlined_call_operand.vmem [shape: bf16[32,96], index: 1, kind: input, shape index: {}]   ;;  %s11672_s2 = inlined_call_operand.vmem [shape: f32[1,96], index: 2, kind: input, shape index: {}]   ;;  %s11673_s3 = inlined_call_operand.vmem [shape: bf16[32,32], index: 3, kind: input, shape index: {}]   ;;  %s11674_s4 = inlined_call_operand.vmem [shape: f32[1,32], index: 4, kind: input, shape index: {}]   ;;  %s11675_s5 = inlined_call_operand.vmem [shape: bf16[4,4,49,49], index: 5, kind: input, shape index: {}]   ;;  %s11676_s6 = inlined_call_operand.vmem [shape: f32[2,4,49,32], index: 6, kind: output, shape index: {}]  }
   0x1 LB: > { %s6824_s22 = sadd.s32 4294967295, %s9162_s21   ;;  %p6828_p0 = scmp.ge.s32.totalorder %s9162_s21, 1  ;;  %s9162_s21 = sphi %s9211_s21, %s16_s21  }
   0x2   : > { %p212_p1 = scmp.lt.s32.totalorder %s9162_s21, 3 }
   0x4   : > { %p213_p2 = pnand %p6828_p0, %p212_p1 }
   0x5   : > { %v9222_v0 = vld [vmem:[%s11671_s1] sm:$0xff] (!%p213_p2)   ;;  %p242_p3 = scmp.lt.s32.totalorder (!%p213_p2), %s6824_s22, 1  ;;  %v9227_v1 = vld [vmem:[%s11671_s1 + $0x8] sm:$0xff] (!%p213_p2)   ;;  %vm294_vm0 = vcmask (!%p213_p2), 261120   ;;  %vm401_vm1 = vcmask (!%p213_p2), 64512   ;;  %s9164_s9 = smov (!%p213_p2), 96  }
   0x6   : > { %216 = sbr.rel (%p213_p2) target bundleno = 5993 (0x1769), region = 44  ;;  %7751 = vmatprep.subr.bf16.mxu0 (!%p213_p2), %v9222_v0  ;;  %v6831_v14 = vld [vmem:[%s11672_s2] ss:$0 sm:$0xff] (!%p213_p2)  ;;  %s9165_s10 = smov (!%p213_p2), 88   ;;  %v7352_v55 = vld [vmem:[%s11675_s5 + $0x8] sm:$0xff] (!%p213_p2)   ;;  %vm490_vm2 = vcmask (!%p213_p2), 400384  }
   0x7   : > { %7752 = vmatpush3.bf16.msra.mxu0 (!%p213_p2), %v9222_v0  ;;  %s9166_s11 = smov (!%p213_p2), 120   ;;  %s9167_s12 = smov (!%p213_p2), 64   ;;  %v7193_v56 = vld [vmem:[%s11675_s5] sm:$0xff] (!%p213_p2)   ;;  %v7198_v57 = vunpack.c.l.bf16 (!%p213_p2), %v7352_v55  ;;  %vm509_vm3 = vcmask (!%p213_p2), 393216   ;;  %vm582_vm4 = vcmask (!%p213_p2), 1040384   ;;  %vm683_vm5 = vcmask (!%p213_p2), 1043456  }
   0x8   : > { %7753 = vmatprep.subr.bf16.mxu0 (!%p213_p2), %v9227_v1  ;;  %v7194_v58 = vunpack.c.l.bf16 (!%p213_p2), %v7193_v56  ;;  %v7195_v60 = vunpack.c.h.bf16 (!%p213_p2), %v7193_v56  ;;  %s9168_s23 = smov (!%p213_p2), 80   ;;  %s9169_s24 = smov (!%p213_p2), 112   ;;  %vm1907_vm6 = vcmask (!%p213_p2), 253952  }
   0x9   : > { %s9171_s15 = smov (!%p213_p2), 56   ;;  %s9172_s18 = smov (!%p213_p2), 72  }
   0xa   : > { %s9173_s19 = smov (!%p213_p2), 104   ;;  %s9174_s14 = smov (!%p213_p2), 48  }
   0xb   : > { %7754 = vmatpush3.bf16.msra.mxu0 (!%p213_p2), %v9227_v1  ;;  %s9175_s16 = smov (!%p213_p2), 40  }
   0xd   : > { %s11678_s22 = smov (!%p242_p3, %s6824_s22), 1 }
   0xe   : > { %s8675_s27 = smul.u32 224, %s11678_s22 }
  0x10   : > { %s9240_s30 = scalar_lea.vmem %s11670_s0, %s8675_s27  ;;  %s9932_s20 = scalar_lea.vmem %s11676_s6, %s8675_s27 }
  0x11   : > { %v271_v2 = vld [vmem:[%s9240_s30] sm:$0xff]  ;;  %v272_v3 = vld [vmem:[%s9240_s30 + $0x8] sm:$0xff]  ;;  %v273_v4 = vld [vmem:[%s9240_s30 + $0x10] sm:$0xff] }
  0x12   : > { %v278_v5 = vpack.c.bf16 %v272_v3, %v271_v2  ;;  %v274_v6 = vld [vmem:[%s9240_s30 + $0x18] sm:$0xff]  ;;  %v275_v7 = vld [vmem:[%s9240_s30 + $0x20] sm:$0xff]  ;;  %v276_v8 = vld [vmem:[%s9240_s30 + $0x28] sm:$0xff] }
  0x13   : > { %v279_v9 = vpack.c.bf16 %v274_v6, %v273_v4  ;;  %v280_v10 = vpack.c.bf16 %v276_v8, %v275_v7  ;;  %v277_v11 = vld [vmem:[%s9240_s30 + $0x30] sm:$0x1]  ;;  %v381_v2 = vld [vmem:[%s11675_s5 + $0x18] sm:$0x1]  ;;  %v7199_v4 = vunpack.c.h.bf16 %v7352_v55 }
  0x14   : > { %7755 = vmatprep.mubr.msk.bf16.mxu0 %vm294_vm0, %v278_v5  ;;  %v281_v12 = vpack.c.bf16 %v277_v11, %v277_v11  ;;  %v7353_v8 = vld [vmem:[%s11675_s5 + $0x10] sm:$0xff]  }
  0x15   : > { %7756 = vmatmul.mubr.msk.bf16.vlgmr.msra.gmra.mrb[0].mxu0 %vm294_vm0, %v279_v9  ;;  %v388_v9 = vunpack.c.l.bf16 %v381_v2 }
  0x16   : > { %7759 = vmatprep.mubr.msk.bf16.mxu0 %vm294_vm0, %v280_v10 }
  0x1d   : > { %7760 = vmatmul.mubr.msk.bf16.gmra.mrb[4].mxu0 %vm294_vm0, %v281_v12 }
  0xe8   : > { %v7757_v13 = vpop.f32.mrb[0].mxu0 }
  0xe9   : > { %v341_v15 = vpop.f32.mrb[1].mxu0  ;;  %v350_v17 = vadd.f32 %v7757_v13, %v6831_v14  ;;  %v7202_v13 = vunpack.c.l.bf16 %v7353_v8 }
  0xea   : > { %v7758_v16 = vpop.f32.mrb[2].mxu0  ;;  %v342_v20 = vadd.f32 %v6831_v14, %v341_v15  ;;  %v7203_v15 = vunpack.c.h.bf16 %v7353_v8 }
  0xeb   : > { %v353_v18 = vadd.f32 %v7758_v16, %v6831_v14  ;;  %v344_v19 = vpop.f32.mrb[3].mxu0 }
  0xec   : > { %v345_v21 = vadd.f32 %v6831_v14, %v344_v19 }
  0xed   : > { %v9257_v22 = vpack.c.bf16 %v353_v18, %v350_v17 }
  0xee   : > { %v9259_v23 = vpack.c.bf16 %v345_v21, %v342_v20 }
  0xf0   : > { %v7761_v24 = vpop.f32.mrb[4].mxu0  ;;  %393 = vrot.lane.b32.xlu0 %v9259_v23, %s9164_s9  ;;  %7771 = vmatprep.mubr.msk.bf16.mxu1 %vm401_vm1, %v9259_v23 }
  0xf1   : > { %v357_v25 = vpop.f32.mrb[5].mxu0  ;;  %v366_v29 = vadd.f32 %v7761_v24, %v6831_v14 }
  0xf2   : > { %v358_v26 = vadd.f32 %v6831_v14, %v357_v25  ;;  %v7762_v27 = vpop.f32.mrb[6].mxu0 }
  0xf3   : > { %v360_v28 = vpop.f32.mrb[7].mxu0  ;;  %v9269_v32 = vpack.c.bf16 %v366_v29, %v366_v29 }
  0xf4   : > { %v361_v30 = vadd.f32 %v6831_v14, %v360_v28  ;;  %395 = vrot.lane.b32.xlu0 %v9257_v22, %s9164_s9 }
  0xf6   : > { %v9267_v31 = vpack.c.bf16 %v361_v30, %v358_v26 }
  0xf8   : > { %397 = vrot.lane.b32.xlu1 %v9267_v31, %s9164_s9  ;;  %781 = vrot.lane.b32.xlu0 %v9259_v23, %s9165_s10 }
  0xfc   : > { %399 = vrot.lane.b32.xlu1 %v9269_v32, %s9164_s9  ;;  %785 = vrot.lane.b32.xlu0 %v9267_v31, %s9165_s10 }
 0x100   : > { %783 = vrot.lane.b32.xlu1 %v9257_v22, %s9165_s10  ;;  %773 = vrot.lane.b32.xlu0 %v9259_v23, %s9166_s11 }
 0x104   : > { %787 = vrot.lane.b32.xlu1 %v9269_v32, %s9165_s10  ;;  %559 = vrot.lane.b32.xlu0 %v9259_v23, %s9167_s12 }
 0x108   : > { %775 = vrot.lane.b32.xlu1 %v9257_v22, %s9166_s11  ;;  %777 = vrot.lane.b32.xlu0 %v9267_v31, %s9166_s11 }
 0x10c   : > { %779 = vrot.lane.b32.xlu1 %v9269_v32, %s9166_s11 }
 0x110   : > { %561 = vrot.lane.b32.xlu1 %v9257_v22, %s9167_s12 }
 0x162   : > { %v394_v33 = vpop.permute.xlu0 %393 }
 0x163   : > { %8595 = vmatprep.subr.msk.bf16.mxu1 %vm401_vm1, %v394_v33  ;;  %v415_v34 = vsel %vm401_vm1, %v394_v33, 0 }
 0x164   : > { %7764 = vmatpush3.bf16.xpose.msra.mxu1 %v415_v34 }
 0x166   : > { %v396_v35 = vpop.permute.xlu0 %395 }
 0x167   : > { %8596 = vmatprep.subr.msk.bf16.mxu1 %vm401_vm1, %v396_v35  ;;  %v418_v38 = vsel %vm401_vm1, %v396_v35, 0 }
 0x16a   : > { %v398_v36 = vpop.permute.xlu1 %397  ;;  %v782_v37 = vpop.permute.xlu0 %781 }
 0x16b   : > { %v421_v43 = vsel %vm401_vm1, %v398_v36, 0  ;;  %v802_v50 = vsel %vm401_vm1, %v782_v37, 0 }
 0x16c   : > { %7766 = vmatpush3.bf16.xpose.msra.mxu1 %v418_v38  ;;  %v7355_v38 = vld [vmem:[%s11675_s5 + $0x78] sm:$0xff]  }
 0x16d   : > { %8597 = vmatprep.subr.msk.bf16.mxu1 %vm401_vm1, %v398_v36 }
 0x16e   : > { %v400_v39 = vpop.permute.xlu1 %399  ;;  %v786_v40 = vpop.permute.xlu0 %785 }
 0x16f   : > { %v424_v47 = vsel %vm401_vm1, %v400_v39, 0  ;;  %v808_v52 = vsel %vm401_vm1, %v786_v40, 0 }
 0x172   : > { %v784_v41 = vpop.permute.xlu1 %783  ;;  %v774_v42 = vpop.permute.xlu0 %773 }
 0x173   : > { %v805_v51 = vsel %vm401_vm1, %v784_v41, 0 }
 0x174   : > { %7768 = vmatpush3.bf16.xpose.msra.mxu1 %v421_v43 }
 0x175   : > { %8598 = vmatprep.subr.msk.bf16.mxu1 %vm401_vm1, %v400_v39  ;;  %v7210_v39 = vunpack.c.l.bf16 %v7355_v38 }
 0x176   : > { %v788_v44 = vpop.permute.xlu1 %787  ;;  %v560_v45 = vpop.permute.xlu0 %559 }
 0x177   : > { %7779 = vmatprep.subr.bf16.mxu0 %v560_v45  ;;  %v811_v53 = vsel %vm401_vm1, %v788_v44, 0 }
 0x178   : > { %7780 = vmatpush3.bf16.msra.mxu0 %v560_v45 }
 0x17a   : > { %v776_v46 = vpop.permute.xlu1 %775  ;;  %v778_v54 = vpop.permute.xlu0 %777 }
 0x17c   : > { %7770 = vmatpush3.bf16.xpose.msra.mxu1 %v424_v47  ;;  %v7356_v47 = vld [vmem:[%s11675_s5 + $0x80] sm:$0xff]  }
 0x17d   : > { %8600 = vmatprep.subr.msk.bf16.mxu1 %vm401_vm1, %v782_v37 }
 0x17e   : > { %v780_v48 = vpop.permute.xlu1 %779 }
 0x182   : > { %v562_v49 = vpop.permute.xlu1 %561 }
 0x183   : > { %7772 = vmatmul.mubr.msk.bf16.vlgmr.msra.gmra.mrb[0].mxu1 %vm401_vm1, %v9257_v22  ;;  %7781 = vmatprep.subr.bf16.mxu0 %v562_v49 }
 0x184   : > { %7775 = vmatprep.mubr.msk.bf16.mxu1 %vm401_vm1, %v9267_v31  ;;  %7782 = vmatpush3.bf16.msra.mxu0 %v562_v49  ;;  %v7215_v49 = vunpack.c.h.bf16 %v7356_v47 }
 0x185   : > { %7806 = vmatpush3.bf16.xpose.msra.mxu1 %v802_v50 }
 0x186   : > { %8601 = vmatprep.subr.msk.bf16.mxu1 %vm401_vm1, %v784_v41  ;;  %v7354_v41 = vld [vmem:[%s11675_s5 + $0x70] sm:$0xff]  }
 0x187   : > { %v7206_v43 = vunpack.c.l.bf16 %v7354_v41  ;;  %v7207_v45 = vunpack.c.h.bf16 %v7354_v41 }
 0x18b   : > { %7776 = vmatmul.mubr.msk.bf16.gmra.mrb[4].mxu1 %vm401_vm1, %v9269_v32 }
 0x18c   : > { %7813 = vmatprep.mubr.msk.bf16.mxu1 %vm401_vm1, %v774_v42 }
 0x18d   : > { %7808 = vmatpush3.bf16.xpose.msra.mxu1 %v805_v51 }
 0x18e   : > { %8602 = vmatprep.subr.msk.bf16.mxu1 %vm401_vm1, %v786_v40  ;;  %v7211_v40 = vunpack.c.h.bf16 %v7355_v38 }
 0x195   : > { %7810 = vmatpush3.bf16.xpose.msra.mxu1 %v808_v52 }
 0x196   : > { %8603 = vmatprep.subr.msk.bf16.mxu1 %vm401_vm1, %v788_v44 }
 0x19d   : > { %7812 = vmatpush3.bf16.xpose.msra.mxu1 %v811_v53 }
 0x1a4   : > { %7814 = vmatmul.mubr.msk.bf16.vlgmr.msra.gmra.mrb[8].mxu1 %vm401_vm1, %v776_v46  ;;  %v6857_v46 = vld [vmem:[%s11675_s5 + $0x88] sm:$0x1] }
 0x1a5   : > { %7817 = vmatprep.mubr.msk.bf16.mxu1 %vm401_vm1, %v778_v54  ;;  %v7214_v54 = vunpack.c.l.bf16 %v7356_v47 }
 0x1ac   : > { %7818 = vmatmul.mubr.msk.bf16.gmra.mrb[12].mxu1 %vm401_vm1, %v780_v48  ;;  %v772_v48 = vunpack.c.l.bf16 %v6857_v46 }
 0x256   : > { %v7773_v59 = vpop.f32.mrb[0].mxu1 }
 0x257   : > { %v9327_v61 = vadd.f32 %v7773_v59, %v7198_v57  ;;  %v460_v62 = vpop.f32.mrb[1].mxu1 }
 0x258   : > { %v7774_v63 = vpop.f32.mrb[2].mxu1  ;;  %v9332_v3 = vadd.f32 %v7194_v58, %v460_v62 }
 0x259   : > { %v463_v5 = vpop.f32.mrb[3].mxu1  ;;  %v497_v6 = vsel %vm490_vm2, %v9327_v61, -inf  ;;  %v9343_v11 = vadd.f32 %v7774_v63, %v7199_v4 }
 0x25a   : > { %v9336_v7 = vadd.f32 %v7195_v60, %v463_v5  ;;  %498 = vmax.xlane.f32.xlu0 %v497_v6  ;;  %v491_v12 = vsel %vm490_vm2, %v9332_v3, -inf }
 0x25b   : > { %v500_v24 = vsel %vm490_vm2, %v9343_v11, -inf }
 0x25c   : > { %v494_v10 = vsel %vm490_vm2, %v9336_v7, -inf }
 0x25d   : > { %495 = vmax.xlane.f32.xlu1 %v494_v10 }
 0x25e   : > { %v7777_v14 = vpop.f32.mrb[4].mxu1  ;;  %492 = vmax.xlane.f32.xlu0 %v491_v12 }
 0x25f   : > { %v9347_v16 = vadd.f32 %v7777_v14, %v388_v9  ;;  %v476_v17 = vpop.f32.mrb[5].mxu1 }
 0x260   : > { %v7778_v18 = vpop.f32.mrb[6].mxu1  ;;  %v9349_v19 = vadd.f32 %v7202_v13, %v476_v17 }
 0x261   : > { %v479_v20 = vpop.f32.mrb[7].mxu1  ;;  %v510_v21 = vsel %vm509_vm3, %v9347_v16, -inf }
 0x262   : > { %v9355_v25 = vadd.f32 %v7203_v15, %v479_v20  ;;  %511 = vmax.xlane.f32.xlu1 %v510_v21  ;;  %501 = vmax.xlane.f32.xlu0 %v500_v24  ;;  %v503_v27 = vsel %vm490_vm2, %v9349_v19, -inf }
 0x264   : > { %v506_v26 = vsel %vm490_vm2, %v9355_v25, -inf }
 0x266   : > { %504 = vmax.xlane.f32.xlu1 %v503_v27  ;;  %507 = vmax.xlane.f32.xlu0 %v506_v26  ;;  %v9170_v26 = vmov 0  }
 0x267   : > { %v9428_v27 = vsel %vm582_vm4, 65535, %v9170_v26 }
 0x277   : > { %v7815_v28 = vpop.f32.mrb[8].mxu1  ;;  %563 = vrot.lane.b32.xlu1 %v9267_v31, %s9167_s12 }
 0x278   : > { %v847_v29 = vpop.f32.mrb[9].mxu1  ;;  %v9387_v42 = vadd.f32 %v7815_v28, %v7210_v39 }
 0x279   : > { %v7816_v30 = vpop.f32.mrb[10].mxu1  ;;  %v9397_v50 = vadd.f32 %v7206_v43, %v847_v29 }
 0x27a   : > { %v850_v33 = vpop.f32.mrb[11].mxu1  ;;  %v9389_v44 = vadd.f32 %v7816_v30, %v7211_v40  ;;  %v883_v52 = vsel %vm490_vm2, %v9387_v42, -inf }
 0x27b   : > { %1162 = vrot.lane.b32.xlu1 %v9259_v23, %s9168_s23  ;;  %v9399_v51 = vadd.f32 %v7207_v45, %v850_v33  ;;  %v877_v57 = vsel %vm490_vm2, %v9397_v50, -inf }
 0x27c   : > { %565 = vrot.lane.b32.xlu0 %v9269_v32, %s9167_s12  ;;  %v886_v53 = vsel %vm490_vm2, %v9389_v44, -inf }
 0x27d   : > { %v880_v58 = vsel %vm490_vm2, %v9399_v51, -inf }
 0x27f   : > { %v7819_v34 = vpop.f32.mrb[12].mxu1  ;;  %1166 = vrot.lane.b32.xlu1 %v9267_v31, %s9168_s23 }
 0x280   : > { %v863_v35 = vpop.f32.mrb[13].mxu1  ;;  %1164 = vrot.lane.b32.xlu0 %v9257_v22, %s9168_s23  ;;  %v9405_v55 = vadd.f32 %v7819_v34, %v772_v48 }
 0x281   : > { %v7820_v36 = vpop.f32.mrb[14].mxu1  ;;  %v9413_v59 = vadd.f32 %v7214_v54, %v863_v35 }
 0x282   : > { %v866_v37 = vpop.f32.mrb[15].mxu1  ;;  %v895_v60 = vsel %vm509_vm3, %v9405_v55, -inf }
 0x283   : > { %1154 = vrot.lane.b32.xlu1 %v9259_v23, %s9169_s24  ;;  %v9407_v56 = vadd.f32 %v7215_v49, %v866_v37  ;;  %v889_v63 = vsel %vm490_vm2, %v9413_v59, -inf }
 0x284   : > { %1168 = vrot.lane.b32.xlu0 %v9269_v32, %s9168_s23 }
 0x285   : > { %v892_v62 = vsel %vm490_vm2, %v9407_v56, -inf }
 0x287   : > { %1158 = vrot.lane.b32.xlu1 %v9267_v31, %s9169_s24 }
 0x288   : > { %1156 = vrot.lane.b32.xlu0 %v9257_v22, %s9169_s24 }
 0x28c   : > { %1160 = vrot.lane.b32.xlu0 %v9269_v32, %s9169_s24 }
 0x2ab   : > { %884 = vmax.xlane.f32.xlu1 %v883_v52  ;;  %887 = vmax.xlane.f32.xlu0 %v886_v53 }
 0x2af   : > { %878 = vmax.xlane.f32.xlu1 %v877_v57  ;;  %881 = vmax.xlane.f32.xlu0 %v880_v58 }
 0x2b3   : > { %896 = vmax.xlane.f32.xlu1 %v895_v60  ;;  %893 = vmax.xlane.f32.xlu0 %v892_v62 }
 0x2b7   : > { %890 = vmax.xlane.f32.xlu1 %v889_v63 }
 0x2e7   : > { %v499_v2 = vpop.xlane.xlu0 %498 }
 0x2e8   : > { %v515_v4 = vsub.f32 %v9327_v61, %v499_v2  ;;  %v670_v2 = vld [vmem:[%s11673_s3] sm:$0xf] }
 0x2ea   : > { %v524_v5 = vmul.f32 1.442695, %v515_v4  ;;  %v496_v6 = vpop.xlane.xlu1 %495  ;;  %v685_v4 = vsel %vm683_vm5, %v670_v2, 0 }
 0x2eb   : > { %v514_v8 = vsub.f32 %v9336_v7, %v496_v6  ;;  %v493_v9 = vpop.xlane.xlu0 %492 }
 0x2ec   : > { %8698 = vpow2.f32 %v524_v5  ;;  %v513_v10 = vsub.f32 %v9332_v3, %v493_v9 }
 0x2ed   : > { %v522_v12 = vmul.f32 1.442695, %v514_v8 }
 0x2ee   : > { %v520_v13 = vmul.f32 1.442695, %v513_v10 }
 0x2ef   : > { %8700 = vpow2.f32 %v522_v12  ;;  %v512_v14 = vpop.xlane.xlu1 %511  ;;  %v502_v15 = vpop.xlane.xlu0 %501 }
 0x2f0   : > { %8702 = vpow2.f32 %v520_v13  ;;  %v519_v17 = vsub.f32 %v9347_v16, %v512_v14  ;;  %v516_v18 = vsub.f32 %v9343_v11, %v502_v15 }
 0x2f2   : > { %v532_v20 = vmul.f32 1.442695, %v519_v17  ;;  %v526_v61 = vmul.f32 1.442695, %v516_v18 }
 0x2f3   : > { %v505_v21 = vpop.xlane.xlu1 %504  ;;  %v508_v24 = vpop.xlane.xlu0 %507 }
 0x2f4   : > { %8704 = vpow2.f32 %v532_v20  ;;  %v517_v7 = vsub.f32 %v9349_v19, %v505_v21  ;;  %v518_v3 = vsub.f32 %v9355_v25, %v508_v24 }
 0x2f5   : > { %8706 = vpow2.f32 %v526_v61 }
 0x2f6   : > { %v8699_v28 = vpop.eup %8698  ;;  %v528_v29 = vmul.f32 1.442695, %v517_v7  ;;  %v530_v30 = vmul.f32 1.442695, %v518_v3 }
 0x2f7   : > { %v564_v16 = vpop.permute.xlu1 %563  ;;  %v566_v33 = vpop.permute.xlu0 %565  ;;  %v540_v11 = vsel %vm490_vm2, %v8699_v28, 0.0 }
 0x2f8   : > { %8708 = vpow2.f32 %v528_v29  ;;  %v586_v34 = vand.u32 %v9428_v27, %v566_v33  ;;  %7783 = vmatprep.subr.bf16.mxu0 %v564_v16  ;;  %541 = vadd.xlane.f32.xlu0 %v540_v11 }
 0x2f9   : > { %v8701_v35 = vpop.eup %8700  ;;  %8710 = vpow2.f32 %v530_v30  ;;  %7784 = vmatpush3.bf16.msra.mxu0 %v564_v16 }
 0x2fa   : > { %v8703_v19 = vpop.eup %8702  ;;  %7785 = vmatprep.subr.bf16.mxu0 %v586_v34  ;;  %v537_v25 = vsel %vm490_vm2, %v8701_v35, 0.0 }
 0x2fb   : > { %v1163_v36 = vpop.permute.xlu1 %1162  ;;  %v534_v37 = vsel %vm490_vm2, %v8703_v19, 0.0  ;;  %v555_v38 = vpack.c.bf16 %v8701_v35, %v8703_v19  ;;  %v1165_v41 = vpop.permute.xlu0 %1164 }
 0x2fc   : > { %8605 = vmatprep.subr.msk.bf16.mxu1 %vm401_vm1, %v1163_v36  ;;  %538 = vadd.xlane.f32.xlu0 %v537_v25  ;;  %v1183_v39 = vsel %vm401_vm1, %v1163_v36, 0  ;;  %v1186_v58 = vsel %vm401_vm1, %v1165_v41, 0 }
 0x2fd   : > { %535 = vadd.xlane.f32.xlu1 %v534_v37  ;;  %7786 = vmatpush3.bf16.msra.mxu0 %v586_v34 }
 0x2fe   : > { %v8705_v40 = vpop.eup %8704  ;;  %7787 = vmatprep.mubr.msk.bf16.mxu0 %vm490_vm2, %v555_v38  ;;  %7848 = vmatpush3.bf16.xpose.msra.mxu1 %v1183_v39 }
 0x2ff   : > { %v8707_v43 = vpop.eup %8706  ;;  %8606 = vmatprep.subr.msk.bf16.mxu1 %vm401_vm1, %v1165_v41  ;;  %v1167_v45 = vpop.permute.xlu1 %1166  ;;  %v552_v46 = vsel %vm509_vm3, %v8705_v40, 0.0  ;;  %v558_v60 = vpack.c.bf16 %v8705_v40, %v8705_v40  ;;  %8599 = vmatprep.subr.msk.bf16.mxu0 %vm683_vm5, %v670_v2 }
 0x300   : > { %v556_v47 = vpack.c.bf16 %v8707_v43, %v8699_v28  ;;  %553 = vadd.xlane.f32.xlu0 %v552_v46  ;;  %v543_v48 = vsel %vm490_vm2, %v8707_v43, 0.0  ;;  %v1189_v62 = vsel %vm401_vm1, %v1167_v45, 0  ;;  %v1169_v63 = vpop.permute.xlu0 %1168 }
 0x301   : > { %544 = vadd.xlane.f32.xlu1 %v543_v48  ;;  %v1192_v5 = vsel %vm401_vm1, %v1169_v63, 0 }
 0x302   : > { %v8709_v49 = vpop.eup %8708  ;;  %7788 = vmatmul.mubr.msk.bf16.vlgmr.msra.gmra.mrb[8].mxu0 %vm490_vm2, %v556_v47 }
 0x303   : > { %v8711_v52 = vpop.eup %8710  ;;  %v1155_v53 = vpop.permute.xlu1 %1154  ;;  %v546_v54 = vsel %vm490_vm2, %v8709_v49, 0.0  ;;  %7796 = vmatpush3.bf16.msra.mxu0 %v685_v4 }
 0x304   : > { %7855 = vmatprep.mubr.msk.bf16.mxu1 %vm401_vm1, %v1155_v53  ;;  %547 = vadd.xlane.f32.xlu0 %v546_v54  ;;  %v557_v57 = vpack.c.bf16 %v8711_v52, %v8709_v49  ;;  %v1157_v6 = vpop.permute.xlu0 %1156  ;;  %v549_v10 = vsel %vm490_vm2, %v8711_v52, 0.0 }
 0x306   : > { %7791 = vmatprep.mubr.msk.bf16.mxu0 %vm490_vm2, %v557_v57  ;;  %7850 = vmatpush3.bf16.xpose.msra.mxu1 %v1186_v58 }
 0x307   : > { %8607 = vmatprep.subr.msk.bf16.mxu1 %vm401_vm1, %v1167_v45  ;;  %v1159_v8 = vpop.permute.xlu1 %1158 }
 0x308   : > { %v1161_v9 = vpop.permute.xlu0 %1160 }
 0x30a   : > { %7792 = vmatmul.mubr.msk.bf16.gmra.mrb[12].mxu0 %vm490_vm2, %v558_v60 }
 0x30e   : > { %7852 = vmatpush3.bf16.xpose.msra.mxu1 %v1189_v62 }
 0x30f   : > { %8608 = vmatprep.subr.msk.bf16.mxu1 %vm401_vm1, %v1169_v63 }
 0x312   : > { %946 = vrot.lane.b32.xlu1 %v9257_v22, %s9171_s15 }
 0x316   : > { %7854 = vmatpush3.bf16.xpose.msra.mxu1 %v1192_v5 }
 0x31a   : > { %944 = vrot.lane.b32.xlu0 %v9259_v23, %s9171_s15 }
 0x31d   : > { %7856 = vmatmul.mubr.msk.bf16.vlgmr.msra.gmra.mrb[16].mxu1 %vm401_vm1, %v1157_v6 }
 0x31e   : > { %7859 = vmatprep.mubr.msk.bf16.mxu1 %vm401_vm1, %v1159_v8  ;;  %950 = vrot.lane.b32.xlu0 %v9269_v32, %s9171_s15 }
 0x322   : > { %1545 = vrot.lane.b32.xlu0 %v9257_v22, %s9172_s18 }
 0x325   : > { %7860 = vmatmul.mubr.msk.bf16.gmra.mrb[20].mxu1 %vm401_vm1, %v1161_v9 }
 0x326   : > { %1549 = vrot.lane.b32.xlu0 %v9269_v32, %s9172_s18 }
 0x32a   : > { %1537 = vrot.lane.b32.xlu0 %v9257_v22, %s9173_s19 }
 0x32e   : > { %1541 = vrot.lane.b32.xlu0 %v9269_v32, %s9173_s19 }
 0x336   : > { %550 = vadd.xlane.f32.xlu1 %v549_v10 }
 0x338   : > { %v888_v12 = vpop.xlane.xlu0 %887  ;;  %v885_v21 = vpop.xlane.xlu1 %884 }
 0x339   : > { %v900_v46 = vsub.f32 %v9387_v42, %v885_v21  ;;  %v901_v47 = vsub.f32 %v9389_v44, %v888_v12 }
 0x33b   : > { %v909_v62 = vmul.f32 1.442695, %v900_v46  ;;  %v911_v2 = vmul.f32 1.442695, %v901_v47 }
 0x33c   : > { %v882_v13 = vpop.xlane.xlu0 %881  ;;  %v879_v24 = vpop.xlane.xlu1 %878 }
 0x33d   : > { %v898_v19 = vsub.f32 %v9397_v50, %v879_v24  ;;  %v899_v36 = vsub.f32 %v9399_v51, %v882_v13 }
 0x33f   : > { %v905_v37 = vmul.f32 1.442695, %v898_v19  ;;  %v907_v39 = vmul.f32 1.442695, %v899_v36  ;;  %v7358_v36 = vld [vmem:[%s11675_s5 + $0xe8] sm:$0xff]  }
 0x340   : > { %v9483_v14 = vpop.xlane.xlu0 %893  ;;  %v9488_v7 = vpop.xlane.xlu1 %896 }
 0x341   : > { %v903_v42 = vsub.f32 %v9407_v56, %v9483_v14  ;;  %v904_v12 = vsub.f32 %v9405_v55, %v9488_v7 }
 0x343   : > { %v915_v9 = vmul.f32 1.442695, %v903_v42 }
 0x344   : > { %v891_v3 = vpop.xlane.xlu1 %890 }
 0x345   : > { %v902_v52 = vsub.f32 %v9413_v59, %v891_v3  ;;  %v917_v3 = vmul.f32 1.442695, %v904_v12 }
 0x347   : > { %948 = vrot.lane.b32.xlu1 %v9267_v31, %s9171_s15  ;;  %v913_v5 = vmul.f32 1.442695, %v902_v52  ;;  %v7359_v52 = vld [vmem:[%s11675_s5 + $0xf0] sm:$0xff]  }
 0x34b   : > { %1543 = vrot.lane.b32.xlu1 %v9259_v23, %s9172_s18 }
 0x34f   : > { %1547 = vrot.lane.b32.xlu1 %v9267_v31, %s9172_s18 }
 0x353   : > { %1535 = vrot.lane.b32.xlu1 %v9259_v23, %s9173_s19 }
 0x357   : > { %1539 = vrot.lane.b32.xlu1 %v9267_v31, %s9173_s19 }
 0x385   : > { %v542_v15 = vpop.xlane.xlu0 %541 }
 0x386   : > { %8712 = vrcp.f32 %v542_v15 }
 0x389   : > { %v539_v17 = vpop.xlane.xlu0 %538 }
 0x38a   : > { %v536_v26 = vpop.xlane.xlu1 %535  ;;  %8714 = vrcp.f32 %v539_v17 }
 0x38d   : > { %v554_v18 = vpop.xlane.xlu0 %553 }
 0x38e   : > { %v545_v28 = vpop.xlane.xlu1 %544 }
 0x38f   : > { %8716 = vrcp.f32 %v545_v28 }
 0x390   : > { %8718 = vrcp.f32 %v536_v26  ;;  %v8713_v41 = vpop.eup %8712 }
 0x391   : > { %v548_v20 = vpop.xlane.xlu0 %547  ;;  %8720 = vrcp.f32 %v554_v18 }
 0x392   : > { %v9490_v29 = vpop.permute.xlu1 %946  ;;  %8722 = vrcp.f32 %v548_v20 }
 0x394   : > { %v8715_v45 = vpop.eup %8714 }
 0x395   : > { %v9485_v61 = vpop.permute.xlu0 %944 }
 0x396   : > { %7821 = vmatprep.subr.bf16.mxu0 %v9485_v61 }
 0x399   : > { %v9492_v16 = vpop.permute.xlu0 %950  ;;  %v8717_v51 = vpop.eup %8716 }
 0x39a   : > { %v8719_v49 = vpop.eup %8718  ;;  %v968_v28 = vand.u32 %v9492_v16, %v9428_v27  ;;  %v7357_v16 = vld [vmem:[%s11675_s5 + $0xe0] sm:$0xff]  }
 0x39b   : > { %v8721_v59 = vpop.eup %8720 }
 0x39c   : > { %v8723_v56 = vpop.eup %8722 }
 0x39d   : > { %v1546_v35 = vpop.permute.xlu0 %1545 }
 0x39e   : > { %v1567_v40 = vsel %vm401_vm1, %v1546_v35, 0 }
 0x3a1   : > { %v1550_v6 = vpop.permute.xlu0 %1549 }
 0x3c3   : > { %v551_v30 = vpop.xlane.xlu1 %550 }
 0x3c4   : > { %8724 = vrcp.f32 %v551_v30 }
 0x3c5   : > { %8726 = vpow2.f32 %v905_v37  ;;  %v7218_v37 = vunpack.c.l.bf16 %v7357_v16 }
 0x3c6   : > { %8728 = vpow2.f32 %v907_v39  ;;  %v6909_v39 = vld [vmem:[%s9240_s30 + $0x40] sm:$0xff] }
 0x3c7   : > { %v9494_v33 = vpop.permute.xlu1 %948  ;;  %8730 = vpow2.f32 %v909_v62  ;;  %v6911_v62 = vld [vmem:[%s9240_s30 + $0x50] sm:$0xff] }
 0x3c8   : > { %8732 = vpow2.f32 %v911_v2  ;;  %v7226_v2 = vunpack.c.l.bf16 %v7359_v52 }
 0x3c9   : > { %8734 = vpow2.f32 %v913_v5 }
 0x3ca   : > { %8736 = vpow2.f32 %v915_v9 }
 0x3cb   : > { %v1544_v11 = vpop.permute.xlu1 %1543  ;;  %8738 = vpow2.f32 %v917_v3 }
 0x3cc   : > { %8610 = vmatprep.subr.msk.bf16.mxu1 %vm401_vm1, %v1544_v11  ;;  %v1564_v34 = vsel %vm401_vm1, %v1544_v11, 0 }
 0x3cd   : > { %7890 = vmatpush3.bf16.xpose.msra.mxu1 %v1564_v34  ;;  %v1538_v34 = vpop.permute.xlu0 %1537 }
 0x3ce   : > { %8611 = vmatprep.subr.msk.bf16.mxu1 %vm401_vm1, %v1546_v35  ;;  %v8725_v14 = vpop.eup %8724 }
 0x3cf   : > { %v1548_v25 = vpop.permute.xlu1 %1547  ;;  %v9517_v18 = vpop.eup %8726 }
 0x3d0   : > { %v1570_v44 = vsel %vm401_vm1, %v1548_v25, 0  ;;  %v9519_v24 = vpop.eup %8728  ;;  %v919_v3 = vsel %vm490_vm2, %v9517_v18, 0.0 }
 0x3d1   : > { %v940_v7 = vpack.c.bf16 %v9519_v24, %v9517_v18  ;;  %v6912_v18 = vld [vmem:[%s9240_s30 + $0x58] sm:$0xff] }
 0x3d3   : > { %v1536_v38 = vpop.permute.xlu1 %1535 }
 0x3d4   : > { %7897 = vmatprep.mubr.msk.bf16.mxu1 %vm401_vm1, %v1536_v38  ;;  %v6908_v38 = vld [vmem:[%s9240_s30 + $0x38] sm:$0xff] }
 0x3d5   : > { %v7789_v43 = vpop.f32.mrb[8].mxu0  ;;  %7892 = vmatpush3.bf16.xpose.msra.mxu1 %v1567_v40  ;;  %v7222_v40 = vunpack.c.l.bf16 %v7358_v36 }
 0x3d6   : > { %v622_v50 = vpop.f32.mrb[9].mxu0  ;;  %8612 = vmatprep.subr.msk.bf16.mxu1 %vm401_vm1, %v1548_v25  ;;  %v661_v53 = vmul.f32 %v8713_v41, %v7789_v43  ;;  %v7219_v43 = vunpack.c.h.bf16 %v7357_v16 }
 0x3d7   : > { %v7790_v48 = vpop.f32.mrb[10].mxu0  ;;  %v659_v58 = vmul.f32 %v8719_v49, %v622_v50  ;;  %v1540_v19 = vpop.permute.xlu1 %1539  ;;  %v1917_v50 = vpack.c.bf16 %v6909_v39, %v6908_v38 }
 0x3d8   : > { %v662_v54 = vmul.f32 %v8717_v51, %v7790_v48  ;;  %v625_v57 = vpop.f32.mrb[11].mxu0  ;;  %v7223_v51 = vunpack.c.h.bf16 %v7358_v36  ;;  %v1542_v48 = vpop.permute.xlu0 %1541 }
 0x3d9   : > { %v660_v60 = vmul.f32 %v8715_v45, %v625_v57 }
 0x3da   : > { %v667_v63 = vpack.c.bf16 %v662_v54, %v661_v53 }
 0x3db   : > { %v666_v4 = vpack.c.bf16 %v660_v60, %v659_v58  ;;  %v6876_v58 = vld [vmem:[%s11675_s5 + $0xf8] sm:$0x1]  ;;  %v6910_v60 = vld [vmem:[%s9240_s30 + $0x48] sm:$0xff] }
 0x3dd   : > { %v7793_v8 = vpop.f32.mrb[12].mxu0  ;;  %7797 = vmatprep.mubr.msk.bf16.mxu0 %vm401_vm1, %v666_v4  ;;  %7894 = vmatpush3.bf16.xpose.msra.mxu1 %v1570_v44  ;;  %v1153_v4 = vunpack.c.l.bf16 %v6876_v58 }
 0x3de   : > { %v638_v10 = vpop.f32.mrb[13].mxu0  ;;  %7798 = vmatmul.mubr.msk.bf16.vlgmr.msra.gmra.mrb[16].mxu0 %vm401_vm1, %v667_v63  ;;  %8613 = vmatprep.subr.msk.bf16.mxu1 %vm401_vm1, %v1550_v6  ;;  %v665_v15 = vmul.f32 %v8721_v59, %v7793_v8  ;;  %v1918_v8 = vpack.c.bf16 %v6911_v62, %v6910_v60 }
 0x3df   : > { %7822 = vmatpush3.bf16.msra.mxu0 %v9485_v61  ;;  %v7794_v13 = vpop.f32.mrb[14].mxu0  ;;  %v663_v20 = vmul.f32 %v8723_v56, %v638_v10  ;;  %v1573_v61 = vsel %vm401_vm1, %v1550_v6, 0  ;;  %v7227_v6 = vunpack.c.h.bf16 %v7359_v52 }
 0x3e0   : > { %7823 = vmatprep.subr.bf16.mxu0 %v9490_v29  ;;  %v641_v17 = vpop.f32.mrb[15].mxu0  ;;  %v669_v55 = vpack.c.bf16 %v665_v15, %v665_v15 }
 0x3e1   : > { %v664_v21 = vmul.f32 %v8725_v14, %v641_v17 }
 0x3e3   : > { %v668_v26 = vpack.c.bf16 %v664_v21, %v663_v20  ;;  %7824 = vmatpush3.bf16.msra.mxu0 %v9490_v29  ;;  %v9533_v29 = vpop.eup %8730 }
 0x3e4   : > { %7825 = vmatprep.subr.bf16.mxu0 %v9494_v33  ;;  %v9535_v30 = vpop.eup %8732  ;;  %v925_v21 = vsel %vm490_vm2, %v9533_v29, 0.0 }
 0x3e5   : > { %7801 = vmatprep.mubr.msk.bf16.mxu0 %vm401_vm1, %v668_v26  ;;  %7896 = vmatpush3.bf16.xpose.msra.mxu1 %v1573_v61  ;;  %v9537_v11 = vpop.eup %8734  ;;  %v922_v26 = vsel %vm490_vm2, %v9519_v24, 0.0  ;;  %v6914_v24 = vld [vmem:[%s9240_s30 + $0x68] sm:$0x1] }
 0x3e6   : > { %7802 = vmatmul.mubr.msk.bf16.gmra.mrb[20].mxu0 %vm401_vm1, %v669_v55  ;;  %7931 = vmatprep.subr.bf16.mxu1 %v9222_v0  ;;  %v9542_v35 = vpop.eup %8736  ;;  %v928_v55 = vsel %vm490_vm2, %v9535_v30, 0.0 }
 0x3e7   : > { %7826 = vmatpush3.bf16.msra.mxu0 %v9494_v33  ;;  %7829 = vmatprep.mubr.msk.bf16.mxu0 %vm490_vm2, %v940_v7  ;;  %v941_v33 = vpack.c.bf16 %v9535_v30, %v9533_v29  ;;  %v942_v25 = vpack.c.bf16 %v9542_v35, %v9537_v11  ;;  %v8739_v45 = vpop.eup %8738  ;;  %v931_v7 = vsel %vm490_vm2, %v9537_v11, 0.0  ;;  %v1052_v30 = vld [vmem:[%s11673_s3 + $0x4] sm:$0xf]  ;;  %v934_v16 = vsel %vm490_vm2, %v9542_v35, 0.0 }
 0x3e8   : > { %7827 = vmatprep.subr.bf16.mxu0 %v968_v28  ;;  %v943_v57 = vpack.c.bf16 %v8739_v45, %v8739_v45  ;;  %v937_v61 = vsel %vm509_vm3, %v8739_v45, 0.0  ;;  %v1066_v11 = vsel %vm683_vm5, %v1052_v30, 0 }
 0x3eb   : > { %7828 = vmatpush3.bf16.msra.mxu0 %v968_v28  ;;  %v6913_v28 = vld [vmem:[%s9240_s30 + $0x60] sm:$0xff] }
 0x3ec   : > { %7898 = vmatmul.mubr.msk.bf16.vlgmr.msra.gmra.mrb[24].mxu1 %vm401_vm1, %v1538_v34  ;;  %v1919_v29 = vpack.c.bf16 %v6913_v28, %v6912_v18  ;;  %v1920_v34 = vpack.c.bf16 %v6914_v24, %v6914_v24  ;;  %8604 = vmatprep.subr.msk.bf16.mxu0 %vm683_vm5, %v1052_v30 }
 0x3ed   : > { %7901 = vmatprep.mubr.msk.bf16.mxu1 %vm401_vm1, %v1540_v19  ;;  %7932 = vmatpush3.bf16.msra.mxu1 %v9222_v0 }
 0x3ee   : > { %7830 = vmatmul.mubr.msk.bf16.vlgmr.msra.gmra.mrb[24].mxu0 %vm490_vm2, %v941_v33  ;;  %7933 = vmatprep.subr.bf16.mxu1 %v9227_v1 }
 0x3ef   : > { %7833 = vmatprep.mubr.msk.bf16.mxu0 %vm490_vm2, %v942_v25  ;;  %7838 = vmatpush3.bf16.msra.mxu0 %v1066_v11 }
 0x3f0   : > { %v7857_v41 = vpop.f32.mrb[16].mxu1 }
 0x3f1   : > { %v1228_v46 = vpop.f32.mrb[17].mxu1  ;;  %7934 = vmatpush3.bf16.msra.mxu1 %v9227_v1  ;;  %v9565_v53 = vadd.f32 %v7857_v41, %v7222_v40 }
 0x3f2   : > { %v9560_v0 = vadd.f32 %v7218_v37, %v1228_v46  ;;  %v7858_v47 = vpop.f32.mrb[18].mxu1 }
 0x3f3   : > { %v1231_v49 = vpop.f32.mrb[19].mxu1  ;;  %v9578_v42 = vadd.f32 %v7858_v47, %v7223_v51  ;;  %v1264_v44 = vsel %vm490_vm2, %v9565_v53, -inf  ;;  %v7360_v51 = vld [vmem:[%s11675_s5 + $0x150] sm:$0xff]   ;;  %v7361_v47 = vld [vmem:[%s11675_s5 + $0x158] sm:$0xff]  }
 0x3f4   : > { %v9567_v54 = vadd.f32 %v7219_v43, %v1231_v49  ;;  %7902 = vmatmul.mubr.msk.bf16.gmra.mrb[28].mxu1 %vm401_vm1, %v1542_v48  ;;  %v1258_v1 = vsel %vm490_vm2, %v9560_v0, -inf  ;;  %v7230_v48 = vunpack.c.l.bf16 %v7360_v51  ;;  %v7234_v49 = vunpack.c.l.bf16 %v7361_v47 }
 0x3f5   : > { %1259 = vmax.xlane.f32.xlu1 %v1258_v1  ;;  %7935 = vmatprep.mubr.msk.bf16.mxu1 %vm294_vm0, %v1917_v50  ;;  %v1267_v56 = vsel %vm490_vm2, %v9578_v42, -inf  ;;  %v7231_v1 = vunpack.c.h.bf16 %v7360_v51 }
 0x3f6   : > { %7834 = vmatmul.mubr.msk.bf16.gmra.mrb[28].mxu0 %vm490_vm2, %v943_v57  ;;  %v1261_v63 = vsel %vm490_vm2, %v9567_v54, -inf }
 0x3f7   : > { %1262 = vmax.xlane.f32.xlu0 %v1261_v63  ;;  %v7235_v63 = vunpack.c.h.bf16 %v7361_v47 }
 0x3f8   : > { %v7861_v5 = vpop.f32.mrb[20].mxu1 }
 0x3f9   : > { %1265 = vmax.xlane.f32.xlu1 %v1264_v44  ;;  %v1244_v59 = vpop.f32.mrb[21].mxu1  ;;  %v9589_v13 = vadd.f32 %v7861_v5, %v1153_v4 }
 0x3fa   : > { %v9585_v9 = vadd.f32 %v7226_v2, %v1244_v59  ;;  %v7862_v10 = vpop.f32.mrb[22].mxu1 }
 0x3fb   : > { %1268 = vmax.xlane.f32.xlu0 %v1267_v56  ;;  %v1247_v12 = vpop.f32.mrb[23].mxu1  ;;  %v1276_v20 = vsel %vm509_vm3, %v9589_v13, -inf }
 0x3fc   : > { %v9591_v14 = vadd.f32 %v7227_v6, %v1247_v12  ;;  %v1270_v15 = vsel %vm490_vm2, %v9585_v9, -inf  ;;  %7936 = vmatmul.mubr.msk.bf16.vlgmr.msra.gmra.mrb[32].mxu1 %vm294_vm0, %v1918_v8 }
 0x3fd   : > { %1271 = vmax.xlane.f32.xlu1 %v1270_v15  ;;  %7939 = vmatprep.mubr.msk.bf16.mxu1 %vm294_vm0, %v1919_v29 }
 0x3fe   : > { %v1273_v17 = vsel %vm490_vm2, %v9591_v14, -inf }
 0x3ff   : > { %1274 = vmax.xlane.f32.xlu0 %v1273_v17 }
 0x401   : > { %1277 = vmax.xlane.f32.xlu1 %v1276_v20 }
 0x403   : > { %926 = vadd.xlane.f32.xlu0 %v925_v21 }
 0x404   : > { %7940 = vmatmul.mubr.msk.bf16.gmra.mrb[36].mxu1 %vm294_vm0, %v1920_v34 }
 0x405   : > { %920 = vadd.xlane.f32.xlu1 %v919_v3 }
 0x407   : > { %923 = vadd.xlane.f32.xlu0 %v922_v26 }
 0x409   : > { %929 = vadd.xlane.f32.xlu1 %v928_v55 }
 0x40b   : > { %938 = vadd.xlane.f32.xlu0 %v937_v61 }
 0x40f   : > { %932 = vadd.xlane.f32.xlu0 %v931_v7 }
 0x41a   : > { %1327 = vrot.lane.b32.xlu1 %v9257_v22, %s9174_s14 }
 0x425   : > { %1325 = vrot.lane.b32.xlu0 %v9259_v23, %s9174_s14 }
 0x429   : > { %1331 = vrot.lane.b32.xlu0 %v9269_v32, %s9174_s14 }
 0x43e   : > { %935 = vadd.xlane.f32.xlu1 %v934_v16 }
 0x44f   : > { %1329 = vrot.lane.b32.xlu1 %v9267_v31, %s9174_s14 }
 0x482   : > { %v9635_v38 = vpop.xlane.xlu1 %1259 }
 0x483   : > { %v1279_v34 = vsub.f32 %v9560_v0, %v9635_v38 }
 0x484   : > { %v1263_v33 = vpop.xlane.xlu0 %1262 }
 0x485   : > { %v1280_v61 = vsub.f32 %v9567_v54, %v1263_v33 }
 0x486   : > { %v9637_v41 = vpop.xlane.xlu1 %1265 }
 0x487   : > { %v1288_v33 = vmul.f32 1.442695, %v1280_v61 }
 0x488   : > { %v9631_v19 = vpop.xlane.xlu0 %1268 }
 0x489   : > { %v1282_v51 = vsub.f32 %v9578_v42, %v9631_v19  ;;  %v9687_v42 = vld [vmem:[%s11672_s2] ss:$0 sm:$0xff] }
 0x48a   : > { %v9639_v35 = vpop.xlane.xlu1 %1271 }
 0x48c   : > { %v9633_v25 = vpop.xlane.xlu0 %1274 }
 0x48e   : > { %v9641_v45 = vpop.xlane.xlu1 %1277 }
 0x490   : > { %v927_v36 = vpop.xlane.xlu0 %926 }
 0x491   : > { %8740 = vrcp.f32 %v927_v36 }
 0x492   : > { %v921_v46 = vpop.xlane.xlu1 %920 }
 0x493   : > { %8742 = vrcp.f32 %v921_v46  ;;  %v1286_v46 = vmul.f32 1.442695, %v1279_v34 }
 0x494   : > { %v924_v37 = vpop.xlane.xlu0 %923 }
 0x496   : > { %v930_v50 = vpop.xlane.xlu1 %929 }
 0x497   : > { %8744 = vrcp.f32 %v930_v50 }
 0x498   : > { %v939_v39 = vpop.xlane.xlu0 %938  ;;  %8746 = vrcp.f32 %v924_v37 }
 0x499   : > { %8748 = vrcp.f32 %v939_v39  ;;  %v1284_v39 = vsub.f32 %v9591_v14, %v9633_v25  ;;  %v1292_v25 = vmul.f32 1.442695, %v1282_v51 }
 0x49a   : > { %v1328_v18 = vpop.permute.xlu1 %1327 }
 0x49b   : > { %v8741_v58 = vpop.eup %8740 }
 0x49c   : > { %v933_v40 = vpop.xlane.xlu0 %932 }
 0x49d   : > { %v8743_v4 = vpop.eup %8742  ;;  %8750 = vrcp.f32 %v933_v40 }
 0x4a0   : > { %v1326_v43 = vpop.permute.xlu0 %1325 }
 0x4a1   : > { %7863 = vmatprep.subr.bf16.mxu0 %v1326_v43  ;;  %v8745_v6 = vpop.eup %8744 }
 0x4a2   : > { %v8747_v12 = vpop.eup %8746 }
 0x4a4   : > { %v1332_v47 = vpop.permute.xlu0 %1331 }
 0x4bf   : > { %v7899_v52 = vpop.f32.mrb[24].mxu1 }
 0x4c0   : > { %v1609_v57 = vpop.f32.mrb[25].mxu1  ;;  %v9651_v8 = vadd.f32 %v7899_v52, %v7234_v49  ;;  %v1283_v49 = vsub.f32 %v9585_v9, %v9639_v35 }
 0x4c1   : > { %v9649_v60 = vadd.f32 %v7230_v48, %v1609_v57  ;;  %v7831_v62 = vpop.f32.mrb[24].mxu0  ;;  %v7900_v2 = vpop.f32.mrb[26].mxu1  ;;  %v1281_v48 = vsub.f32 %v9565_v53, %v9637_v41  ;;  %v1296_v41 = vmul.f32 1.442695, %v1284_v39 }
 0x4c2   : > { %v1004_v5 = vpop.f32.mrb[25].mxu0  ;;  %v1612_v44 = vpop.f32.mrb[27].mxu1  ;;  %v1043_v15 = vmul.f32 %v8741_v58, %v7831_v62  ;;  %v9657_v21 = vadd.f32 %v7900_v2, %v7235_v63  ;;  %v1645_v24 = vsel %vm490_vm2, %v9651_v8, -inf  ;;  %v1294_v63 = vmul.f32 1.442695, %v1283_v49 }
 0x4c3   : > { %v9653_v59 = vadd.f32 %v7231_v1, %v1612_v44  ;;  %v7832_v10 = vpop.f32.mrb[26].mxu0  ;;  %v1639_v56 = vsel %vm490_vm2, %v9649_v60, -inf  ;;  %v1041_v3 = vmul.f32 %v8743_v4, %v1004_v5  ;;  %v1349_v1 = vand.u32 %v1332_v47, %v9428_v27  ;;  %v8749_v62 = vpop.eup %8748 }
 0x4c4   : > { %v1044_v17 = vmul.f32 %v8745_v6, %v7832_v10  ;;  %v1007_v20 = vpop.f32.mrb[27].mxu0  ;;  %1640 = vmax.xlane.f32.xlu1 %v1639_v56  ;;  %v1648_v54 = vsel %vm490_vm2, %v9657_v21, -inf  ;;  %v1290_v9 = vmul.f32 1.442695, %v1281_v48  ;;  %v8751_v4 = vpop.eup %8750  ;;  %v1285_v5 = vsub.f32 %v9589_v13, %v9641_v45 }
 0x4c5   : > { %v1042_v26 = vmul.f32 %v8747_v12, %v1007_v20  ;;  %v1642_v55 = vsel %vm490_vm2, %v9653_v59, -inf }
 0x4c6   : > { %v1049_v7 = vpack.c.bf16 %v1044_v17, %v1043_v15  ;;  %1643 = vmax.xlane.f32.xlu0 %v1642_v55  ;;  %v1433_v17 = vld [vmem:[%s11673_s3 + $0x8] sm:$0xf]  ;;  %v1298_v20 = vmul.f32 1.442695, %v1285_v5 }
 0x4c7   : > { %v1048_v28 = vpack.c.bf16 %v1042_v26, %v1041_v3  ;;  %v9662_v29 = vpop.f32.mrb[28].mxu1 }
 0x4c8   : > { %1646 = vmax.xlane.f32.xlu1 %v1645_v24  ;;  %v9668_v30 = vpop.f32.mrb[29].mxu1 }
 0x4c9   : > { %v7835_v11 = vpop.f32.mrb[28].mxu0  ;;  %7839 = vmatprep.mubr.msk.bf16.mxu0 %vm401_vm1, %v1048_v28  ;;  %v7904_v16 = vpop.f32.mrb[30].mxu1  ;;  %v1447_v28 = vsel %vm683_vm5, %v1433_v17, 0 }
 0x4ca   : > { %v1020_v36 = vpop.f32.mrb[29].mxu0  ;;  %1649 = vmax.xlane.f32.xlu0 %v1648_v54  ;;  %7840 = vmatmul.mubr.msk.bf16.vlgmr.msra.gmra.mrb[16].mxu0 %vm401_vm1, %v1049_v7  ;;  %v9674_v37 = vpop.f32.mrb[31].mxu1  ;;  %v1047_v10 = vmul.f32 %v8749_v62, %v7835_v11  ;;  %v7362_v16 = vld [vmem:[%s11675_s5 + $0x160] sm:$0xff]  }
 0x4cb   : > { %7864 = vmatpush3.bf16.msra.mxu0 %v1326_v43  ;;  %v936_v0 = vpop.xlane.xlu1 %935  ;;  %v7836_v38 = vpop.f32.mrb[30].mxu0  ;;  %v1045_v56 = vmul.f32 %v8751_v4, %v1020_v36 }
 0x4cc   : > { %8752 = vrcp.f32 %v936_v0  ;;  %7865 = vmatprep.subr.bf16.mxu0 %v1328_v18  ;;  %v1023_v50 = vpop.f32.mrb[31].mxu0  ;;  %v1051_v45 = vpack.c.bf16 %v1047_v10, %v1047_v10  ;;  %v6895_v38 = vld [vmem:[%s11675_s5 + $0x168] sm:$0x1] }
 0x4cd   : > { %8754 = vpow2.f32 %v1288_v33  ;;  %v7238_v33 = vunpack.c.l.bf16 %v7362_v16  ;;  %v1534_v39 = vunpack.c.l.bf16 %v6895_v38 }
 0x4ce   : > { %8756 = vpow2.f32 %v1286_v46 }
 0x4cf   : > { %7866 = vmatpush3.bf16.msra.mxu0 %v1328_v18  ;;  %v1330_v40 = vpop.permute.xlu1 %1329  ;;  %v7937_v43 = vpop.f32.mrb[32].mxu1  ;;  %8758 = vpow2.f32 %v1292_v25  ;;  %v9726_v47 = vadd.f32 %v7238_v33, %v9668_v30 }
 0x4d0   : > { %7867 = vmatprep.subr.bf16.mxu0 %v1330_v40  ;;  %v1976_v19 = vadd.f32 %v9687_v42, %v7937_v43  ;;  %v1967_v14 = vpop.f32.mrb[33].mxu1  ;;  %8760 = vpow2.f32 %v1296_v41  ;;  %v9734_v43 = vadd.f32 %v9662_v29, %v1534_v39 }
 0x4d1   : > { %v1968_v52 = vadd.f32 %v9687_v42, %v1967_v14  ;;  %v7938_v53 = vpop.f32.mrb[34].mxu1  ;;  %8762 = vpow2.f32 %v1290_v9  ;;  %v1651_v49 = vsel %vm490_vm2, %v9726_v47, -inf }
 0x4d2   : > { %v1979_v57 = vadd.f32 %v9687_v42, %v7938_v53  ;;  %v1970_v58 = vpop.f32.mrb[35].mxu1  ;;  %8764 = vpow2.f32 %v1294_v63  ;;  %v1657_v30 = vsel %vm509_vm3, %v9734_v43, -inf }
 0x4d3   : > { %7868 = vmatpush3.bf16.msra.mxu0 %v1330_v40  ;;  %v1971_v35 = vadd.f32 %v9687_v42, %v1970_v58  ;;  %8766 = vpow2.f32 %v1298_v20 }
 0x4d4   : > { %7869 = vmatprep.subr.bf16.mxu0 %v1349_v1  ;;  %v9694_v2 = vpack.c.bf16 %v1979_v57, %v1976_v19 }
 0x4d5   : > { %v9698_v44 = vpack.c.bf16 %v1971_v35, %v1968_v52 }
 0x4d6   : > { %v8753_v6 = vpop.eup %8752 }
 0x4d7   : > { %v1046_v12 = vmul.f32 %v8753_v6, %v1023_v50  ;;  %7870 = vmatpush3.bf16.msra.mxu0 %v1349_v1  ;;  %v8755_v15 = vpop.eup %8754  ;;  %v7239_v50 = vunpack.c.h.bf16 %v7362_v16 }
 0x4d8   : > { %8609 = vmatprep.subr.msk.bf16.mxu0 %vm683_vm5, %v1433_v17  ;;  %v8757_v13 = vpop.eup %8756  ;;  %v1303_v29 = vsel %vm490_vm2, %v8755_v15, 0.0 }
 0x4d9   : > { %v1050_v3 = vpack.c.bf16 %v1046_v12, %v1045_v56  ;;  %1706 = vrot.lane.b32.xlu1 %v9259_v23, %s9175_s16  ;;  %v1321_v26 = vpack.c.bf16 %v8755_v15, %v8757_v13  ;;  %v8759_v55 = vpop.eup %8758  ;;  %v9731_v40 = vadd.f32 %v7239_v50, %v9674_v37  ;;  %v1300_v37 = vsel %vm490_vm2, %v8757_v13, 0.0 }
 0x4da   : > { %v8761_v61 = vpop.eup %8760  ;;  %v1309_v25 = vsel %vm490_vm2, %v8759_v55, 0.0 }
 0x4db   : > { %7843 = vmatprep.mubr.msk.bf16.mxu0 %vm401_vm1, %v1050_v3  ;;  %v8763_v7 = vpop.eup %8762  ;;  %v1654_v19 = vsel %vm490_vm2, %v9731_v40, -inf  ;;  %v1315_v53 = vsel %vm490_vm2, %v8761_v61, 0.0 }
 0x4dc   : > { %7844 = vmatmul.mubr.msk.bf16.gmra.mrb[20].mxu0 %vm401_vm1, %v1051_v45  ;;  %v8765_v18 = vpop.eup %8764  ;;  %v1322_v23 = vpack.c.bf16 %v8759_v55, %v8763_v7  ;;  %v1306_v14 = vsel %vm490_vm2, %v8763_v7, 0.0 }
 0x4dd   : > { %7871 = vmatprep.mubr.msk.bf16.mxu0 %vm490_vm2, %v1321_v26  ;;  %v1323_v24 = vpack.c.bf16 %v8761_v61, %v8765_v18  ;;  %v8767_v34 = vpop.eup %8766  ;;  %v1312_v41 = vsel %vm490_vm2, %v8765_v18, 0.0 }
 0x4de   : > { %v1324_v11 = vpack.c.bf16 %v8767_v34, %v8767_v34  ;;  %v1318_v52 = vsel %vm509_vm3, %v8767_v34, 0.0 }
 0x4e0   : > { %1708 = vrot.lane.b32.xlu0 %v9257_v22, %s9175_s16  ;;  %v9718_v22 = vpop.f32.mrb[36].mxu1 }
 0x4e1   : > { %v1983_v54 = vpop.f32.mrb[37].mxu1  ;;  %v1992_v38 = vadd.f32 %v9687_v42, %v9718_v22 }
 0x4e2   : > { %v1984_v36 = vadd.f32 %v9687_v42, %v1983_v54  ;;  %v7942_v0 = vpop.f32.mrb[38].mxu1 }
 0x4e3   : > { %v1986_v46 = vpop.f32.mrb[39].mxu1 }
 0x4e4   : > { %7872 = vmatmul.mubr.msk.bf16.vlgmr.msra.gmra.mrb[32].mxu0 %vm490_vm2, %v1322_v23  ;;  %v1987_v51 = vadd.f32 %v9687_v42, %v1986_v46 }
 0x4e5   : > { %7875 = vmatprep.mubr.msk.bf16.mxu0 %vm490_vm2, %v1323_v24  ;;  %7880 = vmatpush3.bf16.msra.mxu0 %v1447_v28 }
 0x4e6   : > { %v9728_v48 = vpack.c.bf16 %v1987_v51, %v1984_v36  ;;  %v9803_v51 = vpack.c.bf16 %v1992_v38, %v1992_v38 }
 0x4ec   : > { %7876 = vmatmul.mubr.msk.bf16.gmra.mrb[36].mxu0 %vm490_vm2, %v1324_v11 }
 0x4fd   : > { %1652 = vmax.xlane.f32.xlu1 %v1651_v49 }
 0x4ff   : > { %1655 = vmax.xlane.f32.xlu0 %v1654_v19 }
 0x501   : > { %1658 = vmax.xlane.f32.xlu1 %v1657_v30 }
 0x503   : > { %1307 = vadd.xlane.f32.xlu0 %v1306_v14 }
 0x505   : > { %1301 = vadd.xlane.f32.xlu1 %v1300_v37 }
 0x507   : > { %1304 = vadd.xlane.f32.xlu0 %v1303_v29 }
 0x509   : > { %1310 = vadd.xlane.f32.xlu1 %v1309_v25 }
 0x50b   : > { %1319 = vadd.xlane.f32.xlu0 %v1318_v52 }
 0x50d   : > { %1316 = vadd.xlane.f32.xlu1 %v1315_v53 }
 0x50f   : > { %1313 = vadd.xlane.f32.xlu0 %v1312_v41 }
 0x51e   : > { %1712 = vrot.lane.b32.xlu1 %v9269_v32, %s9175_s16 }
 0x522   : > { %2020 = vrot.lane.b32.xlu1 %v9698_v44, %s9164_s9 }
 0x525   : > { %1710 = vrot.lane.b32.xlu0 %v9267_v31, %s9175_s16 }
 0x551   : > { %v1641_v1 = vpop.xlane.xlu1 %1640 }
 0x552   : > { %v1660_v57 = vsub.f32 %v9649_v60, %v1641_v1 }
 0x553   : > { %v1644_v58 = vpop.xlane.xlu0 %1643 }
 0x554   : > { %v1667_v9 = vmul.f32 1.442695, %v1660_v57  ;;  %v1661_v35 = vsub.f32 %v9653_v59, %v1644_v58 }
 0x555   : > { %v1647_v62 = vpop.xlane.xlu1 %1646 }
 0x556   : > { %8768 = vpow2.f32 %v1667_v9  ;;  %v1669_v63 = vmul.f32 1.442695, %v1661_v35  ;;  %v1662_v4 = vsub.f32 %v9651_v8, %v1647_v62 }
 0x557   : > { %v1650_v5 = vpop.xlane.xlu0 %1649 }
 0x558   : > { %8770 = vpow2.f32 %v1669_v63  ;;  %v1671_v32 = vmul.f32 1.442695, %v1662_v4  ;;  %v1663_v6 = vsub.f32 %v9657_v21, %v1650_v5 }
 0x559   : > { %v9759_v10 = vpop.permute.xlu1 %1706 }
 0x55a   : > { %8772 = vpow2.f32 %v1671_v32  ;;  %v1673_v31 = vmul.f32 1.442695, %v1663_v6  ;;  %7905 = vmatprep.subr.bf16.mxu0 %v9759_v10 }
 0x55b   : > { %v9784_v13 = vpop.permute.xlu0 %1708 }
 0x55c   : > { %8774 = vpow2.f32 %v1673_v31 }
 0x560   : > { %v9762_v60 = vpop.eup %8768 }
 0x561   : > { %v1681_v59 = vsel %vm490_vm2, %v9762_v60, 0.0 }
 0x562   : > { %v9766_v56 = vpop.eup %8770  ;;  %1682 = vadd.xlane.f32.xlu1 %v1681_v59 }
 0x563   : > { %v1702_v8 = vpack.c.bf16 %v9766_v56, %v9762_v60  ;;  %v1684_v3 = vsel %vm490_vm2, %v9766_v56, 0.0 }
 0x564   : > { %v9770_v12 = vpop.eup %8772 }
 0x565   : > { %v1687_v21 = vsel %vm490_vm2, %v9770_v12, 0.0 }
 0x566   : > { %v9774_v15 = vpop.eup %8774  ;;  %1688 = vadd.xlane.f32.xlu0 %v1687_v21 }
 0x567   : > { %v1703_v17 = vpack.c.bf16 %v9774_v15, %v9770_v12  ;;  %v1690_v20 = vsel %vm490_vm2, %v9774_v15, 0.0 }
 0x568   : > { %1691 = vadd.xlane.f32.xlu1 %v1690_v20 }
 0x56a   : > { %1685 = vadd.xlane.f32.xlu0 %v1684_v3 }
 0x579   : > { %2024 = vrot.lane.b32.xlu1 %v9728_v48, %s9164_s9 }
 0x58a   : > { %v1653_v45 = vpop.xlane.xlu1 %1652 }
 0x58b   : > { %v1664_v55 = vsub.f32 %v9726_v47, %v1653_v45 }
 0x58c   : > { %v1656_v26 = vpop.xlane.xlu0 %1655 }
 0x58d   : > { %v1665_v61 = vsub.f32 %v9731_v40, %v1656_v26  ;;  %v1675_v28 = vmul.f32 1.442695, %v1664_v55 }
 0x58e   : > { %v1659_v7 = vpop.xlane.xlu1 %1658 }
 0x58f   : > { %v1677_v18 = vmul.f32 1.442695, %v1665_v61  ;;  %v1666_v23 = vsub.f32 %v9734_v43, %v1659_v7 }
 0x590   : > { %v1308_v0 = vpop.xlane.xlu0 %1307 }
 0x591   : > { %8776 = vpow2.f32 %v1677_v18  ;;  %v1679_v24 = vmul.f32 1.442695, %v1666_v23 }
 0x592   : > { %v1302_v46 = vpop.xlane.xlu1 %1301 }
 0x593   : > { %8778 = vpow2.f32 %v1679_v24 }
 0x594   : > { %8780 = vpow2.f32 %v1675_v28  ;;  %v1305_v50 = vpop.xlane.xlu0 %1304 }
 0x595   : > { %8782 = vrcp.f32 %v1308_v0 }
 0x596   : > { %v1311_v39 = vpop.xlane.xlu1 %1310  ;;  %8784 = vrcp.f32 %v1302_v46 }
 0x597   : > { %8786 = vrcp.f32 %v1311_v39 }
 0x598   : > { %v1320_v47 = vpop.xlane.xlu0 %1319  ;;  %8788 = vrcp.f32 %v1305_v50 }
 0x599   : > { %8790 = vrcp.f32 %v1320_v47 }
 0x59a   : > { %v1317_v40 = vpop.xlane.xlu1 %1316 }
 0x59b   : > { %v9789_v34 = vpop.eup %8776  ;;  %8792 = vrcp.f32 %v1317_v40 }
 0x59c   : > { %v1696_v11 = vsel %vm490_vm2, %v9789_v34, 0.0  ;;  %v1314_v43 = vpop.xlane.xlu0 %1313 }
 0x59d   : > { %v9793_v16 = vpop.eup %8778  ;;  %1697 = vadd.xlane.f32.xlu1 %v1696_v11  ;;  %8794 = vrcp.f32 %v1314_v43 }
 0x59e   : > { %v1699_v54 = vsel %vm509_vm3, %v9793_v16, 0.0  ;;  %v9797_v33 = vpop.eup %8780  ;;  %v1713_v59 = vpop.permute.xlu1 %1712  ;;  %v1705_v56 = vpack.c.bf16 %v9793_v16, %v9793_v16 }
 0x59f   : > { %1700 = vadd.xlane.f32.xlu0 %v1699_v54  ;;  %v1693_v36 = vsel %vm490_vm2, %v9797_v33, 0.0  ;;  %v8783_v42 = vpop.eup %8782  ;;  %v1730_v3 = vand.u32 %v1713_v59, %v9428_v27  ;;  %v1704_v26 = vpack.c.bf16 %v9789_v34, %v9797_v33 }
 0x5a0   : > { %v8785_v49 = vpop.eup %8784  ;;  %v1711_v21 = vpop.permute.xlu0 %1710 }
 0x5a1   : > { %v8787_v30 = vpop.eup %8786 }
 0x5a2   : > { %v8789_v37 = vpop.eup %8788  ;;  %v2021_v60 = vpop.permute.xlu1 %2020 }
 0x5a3   : > { %1694 = vadd.xlane.f32.xlu0 %v1693_v36  ;;  %v8791_v9 = vpop.eup %8790 }
 0x5a5   : > { %v8793_v62 = vpop.eup %8792 }
 0x5a7   : > { %v8795_v4 = vpop.eup %8794 }
 0x5ae   : > { %2026 = vrot.lane.b32.xlu1 %v9803_v51, %s9164_s9 }
 0x5b2   : > { %2403 = vrot.lane.b32.xlu1 %v9694_v2, %s9165_s10 }
 0x5b6   : > { %2407 = vrot.lane.b32.xlu1 %v9803_v51, %s9165_s10 }
 0x5b7   : > { %v7873_v22 = vpop.f32.mrb[32].mxu0 }
 0x5b8   : > { %v1385_v19 = vpop.f32.mrb[33].mxu0  ;;  %v1424_v29 = vmul.f32 %v8783_v42, %v7873_v22 }
 0x5b9   : > { %v7874_v14 = vpop.f32.mrb[34].mxu0  ;;  %2022 = vrot.lane.b32.xlu0 %v9694_v2, %s9164_s9  ;;  %v1422_v53 = vmul.f32 %v8785_v49, %v1385_v19 }
 0x5ba   : > { %v1425_v25 = vmul.f32 %v8787_v30, %v7874_v14  ;;  %v1388_v52 = vpop.f32.mrb[35].mxu0  ;;  %2395 = vrot.lane.b32.xlu1 %v9694_v2, %s9166_s11 }
 0x5bb   : > { %v1423_v41 = vmul.f32 %v8789_v37, %v1388_v52 }
 0x5bc   : > { %v1430_v1 = vpack.c.bf16 %v1425_v25, %v1424_v29 }
 0x5bd   : > { %v1429_v57 = vpack.c.bf16 %v1423_v41, %v1422_v53  ;;  %2401 = vrot.lane.b32.xlu0 %v9698_v44, %s9165_s10 }
 0x5be   : > { %2399 = vrot.lane.b32.xlu1 %v9803_v51, %s9166_s11 }
 0x5bf   : > { %v7877_v58 = vpop.f32.mrb[36].mxu0  ;;  %7881 = vmatprep.mubr.msk.bf16.mxu0 %vm401_vm1, %v1429_v57 }
 0x5c0   : > { %v1401_v35 = vpop.f32.mrb[37].mxu0  ;;  %7882 = vmatmul.mubr.msk.bf16.vlgmr.msra.gmra.mrb[16].mxu0 %vm401_vm1, %v1430_v1  ;;  %v1428_v5 = vmul.f32 %v8791_v9, %v7877_v58  ;;  %v2041_v1 = vsel %vm401_vm1, %v2021_v60, 0 }
 0x5c1   : > { %7906 = vmatpush3.bf16.msra.mxu0 %v9759_v10  ;;  %v7878_v63 = vpop.f32.mrb[38].mxu0  ;;  %2405 = vrot.lane.b32.xlu0 %v9728_v48, %s9165_s10  ;;  %v1426_v6 = vmul.f32 %v8795_v4, %v1401_v35 }
 0x5c2   : > { %7907 = vmatprep.subr.bf16.mxu0 %v9784_v13  ;;  %v1404_v32 = vpop.f32.mrb[39].mxu0  ;;  %2185 = vrot.lane.b32.xlu1 %v9694_v2, %s9167_s12  ;;  %v1432_v10 = vpack.c.bf16 %v1428_v5, %v1428_v5 }
 0x5c3   : > { %v1427_v31 = vmul.f32 %v8793_v62, %v1404_v32 }
 0x5c5   : > { %v1431_v20 = vpack.c.bf16 %v1427_v31, %v1426_v6  ;;  %7908 = vmatpush3.bf16.msra.mxu0 %v9784_v13  ;;  %2393 = vrot.lane.b32.xlu0 %v9698_v44, %s9166_s11  ;;  %v1814_v13 = vld [vmem:[%s11673_s3 + $0xc] sm:$0xf] }
 0x5c6   : > { %7909 = vmatprep.subr.bf16.mxu0 %v1711_v21  ;;  %v1828_v45 = vsel %vm683_vm5, %v1814_v13, 0 }
 0x5c7   : > { %7885 = vmatprep.mubr.msk.bf16.mxu0 %vm401_vm1, %v1431_v20 }
 0x5c8   : > { %7886 = vmatmul.mubr.msk.bf16.gmra.mrb[20].mxu0 %vm401_vm1, %v1432_v10 }
 0x5c9   : > { %7910 = vmatpush3.bf16.msra.mxu0 %v1711_v21  ;;  %2397 = vrot.lane.b32.xlu0 %v9728_v48, %s9166_s11 }
 0x5ca   : > { %7911 = vmatprep.subr.bf16.mxu0 %v1730_v3  ;;  %7913 = vmatprep.mubr.msk.bf16.mxu0 %vm490_vm2, %v1702_v8 }
 0x5cd   : > { %7912 = vmatpush3.bf16.msra.mxu0 %v1730_v3  ;;  %2183 = vrot.lane.b32.xlu0 %v9698_v44, %s9167_s12 }
 0x5ce   : > { %8614 = vmatprep.subr.msk.bf16.mxu0 %vm683_vm5, %v1814_v13  ;;  %v6832_v13 = vld [vmem:[%s11674_s4] ss:$0 sm:$0xff] }
 0x5d0   : > { %7914 = vmatmul.mubr.msk.bf16.vlgmr.msra.gmra.mrb[40].mxu0 %vm490_vm2, %v1703_v17 }
 0x5d1   : > { %7917 = vmatprep.mubr.msk.bf16.mxu0 %vm490_vm2, %v1704_v26  ;;  %7922 = vmatpush3.bf16.msra.mxu0 %v1828_v45 }
 0x5d2   : > { %8615 = vmatprep.subr.msk.bf16.mxu0 %vm401_vm1, %v2021_v60 }
 0x5d8   : > { %7918 = vmatmul.mubr.msk.bf16.gmra.mrb[44].mxu0 %vm490_vm2, %v1705_v56 }
 0x5ef   : > { %v1683_v8 = vpop.xlane.xlu1 %1682 }
 0x5f0   : > { %8796 = vrcp.f32 %v1683_v8 }
 0x5f3   : > { %v1689_v61 = vpop.xlane.xlu0 %1688 }
 0x5f4   : > { %8798 = vrcp.f32 %v1689_v61 }
 0x5f5   : > { %v1692_v55 = vpop.xlane.xlu1 %1691 }
 0x5f6   : > { %8800 = vrcp.f32 %v1692_v55 }
 0x5f7   : > { %v1686_v18 = vpop.xlane.xlu0 %1685 }
 0x5f8   : > { %8802 = vrcp.f32 %v1686_v18 }
 0x5f9   : > { %v9857_v7 = vpop.permute.xlu1 %2024 }
 0x5fa   : > { %v8797_v50 = vpop.eup %8796  ;;  %v2047_v31 = vsel %vm401_vm1, %v9857_v7, 0 }
 0x5fe   : > { %v8799_v47 = vpop.eup %8798 }
 0x600   : > { %v8801_v43 = vpop.eup %8800 }
 0x602   : > { %v8803_v22 = vpop.eup %8802 }
 0x62a   : > { %v1698_v12 = vpop.xlane.xlu1 %1697 }
 0x62b   : > { %8804 = vrcp.f32 %v1698_v12 }
 0x62c   : > { %v1701_v15 = vpop.xlane.xlu0 %1700 }
 0x62d   : > { %8806 = vrcp.f32 %v1701_v15 }
 0x62e   : > { %v9859_v17 = vpop.permute.xlu1 %2026 }
 0x62f   : > { %v2050_v59 = vsel %vm401_vm1, %v9859_v17, 0 }
 0x630   : > { %v1695_v23 = vpop.xlane.xlu0 %1694 }
 0x631   : > { %8808 = vrcp.f32 %v1695_v23 }
 0x632   : > { %v9861_v28 = vpop.permute.xlu1 %2403 }
 0x633   : > { %v2425_v20 = vsel %vm401_vm1, %v9861_v28, 0 }
 0x634   : > { %v2023_v24 = vpop.permute.xlu0 %2022 }
 0x635   : > { %v8805_v53 = vpop.eup %8804  ;;  %v2044_v6 = vsel %vm401_vm1, %v2023_v24, 0 }
 0x636   : > { %v9863_v34 = vpop.permute.xlu1 %2407 }
 0x637   : > { %v8807_v57 = vpop.eup %8806  ;;  %v2431_v3 = vsel %vm401_vm1, %v9863_v34, 0 }
 0x638   : > { %v9865_v11 = vpop.permute.xlu0 %2401 }
 0x639   : > { %v2422_v21 = vsel %vm401_vm1, %v9865_v11, 0 }
 0x63a   : > { %v9869_v54 = vpop.permute.xlu1 %2395 }
 0x63b   : > { %v8809_v9 = vpop.eup %8808 }
 0x63c   : > { %v9867_v16 = vpop.permute.xlu0 %2405 }
 0x63d   : > { %v2428_v10 = vsel %vm401_vm1, %v9867_v16, 0 }
 0x63e   : > { %v9873_v36 = vpop.permute.xlu1 %2399 }
 0x640   : > { %v9871_v33 = vpop.permute.xlu0 %2393 }
 0x642   : > { %v2186_v46 = vpop.permute.xlu1 %2185 }
 0x644   : > { %v9875_v0 = vpop.permute.xlu0 %2397 }
 0x648   : > { %v2184_v38 = vpop.permute.xlu0 %2183 }
 0x649   : > { %7959 = vmatprep.subr.bf16.mxu1 %v2184_v38 }
 0x64a   : > { %7960 = vmatpush3.bf16.msra.mxu1 %v2184_v38 }
 0x64b   : > { %7961 = vmatprep.subr.bf16.mxu1 %v2186_v46 }
 0x64e   : > { %7962 = vmatpush3.bf16.msra.mxu1 %v2186_v46 }
 0x6a3   : > { %v7915_v39 = vpop.f32.mrb[40].mxu0 }
 0x6a4   : > { %v1766_v40 = vpop.f32.mrb[41].mxu0  ;;  %v1805_v49 = vmul.f32 %v8799_v47, %v7915_v39  ;;  %v6925_v39 = vld [vmem:[%s11675_s5 + $0x34] sm:$0x1] }
 0x6a5   : > { %v7916_v42 = vpop.f32.mrb[42].mxu0  ;;  %v1803_v14 = vmul.f32 %v8797_v50, %v1766_v40 }
 0x6a6   : > { %v1806_v19 = vmul.f32 %v8801_v43, %v7916_v42  ;;  %v1769_v30 = vpop.f32.mrb[43].mxu0 }
 0x6a7   : > { %v1804_v37 = vmul.f32 %v8803_v22, %v1769_v30 }
 0x6a8   : > { %v1811_v29 = vpack.c.bf16 %v1806_v19, %v1805_v49  ;;  %v2015_v49 = vunpack.c.l.bf16 %v6925_v39 }
 0x6a9   : > { %v1810_v25 = vpack.c.bf16 %v1804_v37, %v1803_v14 }
 0x6ab   : > { %v7919_v52 = vpop.f32.mrb[44].mxu0  ;;  %7923 = vmatprep.mubr.msk.bf16.mxu0 %vm401_vm1, %v1810_v25 }
 0x6ac   : > { %v1782_v41 = vpop.f32.mrb[45].mxu0  ;;  %7924 = vmatmul.mubr.msk.bf16.vlgmr.msra.gmra.mrb[16].mxu0 %vm401_vm1, %v1811_v29  ;;  %v1809_v35 = vmul.f32 %v8807_v57, %v7919_v52 }
 0x6ad   : > { %7944 = vmatpush3.bf16.xpose.msra.mxu0 %v2041_v1  ;;  %v7920_v58 = vpop.f32.mrb[46].mxu0  ;;  %v1807_v63 = vmul.f32 %v8809_v9, %v1782_v41 }
 0x6ae   : > { %8616 = vmatprep.subr.msk.bf16.mxu0 %vm401_vm1, %v2023_v24  ;;  %v1785_v62 = vpop.f32.mrb[47].mxu0  ;;  %v1813_v32 = vpack.c.bf16 %v1809_v35, %v1809_v35 }
 0x6af   : > { %v1808_v4 = vmul.f32 %v8805_v53, %v1785_v62 }
 0x6b1   : > { %v1812_v5 = vpack.c.bf16 %v1808_v4, %v1807_v63 }
 0x6b3   : > { %7927 = vmatprep.mubr.msk.bf16.mxu0 %vm401_vm1, %v1812_v5 }
 0x6b4   : > { %7928 = vmatmul.mubr.msk.bf16.gmra.mrb[20].mxu0 %vm401_vm1, %v1813_v32 }
 0x6b5   : > { %7946 = vmatpush3.bf16.xpose.msra.mxu0 %v2044_v6  ;;  %7951 = vmatprep.mubr.msk.bf16.mxu0 %vm401_vm1, %v9698_v44 }
 0x6b6   : > { %8617 = vmatprep.subr.msk.bf16.mxu0 %vm401_vm1, %v9857_v7 }
 0x6bd   : > { %7948 = vmatpush3.bf16.xpose.msra.mxu0 %v2047_v31 }
 0x6be   : > { %8618 = vmatprep.subr.msk.bf16.mxu0 %vm401_vm1, %v9859_v17 }
 0x6c5   : > { %7950 = vmatpush3.bf16.xpose.msra.mxu0 %v2050_v59 }
 0x6c6   : > { %8620 = vmatprep.subr.msk.bf16.mxu0 %vm401_vm1, %v9865_v11  ;;  %v6919_v11 = vld [vmem:[%s11675_s5 + $0x1c] ss:$20 sps:$4 sm:$0xff]  }
 0x6c7   : > { %v2014_v25 = vunpack.c.h.bf16 %v6919_v11 }
 0x6cc   : > { %7952 = vmatmul.mubr.msk.bf16.vlgmr.msra.gmra.mrb[48].mxu0 %vm401_vm1, %v9694_v2 }
 0x6cd   : > { %7955 = vmatprep.mubr.msk.bf16.mxu0 %vm401_vm1, %v9728_v48  ;;  %7986 = vmatpush3.bf16.xpose.msra.mxu0 %v2422_v21 }
 0x6ce   : > { %8621 = vmatprep.subr.msk.bf16.mxu0 %vm401_vm1, %v9861_v28 }
 0x6d4   : > { %7956 = vmatmul.mubr.msk.bf16.gmra.mrb[52].mxu0 %vm401_vm1, %v9803_v51 }
 0x6d5   : > { %7988 = vmatpush3.bf16.xpose.msra.mxu0 %v2425_v20  ;;  %7993 = vmatprep.mubr.msk.bf16.mxu0 %vm401_vm1, %v9871_v33 }
 0x6d6   : > { %8622 = vmatprep.subr.msk.bf16.mxu0 %vm401_vm1, %v9867_v16 }
 0x6dd   : > { %7990 = vmatpush3.bf16.xpose.msra.mxu0 %v2428_v10  ;;  %v7365_v10 = vld [vmem:[%s11675_s5 + $0x90] sm:$0xff]  }
 0x6de   : > { %8623 = vmatprep.subr.msk.bf16.mxu0 %vm401_vm1, %v9863_v34  ;;  %v7363_v34 = vld [vmem:[%s11675_s5 + $0x20] sm:$0xff]  }
 0x6df   : > { %v7243_v16 = vunpack.c.h.bf16 %v7363_v34 }
 0x6e5   : > { %7992 = vmatpush3.bf16.xpose.msra.mxu0 %v2431_v3  ;;  %v7366_v3 = vld [vmem:[%s11675_s5 + $0x98] sm:$0xff]  }
 0x6ec   : > { %7994 = vmatmul.mubr.msk.bf16.vlgmr.msra.gmra.mrb[56].mxu0 %vm401_vm1, %v9869_v54  ;;  %v2009_v54 = vunpack.c.l.bf16 %v6919_v11 }
 0x6ed   : > { %7997 = vmatprep.mubr.msk.bf16.mxu0 %vm401_vm1, %v9875_v0  ;;  %v7242_v0 = vunpack.c.l.bf16 %v7363_v34 }
 0x6f4   : > { %7998 = vmatmul.mubr.msk.bf16.gmra.mrb[60].mxu0 %vm401_vm1, %v9873_v36  ;;  %v7364_v36 = vld [vmem:[%s11675_s5 + $0x28] sm:$0xff]  }
 0x6f5   : > { %v7246_v40 = vunpack.c.l.bf16 %v7364_v36  ;;  %v7247_v37 = vunpack.c.h.bf16 %v7364_v36 }
 0x77f   : > { %v7925_v45 = vpop.f32.mrb[16].mxu0 }
 0x780   : > { %v8471_v26 = vadd.f32 %v7925_v45, %v6832_v13  ;;  %v1864_v60 = vpop.f32.mrb[17].mxu0  ;;  %v7254_v45 = vunpack.c.l.bf16 %v7366_v3 }
 0x781   : > { %v8472_v56 = vadd.f32 %v6832_v13, %v1864_v60  ;;  %v7926_v8 = vpop.f32.mrb[18].mxu0 }
 0x782   : > { %1903 = vst.msk [vmem:[%s9932_s20 + $0x10] sm:$0xff] %vm294_vm0, %v8471_v26  ;;  %v8473_v55 = vadd.f32 %v7926_v8, %v6832_v13  ;;  %v1867_v61 = vpop.f32.mrb[19].mxu0  ;;  %v6938_v26 = vld [vmem:[%s11675_s5 + $0x8c] ss:$20 sps:$4 sm:$0xff]  }
 0x783   : > { %1901 = vst.msk [vmem:[%s9932_s20] sm:$0xff] %vm294_vm0, %v8472_v56  ;;  %v8474_v7 = vadd.f32 %v6832_v13, %v1867_v61  ;;  %v2386_v56 = vunpack.c.l.bf16 %v6938_v26  ;;  %v6944_v61 = vld [vmem:[%s11675_s5 + $0xa4] sm:$0x1] }
 0x784   : > { %1904 = vst.msk [vmem:[%s9932_s20 + $0x18] sm:$0xff] %vm294_vm0, %v8473_v55  ;;  %v7250_v55 = vunpack.c.l.bf16 %v7365_v10 }
 0x785   : > { %1902 = vst.msk [vmem:[%s9932_s20 + $0x8] sm:$0xff] %vm294_vm0, %v8474_v7  ;;  %v2392_v7 = vunpack.c.l.bf16 %v6944_v61 }
 0x787   : > { %v7929_v18 = vpop.f32.mrb[20].mxu0 }
 0x788   : > { %v8475_v12 = vadd.f32 %v7929_v18, %v6832_v13  ;;  %v1880_v15 = vpop.f32.mrb[21].mxu0  ;;  %v2391_v18 = vunpack.c.h.bf16 %v6938_v26 }
 0x789   : > { %v8476_v17 = vadd.f32 %v6832_v13, %v1880_v15  ;;  %v7930_v23 = vpop.f32.mrb[22].mxu0 }
 0x78a   : > { %1908 = vst.msk [vmem:[%s9932_s20 + $0x30] sm:$0x1] %vm1907_vm6, %v8475_v12  ;;  %v1883_v28 = vpop.f32.mrb[23].mxu0 }
 0x78b   : > { %1905 = vst.msk [vmem:[%s9932_s20 + $0x20] sm:$0xff] %vm294_vm0, %v8476_v17  ;;  %v8477_v24 = vadd.f32 %v6832_v13, %v1883_v28  ;;  %v7251_v13 = vunpack.c.h.bf16 %v7365_v10  ;;  %v7255_v28 = vunpack.c.h.bf16 %v7366_v3 }
 0x78d   : > { %1906 = vst.msk [vmem:[%s9932_s20 + $0x28] sm:$0xff] %vm294_vm0, %v8477_v24 }
 0x79f   : > { %v7953_v33 = vpop.f32.mrb[48].mxu0 }
 0x7a0   : > { %v9957_v38 = vadd.f32 %v7953_v33, %v7243_v16  ;;  %v2086_v46 = vpop.f32.mrb[49].mxu0 }
 0x7a1   : > { %v7954_v50 = vpop.f32.mrb[50].mxu0  ;;  %v9962_v47 = vadd.f32 %v2086_v46, %v2009_v54 }
 0x7a2   : > { %v2089_v43 = vpop.f32.mrb[51].mxu0  ;;  %v2122_v42 = vsel %vm490_vm2, %v9957_v38, -inf  ;;  %v9970_v30 = vadd.f32 %v7954_v50, %v7246_v40 }
 0x7a3   : > { %v9966_v22 = vadd.f32 %v7242_v0, %v2089_v43  ;;  %2123 = vmax.xlane.f32.xlu0 %v2122_v42  ;;  %v2116_v14 = vsel %vm490_vm2, %v9962_v47, -inf }
 0x7a4   : > { %v2125_v9 = vsel %vm490_vm2, %v9970_v30, -inf }
 0x7a5   : > { %v2119_v19 = vsel %vm490_vm2, %v9966_v22, -inf }
 0x7a6   : > { %2120 = vmax.xlane.f32.xlu1 %v2119_v19 }
 0x7a7   : > { %v7957_v29 = vpop.f32.mrb[52].mxu0  ;;  %2117 = vmax.xlane.f32.xlu0 %v2116_v14 }
 0x7a8   : > { %v9974_v52 = vadd.f32 %v7957_v29, %v2015_v49  ;;  %v2102_v53 = vpop.f32.mrb[53].mxu0 }
 0x7a9   : > { %v7958_v41 = vpop.f32.mrb[54].mxu0  ;;  %v9976_v1 = vadd.f32 %v7247_v37, %v2102_v53 }
 0x7aa   : > { %v2105_v57 = vpop.f32.mrb[55].mxu0  ;;  %v2134_v58 = vsel %vm509_vm3, %v9974_v52, -inf }
 0x7ab   : > { %v9982_v35 = vadd.f32 %v2105_v57, %v2014_v25  ;;  %2135 = vmax.xlane.f32.xlu1 %v2134_v58  ;;  %2126 = vmax.xlane.f32.xlu0 %v2125_v9  ;;  %v2128_v63 = vsel %vm490_vm2, %v9976_v1, -inf }
 0x7ad   : > { %v2131_v62 = vsel %vm490_vm2, %v9982_v35, -inf }
 0x7af   : > { %2129 = vmax.xlane.f32.xlu1 %v2128_v63  ;;  %2132 = vmax.xlane.f32.xlu0 %v2131_v62 }
 0x7bf   : > { %v7995_v4 = vpop.f32.mrb[56].mxu0 }
 0x7c0   : > { %2187 = vrot.lane.b32.xlu1 %v9728_v48, %s9167_s12  ;;  %v2467_v5 = vpop.f32.mrb[57].mxu0  ;;  %v10017_v60 = vadd.f32 %v7995_v4, %v7251_v13 }
 0x7c1   : > { %v7996_v32 = vpop.f32.mrb[58].mxu0  ;;  %v10024_v12 = vadd.f32 %v2467_v5, %v2386_v56 }
 0x7c2   : > { %v2470_v6 = vpop.f32.mrb[59].mxu0  ;;  %v10019_v8 = vadd.f32 %v7996_v32, %v7254_v45  ;;  %v2503_v17 = vsel %vm490_vm2, %v10017_v60, -inf }
 0x7c3   : > { %v10026_v15 = vadd.f32 %v7250_v55, %v2470_v6  ;;  %v2497_v16 = vsel %vm490_vm2, %v10024_v12, -inf }
 0x7c4   : > { %2782 = vrot.lane.b32.xlu1 %v9698_v44, %s9168_s23  ;;  %v2506_v23 = vsel %vm490_vm2, %v10019_v8, -inf }
 0x7c5   : > { %2189 = vrot.lane.b32.xlu0 %v9803_v51, %s9167_s12  ;;  %v2500_v11 = vsel %vm490_vm2, %v10026_v15, -inf }
 0x7c7   : > { %v7999_v31 = vpop.f32.mrb[60].mxu0 }
 0x7c8   : > { %2786 = vrot.lane.b32.xlu1 %v9728_v48, %s9168_s23  ;;  %v2483_v59 = vpop.f32.mrb[61].mxu0  ;;  %v10032_v24 = vadd.f32 %v7999_v31, %v2392_v7 }
 0x7c9   : > { %2784 = vrot.lane.b32.xlu0 %v9694_v2, %s9168_s23  ;;  %v8000_v21 = vpop.f32.mrb[62].mxu0  ;;  %v10040_v54 = vadd.f32 %v7255_v28, %v2483_v59 }
 0x7ca   : > { %v2486_v20 = vpop.f32.mrb[63].mxu0  ;;  %v2515_v33 = vsel %vm509_vm3, %v10032_v24, -inf }
 0x7cb   : > { %v10034_v34 = vadd.f32 %v2486_v20, %v2391_v18  ;;  %v2509_v0 = vsel %vm490_vm2, %v10040_v54, -inf }
 0x7cc   : > { %2774 = vrot.lane.b32.xlu1 %v9698_v44, %s9169_s24 }
 0x7cd   : > { %2788 = vrot.lane.b32.xlu0 %v9803_v51, %s9168_s23  ;;  %v2512_v36 = vsel %vm490_vm2, %v10034_v34, -inf }
 0x7d0   : > { %2778 = vrot.lane.b32.xlu1 %v9728_v48, %s9169_s24 }
 0x7d1   : > { %2776 = vrot.lane.b32.xlu0 %v9694_v2, %s9169_s24 }
 0x7d5   : > { %2780 = vrot.lane.b32.xlu0 %v9803_v51, %s9169_s24 }
 0x7f4   : > { %2504 = vmax.xlane.f32.xlu1 %v2503_v17  ;;  %2507 = vmax.xlane.f32.xlu0 %v2506_v23 }
 0x7f8   : > { %2501 = vmax.xlane.f32.xlu0 %v2500_v11  ;;  %2498 = vmax.xlane.f32.xlu1 %v2497_v16 }
 0x7fc   : > { %2516 = vmax.xlane.f32.xlu1 %v2515_v33  ;;  %2513 = vmax.xlane.f32.xlu0 %v2512_v36  ;;  %v2291_v33 = vld [vmem:[%s11673_s3] sm:$0xf] }
 0x7fd   : > { %v2305_v36 = vsel %vm683_vm5, %v2291_v33, 0 }
 0x800   : > { %2510 = vmax.xlane.f32.xlu1 %v2509_v0 }
 0x830   : > { %v2124_v46 = vpop.xlane.xlu0 %2123 }
 0x831   : > { %v2139_v50 = vsub.f32 %v9957_v38, %v2124_v46 }
 0x833   : > { %v2148_v39 = vmul.f32 1.442695, %v2139_v50  ;;  %v2121_v40 = vpop.xlane.xlu1 %2120 }
 0x834   : > { %v2138_v43 = vsub.f32 %v9966_v22, %v2121_v40  ;;  %v2118_v42 = vpop.xlane.xlu0 %2117 }
 0x835   : > { %8810 = vpow2.f32 %v2148_v39  ;;  %v2137_v49 = vsub.f32 %v9962_v47, %v2118_v42 }
 0x836   : > { %v2146_v19 = vmul.f32 1.442695, %v2138_v43 }
 0x837   : > { %v2144_v14 = vmul.f32 1.442695, %v2137_v49 }
 0x838   : > { %8812 = vpow2.f32 %v2146_v19  ;;  %v2136_v37 = vpop.xlane.xlu1 %2135  ;;  %v2127_v29 = vpop.xlane.xlu0 %2126 }
 0x839   : > { %8814 = vpow2.f32 %v2144_v14  ;;  %v2143_v25 = vsub.f32 %v9974_v52, %v2136_v37  ;;  %v2140_v53 = vsub.f32 %v9970_v30, %v2127_v29 }
 0x83b   : > { %v2156_v41 = vmul.f32 1.442695, %v2143_v25  ;;  %v2150_v38 = vmul.f32 1.442695, %v2140_v53 }
 0x83c   : > { %v2130_v57 = vpop.xlane.xlu1 %2129  ;;  %v2133_v58 = vpop.xlane.xlu0 %2132 }
 0x83d   : > { %8816 = vpow2.f32 %v2156_v41  ;;  %v2141_v22 = vsub.f32 %v9976_v1, %v2130_v57  ;;  %v2142_v9 = vsub.f32 %v9982_v35, %v2133_v58 }
 0x83e   : > { %8818 = vpow2.f32 %v2150_v38 }
 0x83f   : > { %v8811_v47 = vpop.eup %8810  ;;  %v2152_v62 = vmul.f32 1.442695, %v2141_v22  ;;  %v2154_v63 = vmul.f32 1.442695, %v2142_v9 }
 0x840   : > { %v2188_v4 = vpop.permute.xlu1 %2187  ;;  %v2190_v5 = vpop.permute.xlu0 %2189  ;;  %v2164_v32 = vsel %vm490_vm2, %v8811_v47, 0.0 }
 0x841   : > { %8820 = vpow2.f32 %v2152_v62  ;;  %v2207_v30 = vand.u32 %v2190_v5, %v9428_v27  ;;  %7963 = vmatprep.subr.bf16.mxu1 %v2188_v4  ;;  %2165 = vadd.xlane.f32.xlu0 %v2164_v32 }
 0x842   : > { %v8813_v52 = vpop.eup %8812  ;;  %8822 = vpow2.f32 %v2154_v63  ;;  %7964 = vmatpush3.bf16.msra.mxu1 %v2188_v4 }
 0x843   : > { %v8815_v6 = vpop.eup %8814  ;;  %7965 = vmatprep.subr.bf16.mxu1 %v2207_v30  ;;  %v2161_v1 = vsel %vm490_vm2, %v8813_v52, 0.0 }
 0x844   : > { %v2783_v35 = vpop.permute.xlu1 %2782  ;;  %v2158_v31 = vsel %vm490_vm2, %v8815_v6, 0.0  ;;  %v2179_v59 = vpack.c.bf16 %v8813_v52, %v8815_v6  ;;  %v2785_v10 = vpop.permute.xlu0 %2784 }
 0x845   : > { %8625 = vmatprep.subr.msk.bf16.mxu0 %vm401_vm1, %v2783_v35  ;;  %2162 = vadd.xlane.f32.xlu0 %v2161_v1  ;;  %v2803_v21 = vsel %vm401_vm1, %v2783_v35, 0  ;;  %v2806_v23 = vsel %vm401_vm1, %v2785_v10, 0 }
 0x846   : > { %2159 = vadd.xlane.f32.xlu1 %v2158_v31  ;;  %7966 = vmatpush3.bf16.msra.mxu1 %v2207_v30 }
 0x847   : > { %v8817_v20 = vpop.eup %8816  ;;  %7967 = vmatprep.mubr.msk.bf16.mxu1 %vm490_vm2, %v2179_v59  ;;  %8028 = vmatpush3.bf16.xpose.msra.mxu0 %v2803_v21 }
 0x848   : > { %v8819_v3 = vpop.eup %8818  ;;  %8626 = vmatprep.subr.msk.bf16.mxu0 %vm401_vm1, %v2785_v10  ;;  %v2787_v13 = vpop.permute.xlu1 %2786  ;;  %v2176_v45 = vsel %vm509_vm3, %v8817_v20, 0.0  ;;  %v2182_v28 = vpack.c.bf16 %v8817_v20, %v8817_v20  ;;  %8619 = vmatprep.subr.msk.bf16.mxu1 %vm683_vm5, %v2291_v33 }
 0x849   : > { %v2180_v26 = vpack.c.bf16 %v8819_v3, %v8811_v47  ;;  %2177 = vadd.xlane.f32.xlu0 %v2176_v45  ;;  %v2167_v56 = vsel %vm490_vm2, %v8819_v3, 0.0  ;;  %v2809_v11 = vsel %vm401_vm1, %v2787_v13, 0  ;;  %v2789_v16 = vpop.permute.xlu0 %2788 }
 0x84a   : > { %2168 = vadd.xlane.f32.xlu1 %v2167_v56  ;;  %v2812_v0 = vsel %vm401_vm1, %v2789_v16, 0 }
 0x84b   : > { %v8821_v55 = vpop.eup %8820  ;;  %7968 = vmatmul.mubr.msk.bf16.vlgmr.msra.gmra.mrb[40].mxu1 %vm490_vm2, %v2180_v26 }
 0x84c   : > { %v8823_v61 = vpop.eup %8822  ;;  %v2775_v7 = vpop.permute.xlu1 %2774  ;;  %v2170_v18 = vsel %vm490_vm2, %v8821_v55, 0.0  ;;  %7976 = vmatpush3.bf16.msra.mxu1 %v2305_v36 }
 0x84d   : > { %8035 = vmatprep.mubr.msk.bf16.mxu0 %vm401_vm1, %v2775_v7  ;;  %2171 = vadd.xlane.f32.xlu0 %v2170_v18  ;;  %v2181_v17 = vpack.c.bf16 %v8823_v61, %v8821_v55  ;;  %v2777_v46 = vpop.permute.xlu0 %2776  ;;  %v2173_v40 = vsel %vm490_vm2, %v8823_v61, 0.0 }
 0x84f   : > { %7971 = vmatprep.mubr.msk.bf16.mxu1 %vm490_vm2, %v2181_v17  ;;  %8030 = vmatpush3.bf16.xpose.msra.mxu0 %v2806_v23 }
 0x850   : > { %8627 = vmatprep.subr.msk.bf16.mxu0 %vm401_vm1, %v2787_v13  ;;  %v2779_v50 = vpop.permute.xlu1 %2778 }
 0x851   : > { %v2781_v39 = vpop.permute.xlu0 %2780 }
 0x853   : > { %7972 = vmatmul.mubr.msk.bf16.gmra.mrb[44].mxu1 %vm490_vm2, %v2182_v28 }
 0x857   : > { %8032 = vmatpush3.bf16.xpose.msra.mxu0 %v2809_v11 }
 0x858   : > { %8628 = vmatprep.subr.msk.bf16.mxu0 %vm401_vm1, %v2789_v16 }
 0x85b   : > { %2566 = vrot.lane.b32.xlu1 %v9694_v2, %s9171_s15 }
 0x85f   : > { %8034 = vmatpush3.bf16.xpose.msra.mxu0 %v2812_v0 }
 0x863   : > { %2564 = vrot.lane.b32.xlu0 %v9698_v44, %s9171_s15 }
 0x866   : > { %8036 = vmatmul.mubr.msk.bf16.vlgmr.msra.gmra.mrb[64].mxu0 %vm401_vm1, %v2777_v46 }
 0x867   : > { %8039 = vmatprep.mubr.msk.bf16.mxu0 %vm401_vm1, %v2779_v50  ;;  %2570 = vrot.lane.b32.xlu0 %v9803_v51, %s9171_s15 }
 0x86b   : > { %3165 = vrot.lane.b32.xlu0 %v9694_v2, %s9172_s18 }
 0x86e   : > { %8040 = vmatmul.mubr.msk.bf16.gmra.mrb[68].mxu0 %vm401_vm1, %v2781_v39 }
 0x86f   : > { %3169 = vrot.lane.b32.xlu0 %v9803_v51, %s9172_s18 }
 0x873   : > { %3157 = vrot.lane.b32.xlu0 %v9694_v2, %s9173_s19 }
 0x877   : > { %3161 = vrot.lane.b32.xlu0 %v9803_v51, %s9173_s19 }
 0x87f   : > { %2174 = vadd.xlane.f32.xlu1 %v2173_v40 }
 0x881   : > { %v2508_v43 = vpop.xlane.xlu0 %2507  ;;  %v2505_v53 = vpop.xlane.xlu1 %2504 }
 0x882   : > { %v2520_v3 = vsub.f32 %v10017_v60, %v2505_v53  ;;  %v2521_v13 = vsub.f32 %v10019_v8, %v2508_v43 }
 0x884   : > { %v2529_v23 = vmul.f32 1.442695, %v2520_v3  ;;  %v2531_v11 = vmul.f32 1.442695, %v2521_v13 }
 0x885   : > { %v2502_v42 = vpop.xlane.xlu0 %2501  ;;  %v2499_v41 = vpop.xlane.xlu1 %2498 }
 0x886   : > { %v2518_v30 = vsub.f32 %v10024_v12, %v2499_v41  ;;  %v2519_v6 = vsub.f32 %v10026_v15, %v2502_v42 }
 0x888   : > { %v2525_v1 = vmul.f32 1.442695, %v2518_v30  ;;  %v2527_v31 = vmul.f32 1.442695, %v2519_v6 }
 0x889   : > { %v10108_v49 = vpop.xlane.xlu0 %2513  ;;  %v10113_v38 = vpop.xlane.xlu1 %2516 }
 0x88a   : > { %v2523_v60 = vsub.f32 %v10034_v34, %v10108_v49  ;;  %v2524_v39 = vsub.f32 %v10032_v24, %v10113_v38 }
 0x88c   : > { %v2535_v46 = vmul.f32 1.442695, %v2523_v60  ;;  %v2537_v53 = vmul.f32 1.442695, %v2524_v39  ;;  %v7004_v60 = vld [vmem:[%s9240_s30 + $0x80] sm:$0xff] }
 0x88d   : > { %v2511_v57 = vpop.xlane.xlu1 %2510 }
 0x88e   : > { %v2522_v56 = vsub.f32 %v10040_v54, %v2511_v57 }
 0x890   : > { %2568 = vrot.lane.b32.xlu1 %v9728_v48, %s9171_s15  ;;  %v2533_v33 = vmul.f32 1.442695, %v2522_v56 }
 0x894   : > { %3163 = vrot.lane.b32.xlu1 %v9698_v44, %s9172_s18 }
 0x898   : > { %3167 = vrot.lane.b32.xlu1 %v9728_v48, %s9172_s18 }
 0x89c   : > { %3155 = vrot.lane.b32.xlu1 %v9698_v44, %s9173_s19 }
 0x8a0   : > { %3159 = vrot.lane.b32.xlu1 %v9728_v48, %s9173_s19 }
 0x8ce   : > { %v2166_v19 = vpop.xlane.xlu0 %2165 }
 0x8cf   : > { %8824 = vrcp.f32 %v2166_v19 }
 0x8d2   : > { %v2163_v14 = vpop.xlane.xlu0 %2162 }
 0x8d3   : > { %v2160_v58 = vpop.xlane.xlu1 %2159  ;;  %8826 = vrcp.f32 %v2163_v14 }
 0x8d6   : > { %v2178_v37 = vpop.xlane.xlu0 %2177 }
 0x8d7   : > { %v2169_v22 = vpop.xlane.xlu1 %2168 }
 0x8d8   : > { %8828 = vrcp.f32 %v2169_v22 }
 0x8d9   : > { %8830 = vrcp.f32 %v2160_v58  ;;  %v8825_v21 = vpop.eup %8824  ;;  %v9147_v58 = vld [vmem:[%s11671_s1] sm:$0xff]  }
 0x8da   : > { %v2172_v29 = vpop.xlane.xlu0 %2171  ;;  %8832 = vrcp.f32 %v2178_v37 }
 0x8db   : > { %v10115_v9 = vpop.permute.xlu1 %2566  ;;  %8834 = vrcp.f32 %v2172_v29 }
 0x8dd   : > { %v8827_v10 = vpop.eup %8826 }
 0x8de   : > { %v10110_v25 = vpop.permute.xlu0 %2564 }
 0x8df   : > { %8001 = vmatprep.subr.bf16.mxu1 %v10110_v25 }
 0x8e2   : > { %v10117_v62 = vpop.permute.xlu0 %2570  ;;  %v8829_v15 = vpop.eup %8828 }
 0x8e3   : > { %v8831_v26 = vpop.eup %8830  ;;  %v2588_v57 = vand.u32 %v10117_v62, %v9428_v27 }
 0x8e4   : > { %v8833_v54 = vpop.eup %8832 }
 0x8e5   : > { %v8835_v34 = vpop.eup %8834 }
 0x8e6   : > { %v3166_v32 = vpop.permute.xlu0 %3165 }
 0x8e7   : > { %v3187_v59 = vsel %vm401_vm1, %v3166_v32, 0 }
 0x8ea   : > { %v3170_v36 = vpop.permute.xlu0 %3169 }
 0x8ee   : > { %v3158_v62 = vpop.permute.xlu0 %3157 }
 0x8f2   : > { %v3162_v56 = vpop.permute.xlu0 %3161 }
 0x90c   : > { %v2175_v47 = vpop.xlane.xlu1 %2174 }
 0x90d   : > { %8836 = vrcp.f32 %v2175_v47 }
 0x90e   : > { %8838 = vpow2.f32 %v2525_v1  ;;  %v9148_v1 = vld [vmem:[%s11671_s1 + $0x8] sm:$0xff]  }
 0x90f   : > { %8840 = vpow2.f32 %v2527_v31  ;;  %v7003_v31 = vld [vmem:[%s9240_s30 + $0x78] sm:$0xff] }
 0x910   : > { %v10119_v63 = vpop.permute.xlu1 %2568  ;;  %8842 = vpow2.f32 %v2529_v23  ;;  %v6963_v23 = vld [vmem:[%s11675_s5 + $0x114] sm:$0x1] }
 0x911   : > { %8844 = vpow2.f32 %v2531_v11 }
 0x912   : > { %8846 = vpow2.f32 %v2533_v33 }
 0x913   : > { %8848 = vpow2.f32 %v2535_v46 }
 0x914   : > { %v3164_v4 = vpop.permute.xlu1 %3163  ;;  %8850 = vpow2.f32 %v2537_v53 }
 0x915   : > { %8630 = vmatprep.subr.msk.bf16.mxu0 %vm401_vm1, %v3164_v4  ;;  %v3184_v5 = vsel %vm401_vm1, %v3164_v4, 0  ;;  %v6957_v4 = vld [vmem:[%s11675_s5 + $0xfc] ss:$20 sps:$4 sm:$0xff]  }
 0x916   : > { %8070 = vmatpush3.bf16.xpose.msra.mxu0 %v3184_v5  ;;  %v2767_v6 = vunpack.c.l.bf16 %v6957_v4 }
 0x917   : > { %8631 = vmatprep.subr.msk.bf16.mxu0 %vm401_vm1, %v3166_v32  ;;  %v8837_v43 = vpop.eup %8836 }
 0x918   : > { %v3168_v52 = vpop.permute.xlu1 %3167  ;;  %v10142_v19 = vpop.eup %8838 }
 0x919   : > { %v3190_v8 = vsel %vm401_vm1, %v3168_v52, 0  ;;  %v10144_v29 = vpop.eup %8840 }
 0x91a   : > { %v2560_v38 = vpack.c.bf16 %v10144_v29, %v10142_v19  ;;  %v10160_v22 = vpop.eup %8842 }
 0x91c   : > { %v3156_v35 = vpop.permute.xlu1 %3155 }
 0x91d   : > { %8077 = vmatprep.mubr.msk.bf16.mxu0 %vm401_vm1, %v3156_v35  ;;  %v7002_v35 = vld [vmem:[%s9240_s30 + $0x70] sm:$0xff] }
 0x91e   : > { %v7969_v20 = vpop.f32.mrb[40].mxu1  ;;  %8072 = vmatpush3.bf16.xpose.msra.mxu0 %v3187_v59  ;;  %v7368_v59 = vld [vmem:[%s11675_s5 + $0x108] sm:$0xff]  }
 0x91f   : > { %v2243_v12 = vpop.f32.mrb[41].mxu1  ;;  %8632 = vmatprep.subr.msk.bf16.mxu0 %vm401_vm1, %v3168_v52  ;;  %v2282_v55 = vmul.f32 %v8825_v21, %v7969_v20  ;;  %v7367_v52 = vld [vmem:[%s11675_s5 + $0x100] sm:$0xff]   ;;  %v7263_v33 = vunpack.c.h.bf16 %v7368_v59 }
 0x920   : > { %v7970_v45 = vpop.f32.mrb[42].mxu1  ;;  %v2280_v18 = vmul.f32 %v8831_v26, %v2243_v12  ;;  %v3160_v32 = vpop.permute.xlu1 %3159  ;;  %v7259_v21 = vunpack.c.h.bf16 %v7367_v52 }
 0x921   : > { %v2283_v61 = vmul.f32 %v8829_v15, %v7970_v45  ;;  %v2246_v7 = vpop.f32.mrb[43].mxu1  ;;  %v3537_v15 = vpack.c.bf16 %v7003_v31, %v7002_v35  ;;  %v7262_v45 = vunpack.c.l.bf16 %v7368_v59 }
 0x922   : > { %v2281_v17 = vmul.f32 %v8827_v10, %v2246_v7  ;;  %v7258_v10 = vunpack.c.l.bf16 %v7367_v52 }
 0x923   : > { %v2288_v28 = vpack.c.bf16 %v2283_v61, %v2282_v55 }
 0x924   : > { %v2287_v16 = vpack.c.bf16 %v2281_v17, %v2280_v18 }
 0x926   : > { %v7973_v0 = vpop.f32.mrb[44].mxu1  ;;  %7977 = vmatprep.mubr.msk.bf16.mxu1 %vm401_vm1, %v2287_v16  ;;  %8074 = vmatpush3.bf16.xpose.msra.mxu0 %v3190_v8  ;;  %v2773_v8 = vunpack.c.l.bf16 %v6963_v23 }
 0x927   : > { %v2259_v50 = vpop.f32.mrb[45].mxu1  ;;  %7978 = vmatmul.mubr.msk.bf16.vlgmr.msra.gmra.mrb[48].mxu1 %vm401_vm1, %v2288_v28  ;;  %8633 = vmatprep.subr.msk.bf16.mxu0 %vm401_vm1, %v3170_v36  ;;  %v2286_v42 = vmul.f32 %v8833_v54, %v7973_v0  ;;  %v7005_v28 = vld [vmem:[%s9240_s30 + $0x88] sm:$0xff]  ;;  %v2772_v54 = vunpack.c.h.bf16 %v6957_v4  ;;  %v7008_v4 = vld [vmem:[%s9240_s30 + $0xa0] sm:$0x1] }
 0x928   : > { %8002 = vmatpush3.bf16.msra.mxu1 %v10110_v25  ;;  %v7974_v40 = vpop.f32.mrb[46].mxu1  ;;  %v2284_v14 = vmul.f32 %v8835_v34, %v2259_v50  ;;  %v3193_v25 = vsel %vm401_vm1, %v3170_v36, 0  ;;  %v3538_v46 = vpack.c.bf16 %v7005_v28, %v7004_v60 }
 0x929   : > { %8003 = vmatprep.subr.bf16.mxu1 %v10115_v9  ;;  %v2262_v49 = vpop.f32.mrb[47].mxu1  ;;  %v2290_v24 = vpack.c.bf16 %v2286_v42, %v2286_v42 }
 0x92a   : > { %v2285_v37 = vmul.f32 %v8837_v43, %v2262_v49 }
 0x92c   : > { %v2289_v41 = vpack.c.bf16 %v2285_v37, %v2284_v14  ;;  %8004 = vmatpush3.bf16.msra.mxu1 %v10115_v9  ;;  %v10162_v9 = vpop.eup %8844 }
 0x92d   : > { %8005 = vmatprep.subr.bf16.mxu1 %v10119_v63  ;;  %v10164_v47 = vpop.eup %8846 }
 0x92e   : > { %7981 = vmatprep.mubr.msk.bf16.mxu1 %vm401_vm1, %v2289_v41  ;;  %8076 = vmatpush3.bf16.xpose.msra.mxu0 %v3193_v25  ;;  %v10169_v5 = vpop.eup %8848  ;;  %v2545_v41 = vsel %vm490_vm2, %v10160_v22, 0.0  ;;  %v2542_v25 = vsel %vm490_vm2, %v10144_v29, 0.0  ;;  %v3540_v29 = vpack.c.bf16 %v7008_v4, %v7008_v4 }
 0x92f   : > { %7982 = vmatmul.mubr.msk.bf16.gmra.mrb[52].mxu1 %vm401_vm1, %v2290_v24  ;;  %8111 = vmatprep.subr.bf16.mxu0 %v9147_v58  ;;  %v2562_v30 = vpack.c.bf16 %v10169_v5, %v10164_v47  ;;  %v8851_v3 = vpop.eup %8850  ;;  %v2539_v24 = vsel %vm490_vm2, %v10142_v19, 0.0  ;;  %v7006_v19 = vld [vmem:[%s9240_s30 + $0x90] sm:$0xff] }
 0x930   : > { %8006 = vmatpush3.bf16.msra.mxu1 %v10119_v63  ;;  %8009 = vmatprep.mubr.msk.bf16.mxu1 %vm490_vm2, %v2560_v38  ;;  %v2561_v63 = vpack.c.bf16 %v10162_v9, %v10160_v22  ;;  %v2563_v17 = vpack.c.bf16 %v8851_v3, %v8851_v3  ;;  %v2548_v38 = vsel %vm490_vm2, %v10162_v9, 0.0  ;;  %v7007_v22 = vld [vmem:[%s9240_s30 + $0x98] sm:$0xff]  ;;  %v2672_v9 = vld [vmem:[%s11673_s3 + $0x4] sm:$0xf] }
 0x931   : > { %8007 = vmatprep.subr.bf16.mxu1 %v2588_v57 }
 0x934   : > { %8008 = vmatpush3.bf16.msra.mxu1 %v2588_v57  ;;  %v2557_v57 = vsel %vm509_vm3, %v8851_v3, 0.0 }
 0x935   : > { %8078 = vmatmul.mubr.msk.bf16.vlgmr.msra.gmra.mrb[72].mxu0 %vm401_vm1, %v3158_v62  ;;  %v3539_v62 = vpack.c.bf16 %v7007_v22, %v7006_v19  ;;  %8624 = vmatprep.subr.msk.bf16.mxu1 %vm683_vm5, %v2672_v9 }
 0x936   : > { %8081 = vmatprep.mubr.msk.bf16.mxu0 %vm401_vm1, %v3160_v32  ;;  %8112 = vmatpush3.bf16.msra.mxu0 %v9147_v58  ;;  %v2551_v58 = vsel %vm490_vm2, %v10164_v47, 0.0  ;;  %v2554_v47 = vsel %vm490_vm2, %v10169_v5, 0.0 }
 0x937   : > { %8010 = vmatmul.mubr.msk.bf16.vlgmr.msra.gmra.mrb[56].mxu1 %vm490_vm2, %v2561_v63  ;;  %8113 = vmatprep.subr.bf16.mxu0 %v9148_v1  ;;  %v2686_v63 = vsel %vm683_vm5, %v2672_v9, 0 }
 0x938   : > { %8013 = vmatprep.mubr.msk.bf16.mxu1 %vm490_vm2, %v2562_v30  ;;  %8018 = vmatpush3.bf16.msra.mxu1 %v2686_v63 }
 0x939   : > { %v8037_v20 = vpop.f32.mrb[64].mxu0 }
 0x93a   : > { %v2848_v12 = vpop.f32.mrb[65].mxu0  ;;  %8114 = vmatpush3.bf16.msra.mxu0 %v9148_v1  ;;  %v10192_v61 = vadd.f32 %v8037_v20, %v7259_v21 }
 0x93b   : > { %v10190_v13 = vadd.f32 %v2848_v12, %v2767_v6  ;;  %v8038_v26 = vpop.f32.mrb[66].mxu0 }
 0x93c   : > { %v2851_v55 = vpop.f32.mrb[67].mxu0  ;;  %v10205_v11 = vadd.f32 %v8038_v26, %v7262_v45  ;;  %v2884_v0 = vsel %vm490_vm2, %v10192_v61, -inf  ;;  %v7369_v45 = vld [vmem:[%s11675_s5 + $0x170] sm:$0xff]  }
 0x93d   : > { %v10194_v7 = vadd.f32 %v7258_v10, %v2851_v55  ;;  %8082 = vmatmul.mubr.msk.bf16.gmra.mrb[76].mxu0 %vm401_vm1, %v3162_v56  ;;  %v2878_v18 = vsel %vm490_vm2, %v10190_v13, -inf  ;;  %v10284_v56 = vld [vmem:[%s11675_s5 + $0x178] sm:$0xff]   ;;  %v7267_v55 = vunpack.c.h.bf16 %v7369_v45 }
 0x93e   : > { %2879 = vmax.xlane.f32.xlu1 %v2878_v18  ;;  %8115 = vmatprep.mubr.msk.bf16.mxu0 %vm294_vm0, %v3537_v15  ;;  %v2887_v40 = vsel %vm490_vm2, %v10205_v11, -inf  ;;  %v10275_v15 = vld [vmem:[%s11675_s5 + $0x16c] ss:$20 sps:$4 sm:$0xff]  }
 0x93f   : > { %8014 = vmatmul.mubr.msk.bf16.gmra.mrb[60].mxu1 %vm490_vm2, %v2563_v17  ;;  %v2881_v16 = vsel %vm490_vm2, %v10194_v7, -inf  ;;  %v3148_v26 = vunpack.c.l.bf16 %v10275_v15  ;;  %v7266_v17 = vunpack.c.l.bf16 %v7369_v45 }
 0x940   : > { %2882 = vmax.xlane.f32.xlu0 %v2881_v16 }
 0x941   : > { %v8041_v36 = vpop.f32.mrb[68].mxu0 }
 0x942   : > { %2885 = vmax.xlane.f32.xlu1 %v2884_v0  ;;  %v2864_v50 = vpop.f32.mrb[69].mxu0  ;;  %v10216_v42 = vadd.f32 %v8041_v36, %v2773_v8 }
 0x943   : > { %v10212_v34 = vadd.f32 %v7263_v33, %v2864_v50  ;;  %v8042_v39 = vpop.f32.mrb[70].mxu0  ;;  %v7270_v33 = vunpack.c.l.bf16 %v10284_v56 }
 0x944   : > { %2888 = vmax.xlane.f32.xlu0 %v2887_v40  ;;  %v2867_v43 = vpop.f32.mrb[71].mxu0  ;;  %v2896_v53 = vsel %vm509_vm3, %v10216_v42, -inf }
 0x945   : > { %v10218_v49 = vadd.f32 %v2867_v43, %v2772_v54  ;;  %v2890_v14 = vsel %vm490_vm2, %v10212_v34, -inf  ;;  %8116 = vmatmul.mubr.msk.bf16.vlgmr.msra.gmra.mrb[80].mxu0 %vm294_vm0, %v3538_v46 }
 0x946   : > { %2891 = vmax.xlane.f32.xlu1 %v2890_v14  ;;  %8119 = vmatprep.mubr.msk.bf16.mxu0 %vm294_vm0, %v3539_v62 }
 0x947   : > { %v2893_v37 = vsel %vm490_vm2, %v10218_v49, -inf }
 0x948   : > { %2894 = vmax.xlane.f32.xlu0 %v2893_v37 }
 0x94a   : > { %2897 = vmax.xlane.f32.xlu1 %v2896_v53 }
 0x94c   : > { %2546 = vadd.xlane.f32.xlu0 %v2545_v41 }
 0x94d   : > { %8120 = vmatmul.mubr.msk.bf16.gmra.mrb[84].mxu0 %vm294_vm0, %v3540_v29 }
 0x94e   : > { %2540 = vadd.xlane.f32.xlu1 %v2539_v24 }
 0x950   : > { %2543 = vadd.xlane.f32.xlu0 %v2542_v25 }
 0x952   : > { %2549 = vadd.xlane.f32.xlu1 %v2548_v38 }
 0x954   : > { %2558 = vadd.xlane.f32.xlu0 %v2557_v57 }
 0x958   : > { %2552 = vadd.xlane.f32.xlu0 %v2551_v58 }
 0x963   : > { %2947 = vrot.lane.b32.xlu1 %v9694_v2, %s9174_s14 }
 0x96e   : > { %2945 = vrot.lane.b32.xlu0 %v9698_v44, %s9174_s14 }
 0x972   : > { %2951 = vrot.lane.b32.xlu0 %v9803_v51, %s9174_s14 }
 0x987   : > { %2555 = vadd.xlane.f32.xlu1 %v2554_v47 }
 0x998   : > { %2949 = vrot.lane.b32.xlu1 %v9728_v48, %s9174_s14 }
 0x9cb   : > { %v10264_v35 = vpop.xlane.xlu1 %2879 }
 0x9cc   : > { %v2899_v9 = vsub.f32 %v10190_v13, %v10264_v35 }
 0x9cd   : > { %v10258_v32 = vpop.xlane.xlu0 %2882 }
 0x9ce   : > { %v2900_v58 = vsub.f32 %v10194_v7, %v10258_v32 }
 0x9cf   : > { %v10266_v21 = vpop.xlane.xlu1 %2885 }
 0x9d0   : > { %v2908_v32 = vmul.f32 1.442695, %v2900_v58 }
 0x9d1   : > { %v10260_v30 = vpop.xlane.xlu0 %2888 }
 0x9d3   : > { %v10268_v5 = vpop.xlane.xlu1 %2891 }
 0x9d5   : > { %v10262_v52 = vpop.xlane.xlu0 %2894 }
 0x9d7   : > { %v10270_v10 = vpop.xlane.xlu1 %2897 }
 0x9d9   : > { %v2547_v6 = vpop.xlane.xlu0 %2546 }
 0x9da   : > { %8852 = vrcp.f32 %v2547_v6 }
 0x9db   : > { %v2541_v3 = vpop.xlane.xlu1 %2540 }
 0x9dc   : > { %8854 = vrcp.f32 %v2541_v3 }
 0x9dd   : > { %v2544_v1 = vpop.xlane.xlu0 %2543 }
 0x9df   : > { %v2550_v12 = vpop.xlane.xlu1 %2549 }
 0x9e0   : > { %8856 = vrcp.f32 %v2550_v12  ;;  %v2906_v12 = vmul.f32 1.442695, %v2899_v9 }
 0x9e1   : > { %v2559_v31 = vpop.xlane.xlu0 %2558  ;;  %8858 = vrcp.f32 %v2544_v1 }
 0x9e2   : > { %8860 = vrcp.f32 %v2559_v31  ;;  %v2904_v31 = vsub.f32 %v10218_v49, %v10262_v52 }
 0x9e3   : > { %v2948_v22 = vpop.permute.xlu1 %2947 }
 0x9e4   : > { %v8853_v60 = vpop.eup %8852 }
 0x9e5   : > { %v2553_v59 = vpop.xlane.xlu0 %2552 }
 0x9e6   : > { %v8855_v36 = vpop.eup %8854  ;;  %8862 = vrcp.f32 %v2553_v59 }
 0x9e9   : > { %v2946_v20 = vpop.permute.xlu0 %2945 }
 0x9ea   : > { %8043 = vmatprep.subr.bf16.mxu1 %v2946_v20  ;;  %v8857_v46 = vpop.eup %8856 }
 0x9eb   : > { %v8859_v14 = vpop.eup %8858 }
 0xa08   : > { %v8079_v18 = vpop.f32.mrb[72].mxu0 }
 0xa09   : > { %v3229_v23 = vpop.f32.mrb[73].mxu0  ;;  %v10289_v50 = vadd.f32 %v8079_v18, %v7267_v55  ;;  %v2952_v55 = vpop.permute.xlu0 %2951  ;;  %v2901_v18 = vsub.f32 %v10192_v61, %v10266_v21  ;;  %v2916_v21 = vmul.f32 1.442695, %v2904_v31 }
 0xa0a   : > { %v10286_v28 = vadd.f32 %v3229_v23, %v3148_v26  ;;  %v8011_v16 = vpop.f32.mrb[56].mxu1  ;;  %v8080_v8 = vpop.f32.mrb[74].mxu0  ;;  %v2902_v26 = vsub.f32 %v10205_v11, %v10260_v30  ;;  %v10326_v11 = vld [vmem:[%s11672_s2] ss:$0 sm:$0xff] }
 0xa0b   : > { %v2624_v0 = vpop.f32.mrb[57].mxu1  ;;  %v3232_v54 = vpop.f32.mrb[75].mxu0  ;;  %v2663_v37 = vmul.f32 %v8853_v60, %v8011_v16  ;;  %v10295_v24 = vadd.f32 %v8080_v8, %v7270_v33  ;;  %v3265_v29 = vsel %vm490_vm2, %v10289_v50, -inf  ;;  %v2969_v60 = vand.u32 %v2952_v55, %v9428_v27 }
 0xa0c   : > { %v10291_v39 = vadd.f32 %v7266_v17, %v3232_v54  ;;  %v8012_v40 = vpop.f32.mrb[58].mxu1  ;;  %v3259_v43 = vsel %vm490_vm2, %v10286_v28, -inf  ;;  %v2661_v25 = vmul.f32 %v8855_v36, %v2624_v0  ;;  %v2903_v17 = vsub.f32 %v10212_v34, %v10268_v5  ;;  %v8861_v8 = vpop.eup %8860 }
 0xa0d   : > { %v2664_v53 = vmul.f32 %v8857_v46, %v8012_v40  ;;  %v2627_v41 = vpop.f32.mrb[59].mxu1  ;;  %3260 = vmax.xlane.f32.xlu1 %v3259_v43  ;;  %v3268_v7 = vsel %vm490_vm2, %v10295_v24, -inf  ;;  %v2912_v52 = vmul.f32 1.442695, %v2902_v26  ;;  %v2910_v34 = vmul.f32 1.442695, %v2901_v18  ;;  %v8863_v54 = vpop.eup %8862 }
 0xa0e   : > { %v2662_v38 = vmul.f32 %v8859_v14, %v2627_v41  ;;  %v3262_v57 = vsel %vm490_vm2, %v10291_v39, -inf  ;;  %v2914_v36 = vmul.f32 1.442695, %v2903_v17  ;;  %v2905_v46 = vsub.f32 %v10216_v42, %v10270_v10 }
 0xa0f   : > { %v2669_v19 = vpack.c.bf16 %v2664_v53, %v2663_v37  ;;  %3263 = vmax.xlane.f32.xlu0 %v3262_v57  ;;  %v3153_v26 = vunpack.c.h.bf16 %v10275_v15 }
 0xa10   : > { %v2668_v62 = vpack.c.bf16 %v2662_v38, %v2661_v25  ;;  %v10301_v4 = vpop.f32.mrb[76].mxu0  ;;  %v3053_v25 = vld [vmem:[%s11673_s3 + $0x8] sm:$0xf]  ;;  %v2918_v38 = vmul.f32 1.442695, %v2905_v46 }
 0xa11   : > { %3266 = vmax.xlane.f32.xlu1 %v3265_v29  ;;  %v10307_v63 = vpop.f32.mrb[77].mxu0  ;;  %v3067_v9 = vsel %vm683_vm5, %v3053_v25, 0 }
 0xa12   : > { %v8015_v47 = vpop.f32.mrb[60].mxu1  ;;  %8019 = vmatprep.mubr.msk.bf16.mxu1 %vm401_vm1, %v2668_v62  ;;  %v8084_v6 = vpop.f32.mrb[78].mxu0 }
 0xa13   : > { %v2640_v1 = vpop.f32.mrb[61].mxu1  ;;  %3269 = vmax.xlane.f32.xlu0 %v3268_v7  ;;  %8020 = vmatmul.mubr.msk.bf16.vlgmr.msra.gmra.mrb[48].mxu1 %vm401_vm1, %v2669_v19  ;;  %v10313_v3 = vpop.f32.mrb[79].mxu0  ;;  %v2667_v14 = vmul.f32 %v8861_v8, %v8015_v47 }
 0xa14   : > { %8044 = vmatpush3.bf16.msra.mxu1 %v2946_v20  ;;  %v2556_v13 = vpop.xlane.xlu1 %2555  ;;  %v8016_v35 = vpop.f32.mrb[62].mxu1  ;;  %v2665_v37 = vmul.f32 %v8863_v54, %v2640_v1 }
 0xa15   : > { %8864 = vrcp.f32 %v2556_v13  ;;  %8045 = vmatprep.subr.bf16.mxu1 %v2948_v22  ;;  %v2643_v45 = vpop.f32.mrb[63].mxu1  ;;  %v2671_v10 = vpack.c.bf16 %v2667_v14, %v2667_v14 }
 0xa16   : > { %8866 = vpow2.f32 %v2908_v32 }
 0xa17   : > { %8868 = vpow2.f32 %v2906_v12  ;;  %v6982_v12 = vld [vmem:[%s11675_s5 + $0x184] sm:$0x1] }
 0xa18   : > { %8046 = vmatpush3.bf16.msra.mxu1 %v2948_v22  ;;  %v2950_v59 = vpop.permute.xlu1 %2949  ;;  %v8117_v20 = vpop.f32.mrb[80].mxu0  ;;  %8870 = vpow2.f32 %v2912_v52  ;;  %v3154_v55 = vunpack.c.l.bf16 %v6982_v12 }
 0xa19   : > { %8047 = vmatprep.subr.bf16.mxu1 %v2950_v59  ;;  %v3596_v30 = vadd.f32 %v10326_v11, %v8117_v20  ;;  %v3587_v49 = vpop.f32.mrb[81].mxu0  ;;  %8872 = vpow2.f32 %v2916_v21 }
 0xa1a   : > { %v3588_v23 = vadd.f32 %v10326_v11, %v3587_v49  ;;  %v8118_v61 = vpop.f32.mrb[82].mxu0  ;;  %8874 = vpow2.f32 %v2910_v34  ;;  %v10372_v20 = vadd.f32 %v10301_v4, %v3154_v55 }
 0xa1b   : > { %v3599_v16 = vadd.f32 %v10326_v11, %v8118_v61  ;;  %v3590_v33 = vpop.f32.mrb[83].mxu0  ;;  %8876 = vpow2.f32 %v2914_v36 }
 0xa1c   : > { %8048 = vmatpush3.bf16.msra.mxu1 %v2950_v59  ;;  %v3591_v5 = vadd.f32 %v10326_v11, %v3590_v33  ;;  %8878 = vpow2.f32 %v2918_v38 }
 0xa1d   : > { %8049 = vmatprep.subr.bf16.mxu1 %v2969_v60  ;;  %v10333_v0 = vpack.c.bf16 %v3599_v16, %v3596_v30 }
 0xa1e   : > { %v10337_v40 = vpack.c.bf16 %v3591_v5, %v3588_v23 }
 0xa1f   : > { %v8865_v43 = vpop.eup %8864 }
 0xa20   : > { %v2666_v53 = vmul.f32 %v8865_v43, %v2643_v45  ;;  %8050 = vmatpush3.bf16.msra.mxu1 %v2969_v60  ;;  %v8867_v41 = vpop.eup %8866  ;;  %v10354_v32 = vpop.f32.mrb[84].mxu0 }
 0xa21   : > { %8629 = vmatprep.subr.msk.bf16.mxu1 %vm683_vm5, %v3053_v25  ;;  %v8869_v42 = vpop.eup %8868  ;;  %v3603_v1 = vpop.f32.mrb[85].mxu0  ;;  %v2923_v4 = vsel %vm490_vm2, %v8867_v41, 0.0  ;;  %v3612_v12 = vadd.f32 %v10326_v11, %v10354_v32 }
 0xa22   : > { %v2670_v57 = vpack.c.bf16 %v2666_v53, %v2665_v37  ;;  %3326 = vrot.lane.b32.xlu1 %v9698_v44, %s9175_s16  ;;  %v2941_v58 = vpack.c.bf16 %v8867_v41, %v8869_v42  ;;  %v8871_v19 = vpop.eup %8870  ;;  %v3604_v13 = vadd.f32 %v10326_v11, %v3603_v1  ;;  %v8122_v35 = vpop.f32.mrb[86].mxu0 }
 0xa23   : > { %v8873_v22 = vpop.eup %8872  ;;  %v3606_v45 = vpop.f32.mrb[87].mxu0  ;;  %v2929_v49 = vsel %vm490_vm2, %v8871_v19, 0.0 }
 0xa24   : > { %8023 = vmatprep.mubr.msk.bf16.mxu1 %vm401_vm1, %v2670_v57  ;;  %v8875_v62 = vpop.eup %8874  ;;  %v3607_v31 = vadd.f32 %v10326_v11, %v3606_v45  ;;  %v2935_v23 = vsel %vm490_vm2, %v8873_v22, 0.0 }
 0xa25   : > { %8024 = vmatmul.mubr.msk.bf16.gmra.mrb[52].mxu1 %vm401_vm1, %v2671_v10  ;;  %v8877_v29 = vpop.eup %8876  ;;  %v2942_v44 = vpack.c.bf16 %v8871_v19, %v8875_v62  ;;  %v2926_v30 = vsel %vm490_vm2, %v8875_v62, 0.0 }
 0xa26   : > { %8051 = vmatprep.mubr.msk.bf16.mxu1 %vm490_vm2, %v2941_v58  ;;  %v2943_v47 = vpack.c.bf16 %v8873_v22, %v8877_v29  ;;  %v8879_v6 = vpop.eup %8878  ;;  %v10366_v59 = vpack.c.bf16 %v3607_v31, %v3604_v13  ;;  %v2932_v61 = vsel %vm490_vm2, %v8877_v29, 0.0  ;;  %v10441_v31 = vpack.c.bf16 %v3612_v12, %v3612_v12 }
 0xa27   : > { %v2944_v7 = vpack.c.bf16 %v8879_v6, %v8879_v6  ;;  %v2938_v52 = vsel %vm509_vm3, %v8879_v6, 0.0 }
 0xa29   : > { %3328 = vrot.lane.b32.xlu0 %v9694_v2, %s9175_s16  ;;  %v7271_v2 = vunpack.c.h.bf16 %v10284_v56  ;;  %v10369_v56 = vadd.f32 %v10313_v3, %v3153_v26  ;;  %v2920_v3 = vsel %vm490_vm2, %v8869_v42, 0.0 }
 0xa2b   : > { %v10364_v18 = vadd.f32 %v7271_v2, %v10307_v63  ;;  %v3274_v15 = vsel %vm490_vm2, %v10369_v56, -inf  ;;  %v3277_v63 = vsel %vm509_vm3, %v10372_v20, -inf }
 0xa2d   : > { %8052 = vmatmul.mubr.msk.bf16.vlgmr.msra.gmra.mrb[64].mxu1 %vm490_vm2, %v2942_v44  ;;  %v3271_v17 = vsel %vm490_vm2, %v10364_v18, -inf }
 0xa2e   : > { %8055 = vmatprep.mubr.msk.bf16.mxu1 %vm490_vm2, %v2943_v47  ;;  %8060 = vmatpush3.bf16.msra.mxu1 %v3067_v9 }
 0xa35   : > { %8056 = vmatmul.mubr.msk.bf16.gmra.mrb[68].mxu1 %vm490_vm2, %v2944_v7 }
 0xa46   : > { %3272 = vmax.xlane.f32.xlu1 %v3271_v17 }
 0xa48   : > { %3275 = vmax.xlane.f32.xlu0 %v3274_v15 }
 0xa4a   : > { %3278 = vmax.xlane.f32.xlu1 %v3277_v63 }
 0xa4c   : > { %2927 = vadd.xlane.f32.xlu0 %v2926_v30 }
 0xa4e   : > { %2921 = vadd.xlane.f32.xlu1 %v2920_v3 }
 0xa50   : > { %2924 = vadd.xlane.f32.xlu0 %v2923_v4 }
 0xa52   : > { %2930 = vadd.xlane.f32.xlu1 %v2929_v49 }
 0xa54   : > { %2939 = vadd.xlane.f32.xlu0 %v2938_v52 }
 0xa56   : > { %2936 = vadd.xlane.f32.xlu1 %v2935_v23 }
 0xa58   : > { %2933 = vadd.xlane.f32.xlu0 %v2932_v61 }
 0xa67   : > { %3332 = vrot.lane.b32.xlu1 %v9803_v51, %s9175_s16 }
 0xa6b   : > { %3640 = vrot.lane.b32.xlu1 %v10337_v40, %s9164_s9 }
 0xa6e   : > { %3330 = vrot.lane.b32.xlu0 %v9728_v48, %s9175_s16 }
 0xa9a   : > { %v3261_v21 = vpop.xlane.xlu1 %3260 }
 0xa9b   : > { %v3280_v60 = vsub.f32 %v10286_v28, %v3261_v21 }
 0xa9c   : > { %v3264_v16 = vpop.xlane.xlu0 %3263 }
 0xa9d   : > { %v3287_v33 = vmul.f32 1.442695, %v3280_v60  ;;  %v3281_v34 = vsub.f32 %v10291_v39, %v3264_v16 }
 0xa9e   : > { %v3267_v5 = vpop.xlane.xlu1 %3266 }
 0xa9f   : > { %8880 = vpow2.f32 %v3287_v33  ;;  %v3289_v8 = vmul.f32 1.442695, %v3281_v34  ;;  %v3282_v36 = vsub.f32 %v10289_v50, %v3267_v5 }
 0xaa0   : > { %v3270_v54 = vpop.xlane.xlu0 %3269 }
 0xaa1   : > { %8882 = vpow2.f32 %v3289_v8  ;;  %v3291_v51 = vmul.f32 1.442695, %v3282_v36  ;;  %v3283_v46 = vsub.f32 %v10295_v24, %v3270_v54 }
 0xaa2   : > { %v10397_v43 = vpop.permute.xlu1 %3326 }
 0xaa3   : > { %8884 = vpow2.f32 %v3291_v51  ;;  %v3293_v48 = vmul.f32 1.442695, %v3283_v46  ;;  %8085 = vmatprep.subr.bf16.mxu1 %v10397_v43 }
 0xaa4   : > { %v10422_v57 = vpop.permute.xlu0 %3328 }
 0xaa5   : > { %8886 = vpow2.f32 %v3293_v48 }
 0xaa9   : > { %v10400_v28 = vpop.eup %8880 }
 0xaaa   : > { %v3301_v39 = vsel %vm490_vm2, %v10400_v28, 0.0 }
 0xaab   : > { %v10404_v14 = vpop.eup %8882  ;;  %3302 = vadd.xlane.f32.xlu1 %v3301_v39 }
 0xaac   : > { %v3322_v50 = vpack.c.bf16 %v10404_v14, %v10400_v28  ;;  %v3304_v38 = vsel %vm490_vm2, %v10404_v14, 0.0 }
 0xaad   : > { %v10408_v37 = vpop.eup %8884 }
 0xaae   : > { %v3307_v24 = vsel %vm490_vm2, %v10408_v37, 0.0 }
 0xaaf   : > { %v10412_v53 = vpop.eup %8886  ;;  %3308 = vadd.xlane.f32.xlu0 %v3307_v24 }
 0xab0   : > { %v3323_v41 = vpack.c.bf16 %v10412_v53, %v10408_v37  ;;  %v3310_v25 = vsel %vm490_vm2, %v10412_v53, 0.0 }
 0xab1   : > { %3311 = vadd.xlane.f32.xlu1 %v3310_v25 }
 0xab3   : > { %3305 = vadd.xlane.f32.xlu0 %v3304_v38 }
 0xac2   : > { %3644 = vrot.lane.b32.xlu1 %v10366_v59, %s9164_s9 }
 0xad3   : > { %v3273_v42 = vpop.xlane.xlu1 %3272 }
 0xad4   : > { %v3284_v58 = vsub.f32 %v10364_v18, %v3273_v42 }
 0xad5   : > { %v3276_v10 = vpop.xlane.xlu0 %3275 }
 0xad6   : > { %v3285_v19 = vsub.f32 %v10369_v56, %v3276_v10  ;;  %v3295_v44 = vmul.f32 1.442695, %v3284_v58 }
 0xad7   : > { %v3279_v22 = vpop.xlane.xlu1 %3278 }
 0xad8   : > { %v3297_v62 = vmul.f32 1.442695, %v3285_v19  ;;  %v3286_v29 = vsub.f32 %v10372_v20, %v3279_v22 }
 0xad9   : > { %v2928_v35 = vpop.xlane.xlu0 %2927 }
 0xada   : > { %8888 = vpow2.f32 %v3297_v62  ;;  %v3299_v9 = vmul.f32 1.442695, %v3286_v29 }
 0xadb   : > { %v2922_v45 = vpop.xlane.xlu1 %2921 }
 0xadc   : > { %8890 = vpow2.f32 %v3299_v9 }
 0xadd   : > { %8892 = vpow2.f32 %v3295_v44  ;;  %v2925_v26 = vpop.xlane.xlu0 %2924 }
 0xade   : > { %8894 = vrcp.f32 %v2928_v35 }
 0xadf   : > { %v2931_v55 = vpop.xlane.xlu1 %2930  ;;  %8896 = vrcp.f32 %v2922_v45 }
 0xae0   : > { %8898 = vrcp.f32 %v2931_v55 }
 0xae1   : > { %v2940_v18 = vpop.xlane.xlu0 %2939  ;;  %8900 = vrcp.f32 %v2925_v26 }
 0xae2   : > { %8902 = vrcp.f32 %v2940_v18 }
 0xae3   : > { %v2937_v56 = vpop.xlane.xlu1 %2936 }
 0xae4   : > { %v10427_v47 = vpop.eup %8888  ;;  %8904 = vrcp.f32 %v2937_v56 }
 0xae5   : > { %v3316_v6 = vsel %vm490_vm2, %v10427_v47, 0.0  ;;  %v2934_v20 = vpop.xlane.xlu0 %2933 }
 0xae6   : > { %v10431_v7 = vpop.eup %8890  ;;  %3317 = vadd.xlane.f32.xlu1 %v3316_v6  ;;  %8906 = vrcp.f32 %v2934_v20 }
 0xae7   : > { %v3319_v1 = vsel %vm509_vm3, %v10431_v7, 0.0  ;;  %v10435_v2 = vpop.eup %8892  ;;  %v3333_v39 = vpop.permute.xlu1 %3332  ;;  %v3325_v14 = vpack.c.bf16 %v10431_v7, %v10431_v7 }
 0xae8   : > { %3320 = vadd.xlane.f32.xlu0 %v3319_v1  ;;  %v3313_v13 = vsel %vm490_vm2, %v10435_v2, 0.0  ;;  %v8895_v11 = vpop.eup %8894  ;;  %v3350_v38 = vand.u32 %v3333_v39, %v9428_v27  ;;  %v3324_v10 = vpack.c.bf16 %v10427_v47, %v10435_v2 }
 0xae9   : > { %v8897_v17 = vpop.eup %8896  ;;  %v3331_v24 = vpop.permute.xlu0 %3330 }
 0xaea   : > { %v8899_v63 = vpop.eup %8898 }
 0xaeb   : > { %v8901_v3 = vpop.eup %8900  ;;  %v3641_v28 = vpop.permute.xlu1 %3640 }
 0xaec   : > { %3314 = vadd.xlane.f32.xlu0 %v3313_v13  ;;  %v8903_v33 = vpop.eup %8902 }
 0xaee   : > { %v8905_v5 = vpop.eup %8904 }
 0xaf0   : > { %v8907_v36 = vpop.eup %8906 }
 0xaf7   : > { %3646 = vrot.lane.b32.xlu1 %v10441_v31, %s9164_s9 }
 0xafb   : > { %4023 = vrot.lane.b32.xlu1 %v10333_v0, %s9165_s10 }
 0xaff   : > { %4027 = vrot.lane.b32.xlu1 %v10441_v31, %s9165_s10 }
 0xb00   : > { %v8053_v32 = vpop.f32.mrb[64].mxu1 }
 0xb01   : > { %v3005_v15 = vpop.f32.mrb[65].mxu1  ;;  %v3044_v4 = vmul.f32 %v8895_v11, %v8053_v32 }
 0xb02   : > { %v8054_v30 = vpop.f32.mrb[66].mxu1  ;;  %3642 = vrot.lane.b32.xlu0 %v10333_v0, %s9164_s9  ;;  %v3042_v23 = vmul.f32 %v8897_v17, %v3005_v15 }
 0xb03   : > { %v3045_v49 = vmul.f32 %v8899_v63, %v8054_v30  ;;  %v3008_v52 = vpop.f32.mrb[67].mxu1  ;;  %4015 = vrot.lane.b32.xlu1 %v10333_v0, %s9166_s11 }
 0xb04   : > { %v3043_v61 = vmul.f32 %v8901_v3, %v3008_v52 }
 0xb05   : > { %v3050_v21 = vpack.c.bf16 %v3045_v49, %v3044_v4 }
 0xb06   : > { %v3049_v60 = vpack.c.bf16 %v3043_v61, %v3042_v23  ;;  %4021 = vrot.lane.b32.xlu0 %v10337_v40, %s9165_s10 }
 0xb07   : > { %4019 = vrot.lane.b32.xlu1 %v10441_v31, %s9166_s11 }
 0xb08   : > { %v8057_v16 = vpop.f32.mrb[68].mxu1  ;;  %8061 = vmatprep.mubr.msk.bf16.mxu1 %vm401_vm1, %v3049_v60 }
 0xb09   : > { %v3021_v34 = vpop.f32.mrb[69].mxu1  ;;  %8062 = vmatmul.mubr.msk.bf16.vlgmr.msra.gmra.mrb[48].mxu1 %vm401_vm1, %v3050_v21  ;;  %v3048_v54 = vmul.f32 %v8903_v33, %v8057_v16  ;;  %v3661_v21 = vsel %vm401_vm1, %v3641_v28, 0 }
 0xb0a   : > { %8086 = vmatpush3.bf16.msra.mxu1 %v10397_v43  ;;  %v8058_v8 = vpop.f32.mrb[70].mxu1  ;;  %4025 = vrot.lane.b32.xlu0 %v10366_v59, %s9165_s10  ;;  %v3046_v46 = vmul.f32 %v8907_v36, %v3021_v34 }
 0xb0b   : > { %8087 = vmatprep.subr.bf16.mxu1 %v10422_v57  ;;  %v3024_v51 = vpop.f32.mrb[71].mxu1  ;;  %3805 = vrot.lane.b32.xlu1 %v10333_v0, %s9167_s12  ;;  %v3052_v43 = vpack.c.bf16 %v3048_v54, %v3048_v54 }
 0xb0c   : > { %v3047_v48 = vmul.f32 %v8905_v5, %v3024_v51 }
 0xb0e   : > { %v3051_v25 = vpack.c.bf16 %v3047_v48, %v3046_v46  ;;  %8088 = vmatpush3.bf16.msra.mxu1 %v10422_v57  ;;  %4013 = vrot.lane.b32.xlu0 %v10337_v40, %s9166_s11  ;;  %v3434_v57 = vld [vmem:[%s11673_s3 + $0xc] sm:$0xf] }
 0xb0f   : > { %8089 = vmatprep.subr.bf16.mxu1 %v3331_v24  ;;  %v3448_v42 = vsel %vm683_vm5, %v3434_v57, 0 }
 0xb10   : > { %8065 = vmatprep.mubr.msk.bf16.mxu1 %vm401_vm1, %v3051_v25 }
 0xb11   : > { %8066 = vmatmul.mubr.msk.bf16.gmra.mrb[52].mxu1 %vm401_vm1, %v3052_v43 }
 0xb12   : > { %8090 = vmatpush3.bf16.msra.mxu1 %v3331_v24  ;;  %4017 = vrot.lane.b32.xlu0 %v10366_v59, %s9166_s11 }
 0xb13   : > { %8091 = vmatprep.subr.bf16.mxu1 %v3350_v38  ;;  %8093 = vmatprep.mubr.msk.bf16.mxu1 %vm490_vm2, %v3322_v50 }
 0xb16   : > { %8092 = vmatpush3.bf16.msra.mxu1 %v3350_v38  ;;  %3803 = vrot.lane.b32.xlu0 %v10337_v40, %s9167_s12 }
 0xb17   : > { %8634 = vmatprep.subr.msk.bf16.mxu1 %vm683_vm5, %v3434_v57 }
 0xb19   : > { %8094 = vmatmul.mubr.msk.bf16.vlgmr.msra.gmra.mrb[72].mxu1 %vm490_vm2, %v3323_v41 }
 0xb1a   : > { %8097 = vmatprep.mubr.msk.bf16.mxu1 %vm490_vm2, %v3324_v10  ;;  %8102 = vmatpush3.bf16.msra.mxu1 %v3448_v42  ;;  %v9150_v42 = vld [vmem:[%s11674_s4] ss:$0 sm:$0xff] }
 0xb1b   : > { %8635 = vmatprep.subr.msk.bf16.mxu1 %vm401_vm1, %v3641_v28 }
 0xb21   : > { %8098 = vmatmul.mubr.msk.bf16.gmra.mrb[76].mxu1 %vm490_vm2, %v3325_v14 }
 0xb38   : > { %v3303_v50 = vpop.xlane.xlu1 %3302 }
 0xb39   : > { %8908 = vrcp.f32 %v3303_v50 }
 0xb3c   : > { %v3309_v19 = vpop.xlane.xlu0 %3308 }
 0xb3d   : > { %8910 = vrcp.f32 %v3309_v19 }
 0xb3e   : > { %v3312_v58 = vpop.xlane.xlu1 %3311 }
 0xb3f   : > { %8912 = vrcp.f32 %v3312_v58 }
 0xb40   : > { %v3306_v62 = vpop.xlane.xlu0 %3305 }
 0xb41   : > { %8914 = vrcp.f32 %v3306_v62 }
 0xb42   : > { %v10495_v22 = vpop.permute.xlu1 %3644 }
 0xb43   : > { %v8909_v26 = vpop.eup %8908  ;;  %v3667_v48 = vsel %vm401_vm1, %v10495_v22, 0 }
 0xb47   : > { %v8911_v18 = vpop.eup %8910 }
 0xb49   : > { %v8913_v20 = vpop.eup %8912 }
 0xb4b   : > { %v8915_v32 = vpop.eup %8914 }
 0xb73   : > { %v3318_v37 = vpop.xlane.xlu1 %3317 }
 0xb74   : > { %8916 = vrcp.f32 %v3318_v37 }
 0xb75   : > { %v3321_v53 = vpop.xlane.xlu0 %3320 }
 0xb76   : > { %8918 = vrcp.f32 %v3321_v53 }
 0xb77   : > { %v10497_v41 = vpop.permute.xlu1 %3646 }
 0xb78   : > { %v3670_v39 = vsel %vm401_vm1, %v10497_v41, 0 }
 0xb79   : > { %v3315_v29 = vpop.xlane.xlu0 %3314 }
 0xb7a   : > { %8920 = vrcp.f32 %v3315_v29 }
 0xb7b   : > { %v10499_v44 = vpop.permute.xlu1 %4023 }
 0xb7c   : > { %v4045_v25 = vsel %vm401_vm1, %v10499_v44, 0 }
 0xb7d   : > { %v3643_v9 = vpop.permute.xlu0 %3642 }
 0xb7e   : > { %v8917_v23 = vpop.eup %8916  ;;  %v3664_v46 = vsel %vm401_vm1, %v3643_v9, 0 }
 0xb7f   : > { %v10501_v47 = vpop.permute.xlu1 %4027 }
 0xb80   : > { %v8919_v60 = vpop.eup %8918  ;;  %v4051_v38 = vsel %vm401_vm1, %v10501_v47, 0 }
 0xb81   : > { %v10503_v6 = vpop.permute.xlu0 %4021 }
 0xb82   : > { %v4042_v24 = vsel %vm401_vm1, %v10503_v6, 0 }
 0xb83   : > { %v10507_v1 = vpop.permute.xlu1 %4015 }
 0xb84   : > { %v8921_v33 = vpop.eup %8920 }
 0xb85   : > { %v10505_v7 = vpop.permute.xlu0 %4025 }
 0xb86   : > { %v4048_v43 = vsel %vm401_vm1, %v10505_v7, 0 }
 0xb87   : > { %v10511_v13 = vpop.permute.xlu1 %4019 }
 0xb89   : > { %v10509_v2 = vpop.permute.xlu0 %4013 }
 0xb8b   : > { %v3806_v45 = vpop.permute.xlu1 %3805 }
 0xb8d   : > { %v10513_v35 = vpop.permute.xlu0 %4017 }
 0xb91   : > { %v3804_v12 = vpop.permute.xlu0 %3803 }
 0xb92   : > { %8139 = vmatprep.subr.bf16.mxu0 %v3804_v12 }
 0xb93   : > { %8140 = vmatpush3.bf16.msra.mxu0 %v3804_v12 }
 0xb94   : > { %8141 = vmatprep.subr.bf16.mxu0 %v3806_v45 }
 0xb97   : > { %8142 = vmatpush3.bf16.msra.mxu0 %v3806_v45 }
 0xbec   : > { %v8095_v55 = vpop.f32.mrb[72].mxu1 }
 0xbed   : > { %v3386_v56 = vpop.f32.mrb[73].mxu1  ;;  %v3425_v17 = vmul.f32 %v8911_v18, %v8095_v55 }
 0xbee   : > { %v8096_v11 = vpop.f32.mrb[74].mxu1  ;;  %v3423_v30 = vmul.f32 %v8909_v26, %v3386_v56  ;;  %v7019_v26 = vld [vmem:[%s11675_s5 + $0x50] sm:$0x1] }
 0xbef   : > { %v3426_v15 = vmul.f32 %v8913_v20, %v8096_v11  ;;  %v3389_v63 = vpop.f32.mrb[75].mxu1 }
 0xbf0   : > { %v3424_v3 = vmul.f32 %v8915_v32, %v3389_v63  ;;  %v7373_v32 = vld [vmem:[%s11675_s5 + $0x48] sm:$0xff]  }
 0xbf1   : > { %v3431_v4 = vpack.c.bf16 %v3426_v15, %v3425_v17  ;;  %v3635_v17 = vunpack.c.l.bf16 %v7019_v26 }
 0xbf2   : > { %v3430_v49 = vpack.c.bf16 %v3424_v3, %v3423_v30  ;;  %v7282_v3 = vunpack.c.l.bf16 %v7373_v32 }
 0xbf4   : > { %v8099_v52 = vpop.f32.mrb[76].mxu1  ;;  %8103 = vmatprep.mubr.msk.bf16.mxu1 %vm401_vm1, %v3430_v49  ;;  %v7283_v49 = vunpack.c.h.bf16 %v7373_v32 }
 0xbf5   : > { %v3402_v61 = vpop.f32.mrb[77].mxu1  ;;  %8104 = vmatmul.mubr.msk.bf16.vlgmr.msra.gmra.mrb[48].mxu1 %vm401_vm1, %v3431_v4  ;;  %v3429_v34 = vmul.f32 %v8919_v60, %v8099_v52 }
 0xbf6   : > { %8124 = vmatpush3.bf16.xpose.msra.mxu1 %v3661_v21  ;;  %v8100_v16 = vpop.f32.mrb[78].mxu1  ;;  %v3427_v8 = vmul.f32 %v8921_v33, %v3402_v61 }
 0xbf7   : > { %8636 = vmatprep.subr.msk.bf16.mxu1 %vm401_vm1, %v3643_v9  ;;  %v3405_v5 = vpop.f32.mrb[79].mxu1  ;;  %v3433_v51 = vpack.c.bf16 %v3429_v34, %v3429_v34 }
 0xbf8   : > { %v3428_v36 = vmul.f32 %v8917_v23, %v3405_v5 }
 0xbfa   : > { %v3432_v54 = vpack.c.bf16 %v3428_v36, %v3427_v8 }
 0xbfc   : > { %8107 = vmatprep.mubr.msk.bf16.mxu1 %vm401_vm1, %v3432_v54 }
 0xbfd   : > { %8108 = vmatmul.mubr.msk.bf16.gmra.mrb[52].mxu1 %vm401_vm1, %v3433_v51 }
 0xbfe   : > { %8126 = vmatpush3.bf16.xpose.msra.mxu1 %v3664_v46  ;;  %8131 = vmatprep.mubr.msk.bf16.mxu1 %vm401_vm1, %v10337_v40 }
 0xbff   : > { %8637 = vmatprep.subr.msk.bf16.mxu1 %vm401_vm1, %v10495_v22 }
 0xc06   : > { %8128 = vmatpush3.bf16.xpose.msra.mxu1 %v3667_v48 }
 0xc07   : > { %8638 = vmatprep.subr.msk.bf16.mxu1 %vm401_vm1, %v10497_v41 }
 0xc0e   : > { %8130 = vmatpush3.bf16.xpose.msra.mxu1 %v3670_v39 }
 0xc0f   : > { %8640 = vmatprep.subr.msk.bf16.mxu1 %vm401_vm1, %v10503_v6  ;;  %v7371_v6 = vld [vmem:[%s11675_s5 + $0x38] sm:$0xff]  }
 0xc15   : > { %8132 = vmatmul.mubr.msk.bf16.vlgmr.msra.gmra.mrb[80].mxu1 %vm401_vm1, %v10333_v0 }
 0xc16   : > { %8135 = vmatprep.mubr.msk.bf16.mxu1 %vm401_vm1, %v10366_v59  ;;  %8166 = vmatpush3.bf16.xpose.msra.mxu1 %v4042_v24 }
 0xc17   : > { %8641 = vmatprep.subr.msk.bf16.mxu1 %vm401_vm1, %v10499_v44 }
 0xc1d   : > { %8136 = vmatmul.mubr.msk.bf16.gmra.mrb[84].mxu1 %vm401_vm1, %v10441_v31 }
 0xc1e   : > { %8168 = vmatpush3.bf16.xpose.msra.mxu1 %v4045_v25  ;;  %8173 = vmatprep.mubr.msk.bf16.mxu1 %vm401_vm1, %v10509_v2 }
 0xc1f   : > { %8642 = vmatprep.subr.msk.bf16.mxu1 %vm401_vm1, %v10505_v7 }
 0xc26   : > { %8170 = vmatpush3.bf16.xpose.msra.mxu1 %v4048_v43  ;;  %v7375_v43 = vld [vmem:[%s11675_s5 + $0xb0] sm:$0xff]  }
 0xc27   : > { %8643 = vmatprep.subr.msk.bf16.mxu1 %vm401_vm1, %v10501_v47  ;;  %v7372_v47 = vld [vmem:[%s11675_s5 + $0x40] sm:$0xff]  }
 0xc28   : > { %v7278_v7 = vunpack.c.l.bf16 %v7372_v47  ;;  %v7279_v18 = vunpack.c.h.bf16 %v7372_v47 }
 0xc2e   : > { %8172 = vmatpush3.bf16.xpose.msra.mxu1 %v4051_v38  ;;  %v7290_v38 = vunpack.c.l.bf16 %v7375_v43 }
 0xc35   : > { %8174 = vmatmul.mubr.msk.bf16.vlgmr.msra.gmra.mrb[88].mxu1 %vm401_vm1, %v10507_v1  ;;  %v7274_v1 = vunpack.c.l.bf16 %v7371_v6 }
 0xc36   : > { %8177 = vmatprep.mubr.msk.bf16.mxu1 %vm401_vm1, %v10513_v35 }
 0xc3d   : > { %8178 = vmatmul.mubr.msk.bf16.gmra.mrb[92].mxu1 %vm401_vm1, %v10511_v13  ;;  %v7275_v13 = vunpack.c.h.bf16 %v7371_v6 }
 0xcc8   : > { %v8105_v57 = vpop.f32.mrb[48].mxu1 }
 0xcc9   : > { %v8478_v10 = vadd.f32 %v9150_v42, %v8105_v57  ;;  %v3484_v28 = vpop.f32.mrb[49].mxu1  ;;  %v7291_v57 = vunpack.c.h.bf16 %v7375_v43 }
 0xcca   : > { %v8479_v14 = vadd.f32 %v9150_v42, %v3484_v28  ;;  %v8106_v50 = vpop.f32.mrb[50].mxu1 }
 0xccb   : > { %6997 = vst.msk [vmem:[%s9932_s20 + $0x48] sm:$0xff] %vm294_vm0, %v8478_v10  ;;  %v8480_v58 = vadd.f32 %v9150_v42, %v8106_v50  ;;  %v3487_v19 = vpop.f32.mrb[51].mxu1 }
 0xccc   : > { %6995 = vst.msk [vmem:[%s9932_s20 + $0x38] sm:$0xff] %vm294_vm0, %v8479_v14  ;;  %v8481_v22 = vadd.f32 %v9150_v42, %v3487_v19  ;;  %v7376_v19 = vld [vmem:[%s11675_s5 + $0xb8] sm:$0xff]  }
 0xccd   : > { %6998 = vst.msk [vmem:[%s9932_s20 + $0x50] sm:$0xff] %vm294_vm0, %v8480_v58  ;;  %v7038_v58 = vld [vmem:[%s11675_s5 + $0xc0] sm:$0x1] }
 0xcce   : > { %6996 = vst.msk [vmem:[%s9932_s20 + $0x40] sm:$0xff] %vm294_vm0, %v8481_v22  ;;  %v4012_v22 = vunpack.c.l.bf16 %v7038_v58 }
 0xcd0   : > { %v8109_v62 = vpop.f32.mrb[52].mxu1 }
 0xcd1   : > { %v8482_v37 = vadd.f32 %v9150_v42, %v8109_v62  ;;  %v3500_v53 = vpop.f32.mrb[53].mxu1  ;;  %v7295_v62 = vunpack.c.h.bf16 %v7376_v19 }
 0xcd2   : > { %v8483_v41 = vadd.f32 %v9150_v42, %v3500_v53  ;;  %v8110_v29 = vpop.f32.mrb[54].mxu1 }
 0xcd3   : > { %7001 = vst.msk [vmem:[%s9932_s20 + $0x68] sm:$0x1] %vm1907_vm6, %v8482_v37  ;;  %v3503_v44 = vpop.f32.mrb[55].mxu1 }
 0xcd4   : > { %6999 = vst.msk [vmem:[%s9932_s20 + $0x58] sm:$0xff] %vm294_vm0, %v8483_v41  ;;  %v8484_v9 = vadd.f32 %v9150_v42, %v3503_v44  ;;  %v7374_v42 = vld [vmem:[%s11675_s5 + $0xa8] sm:$0xff]   ;;  %v7294_v44 = vunpack.c.l.bf16 %v7376_v19 }
 0xcd5   : > { %v7286_v28 = vunpack.c.l.bf16 %v7374_v42  ;;  %v7287_v50 = vunpack.c.h.bf16 %v7374_v42 }
 0xcd6   : > { %7000 = vst.msk [vmem:[%s9932_s20 + $0x60] sm:$0xff] %vm294_vm0, %v8484_v9 }
 0xce8   : > { %v8133_v2 = vpop.f32.mrb[80].mxu1 }
 0xce9   : > { %v10585_v35 = vadd.f32 %v8133_v2, %v7278_v7  ;;  %v3706_v12 = vpop.f32.mrb[81].mxu1 }
 0xcea   : > { %v8134_v45 = vpop.f32.mrb[82].mxu1  ;;  %v10590_v55 = vadd.f32 %v7274_v1, %v3706_v12 }
 0xceb   : > { %v3709_v56 = vpop.f32.mrb[83].mxu1  ;;  %v3742_v20 = vsel %vm490_vm2, %v10585_v35, -inf  ;;  %v10601_v63 = vadd.f32 %v8134_v45, %v7279_v18 }
 0xcec   : > { %v10594_v11 = vadd.f32 %v7275_v13, %v3709_v56  ;;  %3743 = vmax.xlane.f32.xlu0 %v3742_v20  ;;  %v3736_v30 = vsel %vm490_vm2, %v10590_v55, -inf }
 0xced   : > { %v3745_v33 = vsel %vm490_vm2, %v10601_v63, -inf }
 0xcee   : > { %v3739_v15 = vsel %vm490_vm2, %v10594_v11, -inf }
 0xcef   : > { %3740 = vmax.xlane.f32.xlu1 %v3739_v15 }
 0xcf0   : > { %v8137_v4 = vpop.f32.mrb[84].mxu1  ;;  %3737 = vmax.xlane.f32.xlu0 %v3736_v30 }
 0xcf1   : > { %v10605_v52 = vadd.f32 %v8137_v4, %v3635_v17  ;;  %v3722_v23 = vpop.f32.mrb[85].mxu1 }
 0xcf2   : > { %v8138_v61 = vpop.f32.mrb[86].mxu1  ;;  %v10607_v21 = vadd.f32 %v7282_v3, %v3722_v23 }
 0xcf3   : > { %v3725_v60 = vpop.f32.mrb[87].mxu1  ;;  %v3754_v16 = vsel %vm509_vm3, %v10605_v52, -inf }
 0xcf4   : > { %v10613_v34 = vadd.f32 %v7283_v49, %v3725_v60  ;;  %3755 = vmax.xlane.f32.xlu1 %v3754_v16  ;;  %3746 = vmax.xlane.f32.xlu0 %v3745_v33  ;;  %v3748_v8 = vsel %vm490_vm2, %v10607_v21, -inf }
 0xcf6   : > { %v3751_v5 = vsel %vm490_vm2, %v10613_v34, -inf }
 0xcf8   : > { %3749 = vmax.xlane.f32.xlu1 %v3748_v8  ;;  %3752 = vmax.xlane.f32.xlu0 %v3751_v5 }
 0xd08   : > { %v8175_v36 = vpop.f32.mrb[88].mxu1 }
 0xd09   : > { %3807 = vrot.lane.b32.xlu1 %v10366_v59, %s9167_s12  ;;  %v4087_v54 = vpop.f32.mrb[89].mxu1  ;;  %v10645_v10 = vadd.f32 %v8175_v36, %v7290_v38 }
 0xd0a   : > { %v8176_v51 = vpop.f32.mrb[90].mxu1  ;;  %v10655_v37 = vadd.f32 %v7286_v28, %v4087_v54 }
 0xd0b   : > { %v4090_v46 = vpop.f32.mrb[91].mxu1  ;;  %v10647_v14 = vadd.f32 %v8176_v51, %v7291_v57  ;;  %v4123_v41 = vsel %vm490_vm2, %v10645_v10, -inf }
 0xd0c   : > { %v10657_v53 = vadd.f32 %v7287_v50, %v4090_v46  ;;  %v4117_v7 = vsel %vm490_vm2, %v10655_v37, -inf }
 0xd0d   : > { %4402 = vrot.lane.b32.xlu1 %v10337_v40, %s9168_s23  ;;  %v4126_v29 = vsel %vm490_vm2, %v10647_v14, -inf }
 0xd0e   : > { %3809 = vrot.lane.b32.xlu0 %v10441_v31, %s9167_s12  ;;  %v4120_v6 = vsel %vm490_vm2, %v10657_v53, -inf }
 0xd10   : > { %v8179_v48 = vpop.f32.mrb[92].mxu1 }
 0xd11   : > { %4406 = vrot.lane.b32.xlu1 %v10366_v59, %s9168_s23  ;;  %v4103_v39 = vpop.f32.mrb[93].mxu1  ;;  %v10663_v9 = vadd.f32 %v8179_v48, %v4012_v22 }
 0xd12   : > { %4404 = vrot.lane.b32.xlu0 %v10333_v0, %s9168_s23  ;;  %v8180_v24 = vpop.f32.mrb[94].mxu1  ;;  %v10671_v1 = vadd.f32 %v7294_v44, %v4103_v39 }
 0xd13   : > { %v4106_v25 = vpop.f32.mrb[95].mxu1  ;;  %v4135_v2 = vsel %vm509_vm3, %v10663_v9, -inf }
 0xd14   : > { %v10665_v47 = vadd.f32 %v7295_v62, %v4106_v25  ;;  %v4129_v12 = vsel %vm490_vm2, %v10671_v1, -inf }
 0xd15   : > { %4394 = vrot.lane.b32.xlu1 %v10337_v40, %s9169_s24 }
 0xd16   : > { %4408 = vrot.lane.b32.xlu0 %v10441_v31, %s9168_s23  ;;  %v4132_v13 = vsel %vm490_vm2, %v10665_v47, -inf }
 0xd19   : > { %4398 = vrot.lane.b32.xlu1 %v10366_v59, %s9169_s24 }
 0xd1a   : > { %4396 = vrot.lane.b32.xlu0 %v10333_v0, %s9169_s24 }
 0xd1e   : > { %4400 = vrot.lane.b32.xlu0 %v10441_v31, %s9169_s24 }
 0xd3d   : > { %4124 = vmax.xlane.f32.xlu1 %v4123_v41  ;;  %4127 = vmax.xlane.f32.xlu0 %v4126_v29 }
 0xd41   : > { %4121 = vmax.xlane.f32.xlu0 %v4120_v6  ;;  %4118 = vmax.xlane.f32.xlu1 %v4117_v7 }
 0xd45   : > { %4136 = vmax.xlane.f32.xlu1 %v4135_v2  ;;  %4133 = vmax.xlane.f32.xlu0 %v4132_v13  ;;  %v3911_v2 = vld [vmem:[%s11673_s3] sm:$0xf] }
 0xd46   : > { %v3925_v13 = vsel %vm683_vm5, %v3911_v2, 0 }
 0xd49   : > { %4130 = vmax.xlane.f32.xlu1 %v4129_v12 }
 0xd79   : > { %v3744_v45 = vpop.xlane.xlu0 %3743 }
 0xd7a   : > { %v3759_v26 = vsub.f32 %v10585_v35, %v3744_v45 }
 0xd7c   : > { %v3768_v18 = vmul.f32 1.442695, %v3759_v26  ;;  %v3741_v56 = vpop.xlane.xlu1 %3740 }
 0xd7d   : > { %v3758_v20 = vsub.f32 %v10594_v11, %v3741_v56  ;;  %v3738_v32 = vpop.xlane.xlu0 %3737 }
 0xd7e   : > { %8922 = vpow2.f32 %v3768_v18  ;;  %v3757_v17 = vsub.f32 %v10590_v55, %v3738_v32 }
 0xd7f   : > { %v3766_v15 = vmul.f32 1.442695, %v3758_v20 }
 0xd80   : > { %v3764_v30 = vmul.f32 1.442695, %v3757_v17 }
 0xd81   : > { %8924 = vpow2.f32 %v3766_v15  ;;  %v3756_v3 = vpop.xlane.xlu1 %3755  ;;  %v3747_v4 = vpop.xlane.xlu0 %3746 }
 0xd82   : > { %8926 = vpow2.f32 %v3764_v30  ;;  %v3763_v49 = vsub.f32 %v10605_v52, %v3756_v3  ;;  %v3760_v23 = vsub.f32 %v10601_v63, %v3747_v4 }
 0xd84   : > { %v3776_v61 = vmul.f32 1.442695, %v3763_v49  ;;  %v3770_v35 = vmul.f32 1.442695, %v3760_v23 }
 0xd85   : > { %v3750_v60 = vpop.xlane.xlu1 %3749  ;;  %v3753_v16 = vpop.xlane.xlu0 %3752 }
 0xd86   : > { %8928 = vpow2.f32 %v3776_v61  ;;  %v3761_v11 = vsub.f32 %v10607_v21, %v3750_v60  ;;  %v3762_v33 = vsub.f32 %v10613_v34, %v3753_v16 }
 0xd87   : > { %8930 = vpow2.f32 %v3770_v35 }
 0xd88   : > { %v8923_v55 = vpop.eup %8922  ;;  %v3772_v5 = vmul.f32 1.442695, %v3761_v11  ;;  %v3774_v8 = vmul.f32 1.442695, %v3762_v33 }
 0xd89   : > { %v3808_v36 = vpop.permute.xlu1 %3807  ;;  %v3810_v54 = vpop.permute.xlu0 %3809  ;;  %v3784_v51 = vsel %vm490_vm2, %v8923_v55, 0.0 }
 0xd8a   : > { %8932 = vpow2.f32 %v3772_v5  ;;  %v3827_v63 = vand.u32 %v3810_v54, %v9428_v27  ;;  %8143 = vmatprep.subr.bf16.mxu0 %v3808_v36  ;;  %3785 = vadd.xlane.f32.xlu0 %v3784_v51 }
 0xd8b   : > { %v8925_v52 = vpop.eup %8924  ;;  %8934 = vpow2.f32 %v3774_v8  ;;  %8144 = vmatpush3.bf16.msra.mxu0 %v3808_v36 }
 0xd8c   : > { %v8927_v46 = vpop.eup %8926  ;;  %8145 = vmatprep.subr.bf16.mxu0 %v3827_v63  ;;  %v3781_v21 = vsel %vm490_vm2, %v8925_v52, 0.0 }
 0xd8d   : > { %v4403_v34 = vpop.permute.xlu1 %4402  ;;  %v3778_v48 = vsel %vm490_vm2, %v8927_v46, 0.0  ;;  %v3799_v39 = vpack.c.bf16 %v8925_v52, %v8927_v46  ;;  %v4405_v43 = vpop.permute.xlu0 %4404 }
 0xd8e   : > { %8645 = vmatprep.subr.msk.bf16.mxu1 %vm401_vm1, %v4403_v34  ;;  %3782 = vadd.xlane.f32.xlu0 %v3781_v21  ;;  %v4423_v24 = vsel %vm401_vm1, %v4403_v34, 0  ;;  %v4426_v29 = vsel %vm401_vm1, %v4405_v43, 0 }
 0xd8f   : > { %3779 = vadd.xlane.f32.xlu1 %v3778_v48  ;;  %8146 = vmatpush3.bf16.msra.mxu0 %v3827_v63 }
 0xd90   : > { %v8929_v25 = vpop.eup %8928  ;;  %8147 = vmatprep.mubr.msk.bf16.mxu0 %vm490_vm2, %v3799_v39  ;;  %8208 = vmatpush3.bf16.xpose.msra.mxu1 %v4423_v24 }
 0xd91   : > { %v8931_v38 = vpop.eup %8930  ;;  %8646 = vmatprep.subr.msk.bf16.mxu1 %vm401_vm1, %v4405_v43  ;;  %v4407_v57 = vpop.permute.xlu1 %4406  ;;  %v3796_v42 = vsel %vm509_vm3, %v8929_v25, 0.0  ;;  %v3802_v44 = vpack.c.bf16 %v8929_v25, %v8929_v25  ;;  %8639 = vmatprep.subr.msk.bf16.mxu0 %vm683_vm5, %v3911_v2 }
 0xd92   : > { %v3800_v28 = vpack.c.bf16 %v8931_v38, %v8923_v55  ;;  %3797 = vadd.xlane.f32.xlu0 %v3796_v42  ;;  %v3787_v50 = vsel %vm490_vm2, %v8931_v38, 0.0  ;;  %v4429_v6 = vsel %vm401_vm1, %v4407_v57, 0  ;;  %v4409_v7 = vpop.permute.xlu0 %4408 }
 0xd93   : > { %3788 = vadd.xlane.f32.xlu1 %v3787_v50  ;;  %v4432_v12 = vsel %vm401_vm1, %v4409_v7, 0 }
 0xd94   : > { %v8933_v58 = vpop.eup %8932  ;;  %8148 = vmatmul.mubr.msk.bf16.vlgmr.msra.gmra.mrb[88].mxu0 %vm490_vm2, %v3800_v28 }
 0xd95   : > { %v8935_v19 = vpop.eup %8934  ;;  %v4395_v22 = vpop.permute.xlu1 %4394  ;;  %v3790_v62 = vsel %vm490_vm2, %v8933_v58, 0.0  ;;  %8156 = vmatpush3.bf16.msra.mxu0 %v3925_v13 }
 0xd96   : > { %8215 = vmatprep.mubr.msk.bf16.mxu1 %vm401_vm1, %v4395_v22  ;;  %3791 = vadd.xlane.f32.xlu0 %v3790_v62  ;;  %v3801_v41 = vpack.c.bf16 %v8935_v19, %v8933_v58  ;;  %v4397_v45 = vpop.permute.xlu0 %4396  ;;  %v3793_v56 = vsel %vm490_vm2, %v8935_v19, 0.0 }
 0xd98   : > { %8151 = vmatprep.mubr.msk.bf16.mxu0 %vm490_vm2, %v3801_v41  ;;  %8210 = vmatpush3.bf16.xpose.msra.mxu1 %v4426_v29 }
 0xd99   : > { %8647 = vmatprep.subr.msk.bf16.mxu1 %vm401_vm1, %v4407_v57  ;;  %v4399_v26 = vpop.permute.xlu1 %4398 }
 0xd9a   : > { %v4401_v18 = vpop.permute.xlu0 %4400 }
 0xd9c   : > { %8152 = vmatmul.mubr.msk.bf16.gmra.mrb[92].mxu0 %vm490_vm2, %v3802_v44 }
 0xda0   : > { %8212 = vmatpush3.bf16.xpose.msra.mxu1 %v4429_v6 }
 0xda1   : > { %8648 = vmatprep.subr.msk.bf16.mxu1 %vm401_vm1, %v4409_v7 }
 0xda4   : > { %4186 = vrot.lane.b32.xlu1 %v10333_v0, %s9171_s15 }
 0xda8   : > { %8214 = vmatpush3.bf16.xpose.msra.mxu1 %v4432_v12 }
 0xdac   : > { %4184 = vrot.lane.b32.xlu0 %v10337_v40, %s9171_s15 }
 0xdaf   : > { %8216 = vmatmul.mubr.msk.bf16.vlgmr.msra.gmra.mrb[96].mxu1 %vm401_vm1, %v4397_v45 }
 0xdb0   : > { %8219 = vmatprep.mubr.msk.bf16.mxu1 %vm401_vm1, %v4399_v26  ;;  %4190 = vrot.lane.b32.xlu0 %v10441_v31, %s9171_s15 }
 0xdb4   : > { %4785 = vrot.lane.b32.xlu0 %v10333_v0, %s9172_s18 }
 0xdb7   : > { %8220 = vmatmul.mubr.msk.bf16.gmra.mrb[100].mxu1 %vm401_vm1, %v4401_v18 }
 0xdb8   : > { %4789 = vrot.lane.b32.xlu0 %v10441_v31, %s9172_s18 }
 0xdbc   : > { %4777 = vrot.lane.b32.xlu0 %v10333_v0, %s9173_s19 }
 0xdc0   : > { %4781 = vrot.lane.b32.xlu0 %v10441_v31, %s9173_s19 }
 0xdc8   : > { %3794 = vadd.xlane.f32.xlu1 %v3793_v56 }
 0xdca   : > { %v4128_v20 = vpop.xlane.xlu0 %4127  ;;  %v4125_v23 = vpop.xlane.xlu1 %4124 }
 0xdcb   : > { %v4140_v38 = vsub.f32 %v10645_v10, %v4125_v23  ;;  %v4141_v57 = vsub.f32 %v10647_v14, %v4128_v20 }
 0xdcd   : > { %v4149_v29 = vmul.f32 1.442695, %v4140_v38  ;;  %v4151_v6 = vmul.f32 1.442695, %v4141_v57 }
 0xdce   : > { %v4122_v32 = vpop.xlane.xlu0 %4121  ;;  %v4119_v61 = vpop.xlane.xlu1 %4118 }
 0xdcf   : > { %v4138_v63 = vsub.f32 %v10655_v37, %v4119_v61  ;;  %v4139_v46 = vsub.f32 %v10657_v53, %v4122_v32 }
 0xdd1   : > { %v4145_v21 = vmul.f32 1.442695, %v4138_v63  ;;  %v4147_v48 = vmul.f32 1.442695, %v4139_v46 }
 0xdd2   : > { %v10739_v17 = vpop.xlane.xlu0 %4133  ;;  %v10744_v35 = vpop.xlane.xlu1 %4136 }
 0xdd3   : > { %v4143_v10 = vsub.f32 %v10665_v47, %v10739_v17  ;;  %v4144_v18 = vsub.f32 %v10663_v9, %v10744_v35 }
 0xdd5   : > { %v4155_v45 = vmul.f32 1.442695, %v4143_v10  ;;  %v4157_v23 = vmul.f32 1.442695, %v4144_v18  ;;  %v7098_v10 = vld [vmem:[%s9240_s30 + $0xb8] sm:$0xff] }
 0xdd6   : > { %v4131_v60 = vpop.xlane.xlu1 %4130 }
 0xdd7   : > { %v4142_v50 = vsub.f32 %v10671_v1, %v4131_v60 }
 0xdd9   : > { %4188 = vrot.lane.b32.xlu1 %v10366_v59, %s9171_s15  ;;  %v4153_v2 = vmul.f32 1.442695, %v4142_v50 }
 0xddd   : > { %4783 = vrot.lane.b32.xlu1 %v10337_v40, %s9172_s18 }
 0xde1   : > { %4787 = vrot.lane.b32.xlu1 %v10366_v59, %s9172_s18 }
 0xde5   : > { %4775 = vrot.lane.b32.xlu1 %v10337_v40, %s9173_s19 }
 0xde9   : > { %4779 = vrot.lane.b32.xlu1 %v10366_v59, %s9173_s19 }
 0xe17   : > { %v3786_v15 = vpop.xlane.xlu0 %3785 }
 0xe18   : > { %8936 = vrcp.f32 %v3786_v15 }
 0xe1b   : > { %v3783_v30 = vpop.xlane.xlu0 %3782 }
 0xe1c   : > { %v3780_v16 = vpop.xlane.xlu1 %3779  ;;  %8938 = vrcp.f32 %v3783_v30 }
 0xe1f   : > { %v3798_v3 = vpop.xlane.xlu0 %3797 }
 0xe20   : > { %v3789_v11 = vpop.xlane.xlu1 %3788 }
 0xe21   : > { %8940 = vrcp.f32 %v3789_v11 }
 0xe22   : > { %8942 = vrcp.f32 %v3780_v16  ;;  %v8937_v24 = vpop.eup %8936  ;;  %v9151_v16 = vld [vmem:[%s11671_s1] sm:$0xff]  }
 0xe23   : > { %v3792_v4 = vpop.xlane.xlu0 %3791  ;;  %8944 = vrcp.f32 %v3798_v3 }
 0xe24   : > { %v10746_v33 = vpop.permute.xlu1 %4186  ;;  %8946 = vrcp.f32 %v3792_v4 }
 0xe26   : > { %v8939_v43 = vpop.eup %8938 }
 0xe27   : > { %v10741_v49 = vpop.permute.xlu0 %4184 }
 0xe28   : > { %8181 = vmatprep.subr.bf16.mxu0 %v10741_v49 }
 0xe2b   : > { %v10748_v5 = vpop.permute.xlu0 %4190  ;;  %v8941_v53 = vpop.eup %8940 }
 0xe2c   : > { %v8943_v28 = vpop.eup %8942  ;;  %v4208_v60 = vand.u32 %v10748_v5, %v9428_v27 }
 0xe2d   : > { %v8945_v1 = vpop.eup %8944 }
 0xe2e   : > { %v8947_v47 = vpop.eup %8946 }
 0xe2f   : > { %v4786_v51 = vpop.permute.xlu0 %4785 }
 0xe30   : > { %v4807_v39 = vsel %vm401_vm1, %v4786_v51, 0 }
 0xe33   : > { %v4790_v13 = vpop.permute.xlu0 %4789 }
 0xe37   : > { %v4778_v5 = vpop.permute.xlu0 %4777 }
 0xe55   : > { %v3795_v55 = vpop.xlane.xlu1 %3794 }
 0xe56   : > { %8948 = vrcp.f32 %v3795_v55 }
 0xe57   : > { %8950 = vpow2.f32 %v4145_v21  ;;  %v9152_v21 = vld [vmem:[%s11671_s1 + $0x8] sm:$0xff]  }
 0xe58   : > { %8952 = vpow2.f32 %v4147_v48  ;;  %v7097_v48 = vld [vmem:[%s9240_s30 + $0xb0] sm:$0xff] }
 0xe59   : > { %v10750_v8 = vpop.permute.xlu1 %4188  ;;  %8954 = vpow2.f32 %v4149_v29  ;;  %v7057_v29 = vld [vmem:[%s11675_s5 + $0x130] sm:$0x1] }
 0xe5a   : > { %8956 = vpow2.f32 %v4151_v6 }
 0xe5b   : > { %8958 = vpow2.f32 %v4153_v2 }
 0xe5c   : > { %8960 = vpow2.f32 %v4155_v45 }
 0xe5d   : > { %v4784_v36 = vpop.permute.xlu1 %4783  ;;  %8962 = vpow2.f32 %v4157_v23 }
 0xe5e   : > { %8650 = vmatprep.subr.msk.bf16.mxu1 %vm401_vm1, %v4784_v36  ;;  %v4804_v54 = vsel %vm401_vm1, %v4784_v36, 0  ;;  %v7377_v36 = vld [vmem:[%s11675_s5 + $0x118] sm:$0xff]  }
 0xe5f   : > { %8250 = vmatpush3.bf16.xpose.msra.mxu1 %v4804_v54  ;;  %v7298_v46 = vunpack.c.l.bf16 %v7377_v36 }
 0xe60   : > { %8651 = vmatprep.subr.msk.bf16.mxu1 %vm401_vm1, %v4786_v51  ;;  %v8949_v20 = vpop.eup %8948 }
 0xe61   : > { %v4788_v52 = vpop.permute.xlu1 %4787  ;;  %v10773_v15 = vpop.eup %8950 }
 0xe62   : > { %v4810_v14 = vsel %vm401_vm1, %v4788_v52, 0  ;;  %v10775_v4 = vpop.eup %8952 }
 0xe63   : > { %v4180_v35 = vpack.c.bf16 %v10775_v4, %v10773_v15  ;;  %v10791_v11 = vpop.eup %8954 }
 0xe65   : > { %v4776_v34 = vpop.permute.xlu1 %4775 }
 0xe66   : > { %8257 = vmatprep.mubr.msk.bf16.mxu1 %vm401_vm1, %v4776_v34  ;;  %v7096_v34 = vld [vmem:[%s9240_s30 + $0xa8] sm:$0xff] }
 0xe67   : > { %v8149_v25 = vpop.f32.mrb[88].mxu0  ;;  %8252 = vmatpush3.bf16.xpose.msra.mxu1 %v4807_v39 }
 0xe68   : > { %v3863_v37 = vpop.f32.mrb[89].mxu0  ;;  %8652 = vmatprep.subr.msk.bf16.mxu1 %vm401_vm1, %v4788_v52  ;;  %v3902_v58 = vmul.f32 %v8937_v24, %v8149_v25  ;;  %v7378_v52 = vld [vmem:[%s11675_s5 + $0x120] sm:$0xff]   ;;  %v7299_v25 = vunpack.c.h.bf16 %v7377_v36  ;;  %v7102_v36 = vld [vmem:[%s9240_s30 + $0xd8] sm:$0x1] }
 0xe69   : > { %v8150_v42 = vpop.f32.mrb[90].mxu0  ;;  %v3900_v62 = vmul.f32 %v8943_v28, %v3863_v37  ;;  %v4780_v51 = vpop.permute.xlu1 %4779  ;;  %v7302_v39 = vunpack.c.l.bf16 %v7378_v52  ;;  %v5157_v37 = vpack.c.bf16 %v7097_v48, %v7096_v34  ;;  %v7303_v57 = vunpack.c.h.bf16 %v7378_v52 }
 0xe6a   : > { %v3903_v19 = vmul.f32 %v8941_v53, %v8150_v42  ;;  %v3866_v22 = vpop.f32.mrb[91].mxu0  ;;  %v4782_v28 = vpop.permute.xlu0 %4781 }
 0xe6b   : > { %v3901_v41 = vmul.f32 %v8939_v43, %v3866_v22 }
 0xe6c   : > { %v3908_v44 = vpack.c.bf16 %v3903_v19, %v3902_v58  ;;  %v7379_v58 = vld [vmem:[%s11675_s5 + $0x128] sm:$0xff]  }
 0xe6d   : > { %v3907_v7 = vpack.c.bf16 %v3901_v41, %v3900_v62  ;;  %v7306_v2 = vunpack.c.l.bf16 %v7379_v58 }
 0xe6f   : > { %v8153_v12 = vpop.f32.mrb[92].mxu0  ;;  %8157 = vmatprep.mubr.msk.bf16.mxu0 %vm401_vm1, %v3907_v7  ;;  %8254 = vmatpush3.bf16.xpose.msra.mxu1 %v4810_v14  ;;  %v4393_v14 = vunpack.c.l.bf16 %v7057_v29 }
 0xe70   : > { %v3879_v26 = vpop.f32.mrb[93].mxu0  ;;  %8158 = vmatmul.mubr.msk.bf16.vlgmr.msra.gmra.mrb[96].mxu0 %vm401_vm1, %v3908_v44  ;;  %8653 = vmatprep.subr.msk.bf16.mxu1 %vm401_vm1, %v4790_v13  ;;  %v3906_v32 = vmul.f32 %v8945_v1, %v8153_v12  ;;  %v7099_v44 = vld [vmem:[%s9240_s30 + $0xc0] sm:$0xff]  ;;  %v7307_v1 = vunpack.c.h.bf16 %v7379_v58 }
 0xe71   : > { %8182 = vmatpush3.bf16.msra.mxu0 %v10741_v49  ;;  %v8154_v56 = vpop.f32.mrb[94].mxu0  ;;  %v3904_v30 = vmul.f32 %v8947_v47, %v3879_v26  ;;  %v4813_v49 = vsel %vm401_vm1, %v4790_v13, 0  ;;  %v5158_v45 = vpack.c.bf16 %v7099_v44, %v7098_v10 }
 0xe72   : > { %8183 = vmatprep.subr.bf16.mxu0 %v10746_v33  ;;  %v3882_v17 = vpop.f32.mrb[95].mxu0  ;;  %v3910_v9 = vpack.c.bf16 %v3906_v32, %v3906_v32 }
 0xe73   : > { %v3905_v3 = vmul.f32 %v8949_v20, %v3882_v17 }
 0xe75   : > { %v3909_v61 = vpack.c.bf16 %v3905_v3, %v3904_v30  ;;  %8184 = vmatpush3.bf16.msra.mxu0 %v10746_v33  ;;  %v10793_v33 = vpop.eup %8956 }
 0xe76   : > { %8185 = vmatprep.subr.bf16.mxu0 %v10750_v8  ;;  %v10795_v55 = vpop.eup %8958 }
 0xe77   : > { %8161 = vmatprep.mubr.msk.bf16.mxu0 %vm401_vm1, %v3909_v61  ;;  %8256 = vmatpush3.bf16.xpose.msra.mxu1 %v4813_v49  ;;  %v10800_v54 = vpop.eup %8960  ;;  %v4165_v61 = vsel %vm490_vm2, %v10791_v11, 0.0  ;;  %v4162_v49 = vsel %vm490_vm2, %v10775_v4, 0.0  ;;  %v5160_v4 = vpack.c.bf16 %v7102_v36, %v7102_v36 }
 0xe78   : > { %8162 = vmatmul.mubr.msk.bf16.gmra.mrb[100].mxu0 %vm401_vm1, %v3910_v9  ;;  %8291 = vmatprep.subr.bf16.mxu1 %v9151_v16  ;;  %v4182_v63 = vpack.c.bf16 %v10800_v54, %v10795_v55  ;;  %v8963_v43 = vpop.eup %8962  ;;  %v4159_v9 = vsel %vm490_vm2, %v10773_v15, 0.0  ;;  %v7100_v15 = vld [vmem:[%s9240_s30 + $0xc8] sm:$0xff] }
 0xe79   : > { %8186 = vmatpush3.bf16.msra.mxu0 %v10750_v8  ;;  %8189 = vmatprep.mubr.msk.bf16.mxu0 %vm490_vm2, %v4180_v35  ;;  %v4181_v8 = vpack.c.bf16 %v10793_v33, %v10791_v11  ;;  %v4183_v41 = vpack.c.bf16 %v8963_v43, %v8963_v43  ;;  %v4168_v35 = vsel %vm490_vm2, %v10793_v33, 0.0  ;;  %v7101_v11 = vld [vmem:[%s9240_s30 + $0xd0] sm:$0xff]  ;;  %v4292_v33 = vld [vmem:[%s11673_s3 + $0x4] sm:$0xf] }
 0xe7a   : > { %8187 = vmatprep.subr.bf16.mxu0 %v4208_v60 }
 0xe7d   : > { %8188 = vmatpush3.bf16.msra.mxu0 %v4208_v60  ;;  %v4177_v60 = vsel %vm509_vm3, %v8963_v43, 0.0 }
 0xe7e   : > { %8258 = vmatmul.mubr.msk.bf16.vlgmr.msra.gmra.mrb[104].mxu1 %vm401_vm1, %v4778_v5  ;;  %v5159_v5 = vpack.c.bf16 %v7101_v11, %v7100_v15  ;;  %8644 = vmatprep.subr.msk.bf16.mxu0 %vm683_vm5, %v4292_v33 }
 0xe7f   : > { %8261 = vmatprep.mubr.msk.bf16.mxu1 %vm401_vm1, %v4780_v51  ;;  %8292 = vmatpush3.bf16.msra.mxu1 %v9151_v16  ;;  %v4171_v16 = vsel %vm490_vm2, %v10795_v55, 0.0  ;;  %v4174_v55 = vsel %vm490_vm2, %v10800_v54, 0.0 }
 0xe80   : > { %8190 = vmatmul.mubr.msk.bf16.vlgmr.msra.gmra.mrb[104].mxu0 %vm490_vm2, %v4181_v8  ;;  %8293 = vmatprep.subr.bf16.mxu1 %v9152_v21  ;;  %v4306_v8 = vsel %vm683_vm5, %v4292_v33, 0 }
 0xe81   : > { %8193 = vmatprep.mubr.msk.bf16.mxu0 %vm490_vm2, %v4182_v63  ;;  %8198 = vmatpush3.bf16.msra.mxu0 %v4306_v8 }
 0xe82   : > { %v8217_v24 = vpop.f32.mrb[96].mxu1 }
 0xe83   : > { %v4468_v38 = vpop.f32.mrb[97].mxu1  ;;  %8294 = vmatpush3.bf16.msra.mxu1 %v9152_v21  ;;  %v10823_v19 = vadd.f32 %v8217_v24, %v7302_v39 }
 0xe84   : > { %v10818_v53 = vadd.f32 %v7298_v46, %v4468_v38  ;;  %v8218_v42 = vpop.f32.mrb[98].mxu1 }
 0xe85   : > { %v4471_v50 = vpop.f32.mrb[99].mxu1  ;;  %v10836_v6 = vadd.f32 %v8218_v42, %v7303_v57  ;;  %v4504_v12 = vsel %vm490_vm2, %v10823_v19, -inf  ;;  %v7380_v57 = vld [vmem:[%s11675_s5 + $0x188] sm:$0xff]   ;;  %v7381_v42 = vld [vmem:[%s11675_s5 + $0x190] sm:$0xff]  }
 0xe86   : > { %v10825_v22 = vadd.f32 %v7299_v25, %v4471_v50  ;;  %8262 = vmatmul.mubr.msk.bf16.gmra.mrb[108].mxu1 %vm401_vm1, %v4782_v28  ;;  %v4498_v62 = vsel %vm490_vm2, %v10818_v53, -inf  ;;  %v7310_v28 = vunpack.c.l.bf16 %v7380_v57  ;;  %v7314_v50 = vunpack.c.l.bf16 %v7381_v42 }
 0xe87   : > { %4499 = vmax.xlane.f32.xlu1 %v4498_v62  ;;  %8295 = vmatprep.mubr.msk.bf16.mxu1 %vm294_vm0, %v5157_v37  ;;  %v4507_v56 = vsel %vm490_vm2, %v10836_v6, -inf  ;;  %v7311_v62 = vunpack.c.h.bf16 %v7380_v57 }
 0xe88   : > { %8194 = vmatmul.mubr.msk.bf16.gmra.mrb[108].mxu0 %vm490_vm2, %v4183_v41  ;;  %v4501_v7 = vsel %vm490_vm2, %v10825_v22, -inf }
 0xe89   : > { %4502 = vmax.xlane.f32.xlu0 %v4501_v7  ;;  %v7315_v7 = vunpack.c.h.bf16 %v7381_v42 }
 0xe8a   : > { %v8221_v13 = vpop.f32.mrb[100].mxu1 }
 0xe8b   : > { %4505 = vmax.xlane.f32.xlu1 %v4504_v12  ;;  %v4484_v26 = vpop.f32.mrb[101].mxu1  ;;  %v10847_v32 = vadd.f32 %v8221_v13, %v4393_v14 }
 0xe8c   : > { %v10843_v47 = vadd.f32 %v7306_v2, %v4484_v26  ;;  %v8222_v18 = vpop.f32.mrb[102].mxu1 }
 0xe8d   : > { %4508 = vmax.xlane.f32.xlu0 %v4507_v56  ;;  %v4487_v20 = vpop.f32.mrb[103].mxu1  ;;  %v4516_v23 = vsel %vm509_vm3, %v10847_v32, -inf }
 0xe8e   : > { %v10849_v17 = vadd.f32 %v7307_v1, %v4487_v20  ;;  %v4510_v30 = vsel %vm490_vm2, %v10843_v47, -inf  ;;  %8296 = vmatmul.mubr.msk.bf16.vlgmr.msra.gmra.mrb[112].mxu1 %vm294_vm0, %v5158_v45 }
 0xe8f   : > { %4511 = vmax.xlane.f32.xlu1 %v4510_v30  ;;  %8299 = vmatprep.mubr.msk.bf16.mxu1 %vm294_vm0, %v5159_v5 }
 0xe90   : > { %v4513_v3 = vsel %vm490_vm2, %v10849_v17, -inf }
 0xe91   : > { %4514 = vmax.xlane.f32.xlu0 %v4513_v3 }
 0xe93   : > { %4517 = vmax.xlane.f32.xlu1 %v4516_v23 }
 0xe95   : > { %4166 = vadd.xlane.f32.xlu0 %v4165_v61 }
 0xe96   : > { %8300 = vmatmul.mubr.msk.bf16.gmra.mrb[116].mxu1 %vm294_vm0, %v5160_v4 }
 0xe97   : > { %4160 = vadd.xlane.f32.xlu1 %v4159_v9 }
 0xe99   : > { %4163 = vadd.xlane.f32.xlu0 %v4162_v49 }
 0xe9b   : > { %4169 = vadd.xlane.f32.xlu1 %v4168_v35 }
 0xe9d   : > { %4178 = vadd.xlane.f32.xlu0 %v4177_v60 }
 0xea1   : > { %4172 = vadd.xlane.f32.xlu0 %v4171_v16 }
 0xeac   : > { %4567 = vrot.lane.b32.xlu1 %v10333_v0, %s9174_s14 }
 0xeb7   : > { %4565 = vrot.lane.b32.xlu0 %v10337_v40, %s9174_s14 }
 0xebb   : > { %4571 = vrot.lane.b32.xlu0 %v10441_v31, %s9174_s14 }
 0xed0   : > { %4175 = vadd.xlane.f32.xlu1 %v4174_v55 }
 0xee1   : > { %4569 = vrot.lane.b32.xlu1 %v10366_v59, %s9174_s14 }
 0xf14   : > { %v10893_v34 = vpop.xlane.xlu1 %4499 }
 0xf15   : > { %v4519_v4 = vsub.f32 %v10818_v53, %v10893_v34 }
 0xf16   : > { %v4503_v51 = vpop.xlane.xlu0 %4502 }
 0xf17   : > { %v4520_v60 = vsub.f32 %v10825_v22, %v4503_v51 }
 0xf18   : > { %v10895_v24 = vpop.xlane.xlu1 %4505 }
 0xf19   : > { %v4528_v51 = vmul.f32 1.442695, %v4520_v60 }
 0xf1a   : > { %v10889_v63 = vpop.xlane.xlu0 %4508 }
 0xf1b   : > { %v4522_v57 = vsub.f32 %v10836_v6, %v10889_v63  ;;  %v10945_v6 = vld [vmem:[%s11672_s2] ss:$0 sm:$0xff] }
 0xf1c   : > { %v10897_v54 = vpop.xlane.xlu1 %4511 }
 0xf1e   : > { %v10891_v52 = vpop.xlane.xlu0 %4514 }
 0xf20   : > { %v10899_v43 = vpop.xlane.xlu1 %4517 }
 0xf22   : > { %v4167_v46 = vpop.xlane.xlu0 %4166 }
 0xf23   : > { %8964 = vrcp.f32 %v4167_v46 }
 0xf24   : > { %v4161_v38 = vpop.xlane.xlu1 %4160 }
 0xf25   : > { %8966 = vrcp.f32 %v4161_v38  ;;  %v4526_v38 = vmul.f32 1.442695, %v4519_v4 }
 0xf26   : > { %v4164_v21 = vpop.xlane.xlu0 %4163 }
 0xf28   : > { %v4170_v37 = vpop.xlane.xlu1 %4169 }
 0xf29   : > { %8968 = vrcp.f32 %v4170_v37 }
 0xf2a   : > { %v4179_v48 = vpop.xlane.xlu0 %4178  ;;  %8970 = vrcp.f32 %v4164_v21 }
 0xf2b   : > { %8972 = vrcp.f32 %v4179_v48  ;;  %v4524_v48 = vsub.f32 %v10849_v17, %v10891_v52  ;;  %v4532_v52 = vmul.f32 1.442695, %v4522_v57 }
 0xf2c   : > { %v4568_v15 = vpop.permute.xlu1 %4567 }
 0xf2d   : > { %v8965_v29 = vpop.eup %8964 }
 0xf2e   : > { %v4173_v39 = vpop.xlane.xlu0 %4172 }
 0xf2f   : > { %v8967_v14 = vpop.eup %8966  ;;  %8974 = vrcp.f32 %v4173_v39 }
 0xf32   : > { %v4566_v25 = vpop.permute.xlu0 %4565 }
 0xf33   : > { %8223 = vmatprep.subr.bf16.mxu0 %v4566_v25  ;;  %v8969_v1 = vpop.eup %8968 }
 0xf34   : > { %v8971_v20 = vpop.eup %8970 }
 0xf36   : > { %v4572_v42 = vpop.permute.xlu0 %4571 }
 0xf51   : > { %v8259_v58 = vpop.f32.mrb[104].mxu1 }
 0xf52   : > { %v4849_v41 = vpop.f32.mrb[105].mxu1  ;;  %v10909_v45 = vadd.f32 %v8259_v58, %v7314_v50  ;;  %v4523_v50 = vsub.f32 %v10843_v47, %v10897_v54 }
 0xf53   : > { %v10907_v10 = vadd.f32 %v7310_v28, %v4849_v41  ;;  %v8191_v44 = vpop.f32.mrb[104].mxu0  ;;  %v8260_v2 = vpop.f32.mrb[106].mxu1  ;;  %v4521_v28 = vsub.f32 %v10823_v19, %v10895_v24  ;;  %v4536_v24 = vmul.f32 1.442695, %v4524_v48 }
 0xf54   : > { %v4244_v13 = vpop.f32.mrb[105].mxu0  ;;  %v4852_v12 = vpop.f32.mrb[107].mxu1  ;;  %v4283_v30 = vmul.f32 %v8965_v29, %v8191_v44  ;;  %v10915_v61 = vadd.f32 %v8260_v2, %v7315_v7  ;;  %v4885_v36 = vsel %vm490_vm2, %v10909_v45, -inf  ;;  %v4534_v7 = vmul.f32 1.442695, %v4523_v50 }
 0xf55   : > { %v10911_v26 = vadd.f32 %v7311_v62, %v4852_v12  ;;  %v8192_v18 = vpop.f32.mrb[106].mxu0  ;;  %v4879_v56 = vsel %vm490_vm2, %v10907_v10, -inf  ;;  %v4281_v9 = vmul.f32 %v8967_v14, %v4244_v13  ;;  %v4589_v62 = vand.u32 %v4572_v42, %v9428_v27  ;;  %v8973_v44 = vpop.eup %8972 }
 0xf56   : > { %v4284_v3 = vmul.f32 %v8969_v1, %v8192_v18  ;;  %v4247_v23 = vpop.f32.mrb[107].mxu0  ;;  %4880 = vmax.xlane.f32.xlu1 %v4879_v56  ;;  %v4888_v22 = vsel %vm490_vm2, %v10915_v61, -inf  ;;  %v4530_v47 = vmul.f32 1.442695, %v4521_v28  ;;  %v8975_v14 = vpop.eup %8974  ;;  %v4525_v13 = vsub.f32 %v10847_v32, %v10899_v43 }
 0xf57   : > { %v4282_v49 = vmul.f32 %v8971_v20, %v4247_v23  ;;  %v4882_v35 = vsel %vm490_vm2, %v10911_v26, -inf }
 0xf58   : > { %v4289_v16 = vpack.c.bf16 %v4284_v3, %v4283_v30  ;;  %4883 = vmax.xlane.f32.xlu0 %v4882_v35  ;;  %v4673_v3 = vld [vmem:[%s11673_s3 + $0x8] sm:$0xf]  ;;  %v4538_v23 = vmul.f32 1.442695, %v4525_v13 }
 0xf59   : > { %v4288_v11 = vpack.c.bf16 %v4282_v49, %v4281_v9  ;;  %v10920_v5 = vpop.f32.mrb[108].mxu1 }
 0xf5a   : > { %4886 = vmax.xlane.f32.xlu1 %v4885_v36  ;;  %v10926_v33 = vpop.f32.mrb[109].mxu1 }
 0xf5b   : > { %v8195_v8 = vpop.f32.mrb[108].mxu0  ;;  %8199 = vmatprep.mubr.msk.bf16.mxu0 %vm401_vm1, %v4288_v11  ;;  %v8264_v55 = vpop.f32.mrb[110].mxu1  ;;  %v4687_v11 = vsel %vm683_vm5, %v4673_v3, 0 }
 0xf5c   : > { %v4260_v46 = vpop.f32.mrb[109].mxu0  ;;  %4889 = vmax.xlane.f32.xlu0 %v4888_v22  ;;  %8200 = vmatmul.mubr.msk.bf16.vlgmr.msra.gmra.mrb[96].mxu0 %vm401_vm1, %v4289_v16  ;;  %v10932_v21 = vpop.f32.mrb[111].mxu1  ;;  %v4287_v18 = vmul.f32 %v8973_v44, %v8195_v8  ;;  %v7382_v55 = vld [vmem:[%s11675_s5 + $0x198] sm:$0xff]  }
 0xf5d   : > { %8224 = vmatpush3.bf16.msra.mxu0 %v4566_v25  ;;  %v4176_v53 = vpop.xlane.xlu1 %4175  ;;  %v8196_v34 = vpop.f32.mrb[110].mxu0  ;;  %v4285_v56 = vmul.f32 %v8975_v14, %v4260_v46 }
 0xf5e   : > { %8976 = vrcp.f32 %v4176_v53  ;;  %8225 = vmatprep.subr.bf16.mxu0 %v4568_v15  ;;  %v4263_v37 = vpop.f32.mrb[111].mxu0  ;;  %v4291_v43 = vpack.c.bf16 %v4287_v18, %v4287_v18  ;;  %v7076_v34 = vld [vmem:[%s11675_s5 + $0x1a0] sm:$0x1] }
 0xf5f   : > { %8978 = vpow2.f32 %v4528_v51  ;;  %v7318_v51 = vunpack.c.l.bf16 %v7382_v55  ;;  %v4774_v48 = vunpack.c.l.bf16 %v7076_v34 }
 0xf60   : > { %8980 = vpow2.f32 %v4526_v38 }
 0xf61   : > { %8226 = vmatpush3.bf16.msra.mxu0 %v4568_v15  ;;  %v4570_v39 = vpop.permute.xlu1 %4569  ;;  %v8297_v25 = vpop.f32.mrb[112].mxu1  ;;  %8982 = vpow2.f32 %v4532_v52  ;;  %v10984_v42 = vadd.f32 %v7318_v51, %v10926_v33 }
 0xf62   : > { %8227 = vmatprep.subr.bf16.mxu0 %v4570_v39  ;;  %v5216_v63 = vadd.f32 %v10945_v6, %v8297_v25  ;;  %v5207_v17 = vpop.f32.mrb[113].mxu1  ;;  %8984 = vpow2.f32 %v4536_v24  ;;  %v10992_v25 = vadd.f32 %v10920_v5, %v4774_v48 }
 0xf63   : > { %v5208_v58 = vadd.f32 %v10945_v6, %v5207_v17  ;;  %v8298_v19 = vpop.f32.mrb[114].mxu1  ;;  %8986 = vpow2.f32 %v4530_v47  ;;  %v4891_v50 = vsel %vm490_vm2, %v10984_v42, -inf }
 0xf64   : > { %v5219_v41 = vadd.f32 %v10945_v6, %v8298_v19  ;;  %v5210_v29 = vpop.f32.mrb[115].mxu1  ;;  %8988 = vpow2.f32 %v4534_v7  ;;  %v4897_v33 = vsel %vm509_vm3, %v10992_v25, -inf }
 0xf65   : > { %8228 = vmatpush3.bf16.msra.mxu0 %v4570_v39  ;;  %v5211_v54 = vadd.f32 %v10945_v6, %v5210_v29  ;;  %8990 = vpow2.f32 %v4538_v23 }
 0xf66   : > { %8229 = vmatprep.subr.bf16.mxu0 %v4589_v62  ;;  %v10952_v2 = vpack.c.bf16 %v5219_v41, %v5216_v63 }
 0xf67   : > { %v10956_v12 = vpack.c.bf16 %v5211_v54, %v5208_v58 }
 0xf68   : > { %v8977_v1 = vpop.eup %8976 }
 0xf69   : > { %v4286_v20 = vmul.f32 %v8977_v1, %v4263_v37  ;;  %8230 = vmatpush3.bf16.msra.mxu0 %v4589_v62  ;;  %v8979_v30 = vpop.eup %8978  ;;  %v7319_v37 = vunpack.c.h.bf16 %v7382_v55 }
 0xf6a   : > { %8649 = vmatprep.subr.msk.bf16.mxu0 %vm683_vm5, %v4673_v3  ;;  %v8981_v32 = vpop.eup %8980  ;;  %v4543_v5 = vsel %vm490_vm2, %v8979_v30, 0.0 }
 0xf6b   : > { %v4290_v9 = vpack.c.bf16 %v4286_v20, %v4285_v56  ;;  %4946 = vrot.lane.b32.xlu1 %v10337_v40, %s9175_s16  ;;  %v4561_v49 = vpack.c.bf16 %v8979_v30, %v8981_v32  ;;  %v8983_v35 = vpop.eup %8982  ;;  %v10989_v39 = vadd.f32 %v7319_v37, %v10932_v21  ;;  %v4540_v21 = vsel %vm490_vm2, %v8981_v32, 0.0 }
 0xf6c   : > { %v8985_v60 = vpop.eup %8984  ;;  %v4549_v52 = vsel %vm490_vm2, %v8983_v35, 0.0 }
 0xf6d   : > { %8203 = vmatprep.mubr.msk.bf16.mxu0 %vm401_vm1, %v4290_v9  ;;  %v8987_v16 = vpop.eup %8986  ;;  %v4894_v63 = vsel %vm490_vm2, %v10989_v39, -inf  ;;  %v4555_v19 = vsel %vm490_vm2, %v8985_v60, 0.0 }
 0xf6e   : > { %8204 = vmatmul.mubr.msk.bf16.gmra.mrb[100].mxu0 %vm401_vm1, %v4291_v43  ;;  %v8989_v15 = vpop.eup %8988  ;;  %v4562_v40 = vpack.c.bf16 %v8983_v35, %v8987_v16  ;;  %v4546_v17 = vsel %vm490_vm2, %v8987_v16, 0.0 }
 0xf6f   : > { %8231 = vmatprep.mubr.msk.bf16.mxu0 %vm490_vm2, %v4561_v49  ;;  %v4563_v36 = vpack.c.bf16 %v8985_v60, %v8989_v15  ;;  %v8991_v4 = vpop.eup %8990  ;;  %v4552_v24 = vsel %vm490_vm2, %v8989_v15, 0.0 }
 0xf70   : > { %v4564_v8 = vpack.c.bf16 %v8991_v4, %v8991_v4  ;;  %v4558_v58 = vsel %vm509_vm3, %v8991_v4, 0.0 }
 0xf72   : > { %4948 = vrot.lane.b32.xlu0 %v10333_v0, %s9175_s16  ;;  %v10976_v0 = vpop.f32.mrb[116].mxu1 }
 0xf73   : > { %v5223_v22 = vpop.f32.mrb[117].mxu1  ;;  %v5232_v34 = vadd.f32 %v10945_v6, %v10976_v0 }
 0xf74   : > { %v5224_v46 = vadd.f32 %v10945_v6, %v5223_v22  ;;  %v8302_v53 = vpop.f32.mrb[118].mxu1 }
 0xf75   : > { %v5226_v38 = vpop.f32.mrb[119].mxu1 }
 0xf76   : > { %8232 = vmatmul.mubr.msk.bf16.vlgmr.msra.gmra.mrb[112].mxu0 %vm490_vm2, %v4562_v40  ;;  %v5227_v57 = vadd.f32 %v10945_v6, %v5226_v38 }
 0xf77   : > { %8235 = vmatprep.mubr.msk.bf16.mxu0 %vm490_vm2, %v4563_v36  ;;  %8240 = vmatpush3.bf16.msra.mxu0 %v4687_v11 }
 0xf78   : > { %v10986_v28 = vpack.c.bf16 %v5227_v57, %v5224_v46  ;;  %v11061_v57 = vpack.c.bf16 %v5232_v34, %v5232_v34 }
 0xf7e   : > { %8236 = vmatmul.mubr.msk.bf16.gmra.mrb[116].mxu0 %vm490_vm2, %v4564_v8 }
 0xf8f   : > { %4892 = vmax.xlane.f32.xlu1 %v4891_v50 }
 0xf91   : > { %4895 = vmax.xlane.f32.xlu0 %v4894_v63 }
 0xf93   : > { %4898 = vmax.xlane.f32.xlu1 %v4897_v33 }
 0xf95   : > { %4547 = vadd.xlane.f32.xlu0 %v4546_v17 }
 0xf97   : > { %4541 = vadd.xlane.f32.xlu1 %v4540_v21 }
 0xf99   : > { %4544 = vadd.xlane.f32.xlu0 %v4543_v5 }
 0xf9b   : > { %4550 = vadd.xlane.f32.xlu1 %v4549_v52 }
 0xf9d   : > { %4559 = vadd.xlane.f32.xlu0 %v4558_v58 }
 0xf9f   : > { %4556 = vadd.xlane.f32.xlu1 %v4555_v19 }
 0xfa1   : > { %4553 = vadd.xlane.f32.xlu0 %v4552_v24 }
 0xfb0   : > { %4952 = vrot.lane.b32.xlu1 %v10441_v31, %s9175_s16 }
 0xfb4   : > { %5260 = vrot.lane.b32.xlu1 %v10956_v12, %s9164_s9 }
 0xfb7   : > { %4950 = vrot.lane.b32.xlu0 %v10366_v59, %s9175_s16 }
 0xfe3   : > { %v4881_v62 = vpop.xlane.xlu1 %4880 }
 0xfe4   : > { %v4900_v41 = vsub.f32 %v10907_v10, %v4881_v62 }
 0xfe5   : > { %v4884_v29 = vpop.xlane.xlu0 %4883 }
 0xfe6   : > { %v4907_v47 = vmul.f32 1.442695, %v4900_v41  ;;  %v4901_v54 = vsub.f32 %v10911_v26, %v4884_v29 }
 0xfe7   : > { %v4887_v44 = vpop.xlane.xlu1 %4886 }
 0xfe8   : > { %8992 = vpow2.f32 %v4907_v47  ;;  %v4909_v7 = vmul.f32 1.442695, %v4901_v54  ;;  %v4902_v14 = vsub.f32 %v10909_v45, %v4887_v44 }
 0xfe9   : > { %v4890_v13 = vpop.xlane.xlu0 %4889 }
 0xfea   : > { %8994 = vpow2.f32 %v4909_v7  ;;  %v4911_v31 = vmul.f32 1.442695, %v4902_v14  ;;  %v4903_v1 = vsub.f32 %v10915_v61, %v4890_v13 }
 0xfeb   : > { %v11017_v18 = vpop.permute.xlu1 %4946 }
 0xfec   : > { %8996 = vpow2.f32 %v4911_v31  ;;  %v4913_v59 = vmul.f32 1.442695, %v4903_v1  ;;  %8265 = vmatprep.subr.bf16.mxu0 %v11017_v18 }
 0xfed   : > { %v11042_v32 = vpop.permute.xlu0 %4948 }
 0xfee   : > { %8998 = vpow2.f32 %v4913_v59 }
 0xff2   : > { %v11020_v10 = vpop.eup %8992 }
 0xff3   : > { %v4921_v26 = vsel %vm490_vm2, %v11020_v10, 0.0 }
 0xff4   : > { %v11024_v56 = vpop.eup %8994  ;;  %4922 = vadd.xlane.f32.xlu1 %v4921_v26 }
 0xff5   : > { %v4942_v45 = vpack.c.bf16 %v11024_v56, %v11020_v10  ;;  %v4924_v9 = vsel %vm490_vm2, %v11024_v56, 0.0 }
 0xff6   : > { %v11028_v20 = vpop.eup %8996 }
 0xff7   : > { %v4927_v61 = vsel %vm490_vm2, %v11028_v20, 0.0 }
 0xff8   : > { %v11032_v30 = vpop.eup %8998  ;;  %4928 = vadd.xlane.f32.xlu0 %v4927_v61 }
 0xff9   : > { %v4943_v3 = vpack.c.bf16 %v11032_v30, %v11028_v20  ;;  %v4930_v23 = vsel %vm490_vm2, %v11032_v30, 0.0 }
 0xffa   : > { %4931 = vadd.xlane.f32.xlu1 %v4930_v23 }
 0xffc   : > { %4925 = vadd.xlane.f32.xlu0 %v4924_v9 }
0x100b   : > { %5264 = vrot.lane.b32.xlu1 %v10986_v28, %s9164_s9 }
0x101c   : > { %v4893_v43 = vpop.xlane.xlu1 %4892 }
0x101d   : > { %v4904_v35 = vsub.f32 %v10984_v42, %v4893_v43 }
0x101e   : > { %v4896_v49 = vpop.xlane.xlu0 %4895 }
0x101f   : > { %v4905_v60 = vsub.f32 %v10989_v39, %v4896_v49  ;;  %v4915_v11 = vmul.f32 1.442695, %v4904_v35 }
0x1020   : > { %v4899_v16 = vpop.xlane.xlu1 %4898 }
0x1021   : > { %v4917_v15 = vmul.f32 1.442695, %v4905_v60  ;;  %v4906_v40 = vsub.f32 %v10992_v25, %v4899_v16 }
0x1022   : > { %v4548_v53 = vpop.xlane.xlu0 %4547 }
0x1023   : > { %9000 = vpow2.f32 %v4917_v15  ;;  %v4919_v36 = vmul.f32 1.442695, %v4906_v40 }
0x1024   : > { %v4542_v38 = vpop.xlane.xlu1 %4541 }
0x1025   : > { %9002 = vpow2.f32 %v4919_v36 }
0x1026   : > { %9004 = vpow2.f32 %v4915_v11  ;;  %v4545_v37 = vpop.xlane.xlu0 %4544 }
0x1027   : > { %9006 = vrcp.f32 %v4548_v53 }
0x1028   : > { %v4551_v48 = vpop.xlane.xlu1 %4550  ;;  %9008 = vrcp.f32 %v4542_v38 }
0x1029   : > { %9010 = vrcp.f32 %v4551_v48 }
0x102a   : > { %v4560_v42 = vpop.xlane.xlu0 %4559  ;;  %9012 = vrcp.f32 %v4545_v37 }
0x102b   : > { %9014 = vrcp.f32 %v4560_v42 }
0x102c   : > { %v4557_v39 = vpop.xlane.xlu1 %4556 }
0x102d   : > { %v11047_v4 = vpop.eup %9000  ;;  %9016 = vrcp.f32 %v4557_v39 }
0x102e   : > { %v4936_v8 = vsel %vm490_vm2, %v11047_v4, 0.0  ;;  %v4554_v25 = vpop.xlane.xlu0 %4553 }
0x102f   : > { %v11051_v55 = vpop.eup %9002  ;;  %4937 = vadd.xlane.f32.xlu1 %v4936_v8  ;;  %9018 = vrcp.f32 %v4554_v25 }
0x1030   : > { %v4939_v22 = vsel %vm509_vm3, %v11051_v55, 0.0  ;;  %v11055_v51 = vpop.eup %9004  ;;  %v4953_v26 = vpop.permute.xlu1 %4952  ;;  %v4945_v56 = vpack.c.bf16 %v11051_v55, %v11051_v55 }
0x1031   : > { %4940 = vadd.xlane.f32.xlu0 %v4939_v22  ;;  %v4933_v46 = vsel %vm490_vm2, %v11055_v51, 0.0  ;;  %v9007_v6 = vpop.eup %9006  ;;  %v4970_v9 = vand.u32 %v4953_v26, %v9428_v27  ;;  %v4944_v49 = vpack.c.bf16 %v11047_v4, %v11055_v51 }
0x1032   : > { %v9009_v50 = vpop.eup %9008  ;;  %v4951_v61 = vpop.permute.xlu0 %4950 }
0x1033   : > { %v9011_v33 = vpop.eup %9010 }
0x1034   : > { %v9013_v21 = vpop.eup %9012  ;;  %v5261_v10 = vpop.permute.xlu1 %5260 }
0x1035   : > { %4934 = vadd.xlane.f32.xlu0 %v4933_v46  ;;  %v9015_v47 = vpop.eup %9014 }
0x1037   : > { %v9017_v44 = vpop.eup %9016 }
0x1039   : > { %v9019_v14 = vpop.eup %9018 }
0x1040   : > { %5266 = vrot.lane.b32.xlu1 %v11061_v57, %s9164_s9 }
0x1044   : > { %5643 = vrot.lane.b32.xlu1 %v10952_v2, %s9165_s10 }
0x1048   : > { %5647 = vrot.lane.b32.xlu1 %v11061_v57, %s9165_s10 }
0x1049   : > { %v8233_v0 = vpop.f32.mrb[112].mxu0 }
0x104a   : > { %v4625_v63 = vpop.f32.mrb[113].mxu0  ;;  %v4664_v5 = vmul.f32 %v9007_v6, %v8233_v0 }
0x104b   : > { %v8234_v17 = vpop.f32.mrb[114].mxu0  ;;  %5262 = vrot.lane.b32.xlu0 %v10952_v2, %s9164_s9  ;;  %v4662_v19 = vmul.f32 %v9009_v50, %v4625_v63 }
0x104c   : > { %v4665_v52 = vmul.f32 %v9011_v33, %v8234_v17  ;;  %v4628_v58 = vpop.f32.mrb[115].mxu0  ;;  %5635 = vrot.lane.b32.xlu1 %v10952_v2, %s9166_s11 }
0x104d   : > { %v4663_v24 = vmul.f32 %v9013_v21, %v4628_v58 }
0x104e   : > { %v4670_v62 = vpack.c.bf16 %v4665_v52, %v4664_v5 }
0x104f   : > { %v4669_v41 = vpack.c.bf16 %v4663_v24, %v4662_v19  ;;  %5641 = vrot.lane.b32.xlu0 %v10956_v12, %s9165_s10 }
0x1050   : > { %5639 = vrot.lane.b32.xlu1 %v11061_v57, %s9166_s11 }
0x1051   : > { %v8237_v29 = vpop.f32.mrb[116].mxu0  ;;  %8241 = vmatprep.mubr.msk.bf16.mxu0 %vm401_vm1, %v4669_v41 }
0x1052   : > { %v4641_v54 = vpop.f32.mrb[117].mxu0  ;;  %8242 = vmatmul.mubr.msk.bf16.vlgmr.msra.gmra.mrb[96].mxu0 %vm401_vm1, %v4670_v62  ;;  %v4668_v13 = vmul.f32 %v9015_v47, %v8237_v29  ;;  %v5281_v62 = vsel %vm401_vm1, %v5261_v10, 0 }
0x1053   : > { %8266 = vmatpush3.bf16.msra.mxu0 %v11017_v18  ;;  %v8238_v7 = vpop.f32.mrb[118].mxu0  ;;  %5645 = vrot.lane.b32.xlu0 %v10986_v28, %s9165_s10  ;;  %v4666_v1 = vmul.f32 %v9019_v14, %v4641_v54 }
0x1054   : > { %8267 = vmatprep.subr.bf16.mxu0 %v11042_v32  ;;  %v4644_v31 = vpop.f32.mrb[119].mxu0  ;;  %5425 = vrot.lane.b32.xlu1 %v10952_v2, %s9167_s12  ;;  %v4672_v18 = vpack.c.bf16 %v4668_v13, %v4668_v13 }
0x1055   : > { %v4667_v59 = vmul.f32 %v9017_v44, %v4644_v31 }
0x1057   : > { %v4671_v23 = vpack.c.bf16 %v4667_v59, %v4666_v1  ;;  %8268 = vmatpush3.bf16.msra.mxu0 %v11042_v32  ;;  %5633 = vrot.lane.b32.xlu0 %v10956_v12, %s9166_s11  ;;  %v5054_v32 = vld [vmem:[%s11673_s3 + $0xc] sm:$0xf] }
0x1058   : > { %8269 = vmatprep.subr.bf16.mxu0 %v4951_v61  ;;  %v5068_v43 = vsel %vm683_vm5, %v5054_v32, 0 }
0x1059   : > { %8245 = vmatprep.mubr.msk.bf16.mxu0 %vm401_vm1, %v4671_v23 }
0x105a   : > { %8246 = vmatmul.mubr.msk.bf16.gmra.mrb[100].mxu0 %vm401_vm1, %v4672_v18 }
0x105b   : > { %8270 = vmatpush3.bf16.msra.mxu0 %v4951_v61  ;;  %5637 = vrot.lane.b32.xlu0 %v10986_v28, %s9166_s11 }
0x105c   : > { %8271 = vmatprep.subr.bf16.mxu0 %v4970_v9  ;;  %8273 = vmatprep.mubr.msk.bf16.mxu0 %vm490_vm2, %v4942_v45 }
0x105f   : > { %8272 = vmatpush3.bf16.msra.mxu0 %v4970_v9  ;;  %5423 = vrot.lane.b32.xlu0 %v10956_v12, %s9167_s12 }
0x1060   : > { %8654 = vmatprep.subr.msk.bf16.mxu0 %vm683_vm5, %v5054_v32 }
0x1062   : > { %8274 = vmatmul.mubr.msk.bf16.vlgmr.msra.gmra.mrb[120].mxu0 %vm490_vm2, %v4943_v3 }
0x1063   : > { %8277 = vmatprep.mubr.msk.bf16.mxu0 %vm490_vm2, %v4944_v49  ;;  %8282 = vmatpush3.bf16.msra.mxu0 %v5068_v43  ;;  %v9154_v43 = vld [vmem:[%s11674_s4] ss:$0 sm:$0xff] }
0x1064   : > { %8655 = vmatprep.subr.msk.bf16.mxu0 %vm401_vm1, %v5261_v10 }
0x106a   : > { %8278 = vmatmul.mubr.msk.bf16.gmra.mrb[124].mxu0 %vm490_vm2, %v4945_v56 }
0x1081   : > { %v4923_v45 = vpop.xlane.xlu1 %4922 }
0x1082   : > { %9020 = vrcp.f32 %v4923_v45 }
0x1085   : > { %v4929_v60 = vpop.xlane.xlu0 %4928 }
0x1086   : > { %9022 = vrcp.f32 %v4929_v60 }
0x1087   : > { %v4932_v35 = vpop.xlane.xlu1 %4931 }
0x1088   : > { %9024 = vrcp.f32 %v4932_v35 }
0x1089   : > { %v4926_v15 = vpop.xlane.xlu0 %4925 }
0x108a   : > { %9026 = vrcp.f32 %v4926_v15 }
0x108b   : > { %v11115_v16 = vpop.permute.xlu1 %5264 }
0x108c   : > { %v9021_v37 = vpop.eup %9020  ;;  %v5287_v59 = vsel %vm401_vm1, %v11115_v16, 0 }
0x1090   : > { %v9023_v42 = vpop.eup %9022 }
0x1092   : > { %v9025_v25 = vpop.eup %9024 }
0x1094   : > { %v9027_v0 = vpop.eup %9026 }
0x10bc   : > { %v4938_v20 = vpop.xlane.xlu1 %4937 }
0x10bd   : > { %9028 = vrcp.f32 %v4938_v20 }
0x10be   : > { %v4941_v30 = vpop.xlane.xlu0 %4940 }
0x10bf   : > { %9030 = vrcp.f32 %v4941_v30 }
0x10c0   : > { %v11117_v3 = vpop.permute.xlu1 %5266 }
0x10c1   : > { %v5290_v26 = vsel %vm401_vm1, %v11117_v3, 0 }
0x10c2   : > { %v4935_v40 = vpop.xlane.xlu0 %4934 }
0x10c3   : > { %9032 = vrcp.f32 %v4935_v40 }
0x10c4   : > { %v11119_v11 = vpop.permute.xlu1 %5643 }
0x10c5   : > { %v5665_v23 = vsel %vm401_vm1, %v11119_v11, 0 }
0x10c6   : > { %v5263_v36 = vpop.permute.xlu0 %5262 }
0x10c7   : > { %v9029_v19 = vpop.eup %9028  ;;  %v5284_v1 = vsel %vm401_vm1, %v5263_v36, 0 }
0x10c8   : > { %v11121_v4 = vpop.permute.xlu1 %5647 }
0x10c9   : > { %v9031_v41 = vpop.eup %9030  ;;  %v5671_v9 = vsel %vm401_vm1, %v11121_v4, 0 }
0x10ca   : > { %v5642_v8 = vpop.permute.xlu0 %5641 }
0x10cb   : > { %v5662_v61 = vsel %vm401_vm1, %v5642_v8, 0 }
0x10cc   : > { %v11125_v22 = vpop.permute.xlu1 %5635 }
0x10cd   : > { %v9033_v47 = vpop.eup %9032 }
0x10ce   : > { %v11123_v55 = vpop.permute.xlu0 %5645 }
0x10cf   : > { %v5668_v18 = vsel %vm401_vm1, %v11123_v55, 0 }
0x10d0   : > { %v11129_v46 = vpop.permute.xlu1 %5639 }
0x10d2   : > { %v11127_v51 = vpop.permute.xlu0 %5633 }
0x10d4   : > { %v5426_v38 = vpop.permute.xlu1 %5425 }
0x10d6   : > { %v11131_v53 = vpop.permute.xlu0 %5637 }
0x10da   : > { %v5424_v34 = vpop.permute.xlu0 %5423 }
0x10db   : > { %8319 = vmatprep.subr.bf16.mxu1 %v5424_v34 }
0x10dc   : > { %8320 = vmatpush3.bf16.msra.mxu1 %v5424_v34 }
0x10dd   : > { %8321 = vmatprep.subr.bf16.mxu1 %v5426_v38 }
0x10e0   : > { %8322 = vmatpush3.bf16.msra.mxu1 %v5426_v38 }
0x1135   : > { %v8275_v48 = vpop.f32.mrb[120].mxu0 }
0x1136   : > { %v5006_v39 = vpop.f32.mrb[121].mxu0  ;;  %v5045_v50 = vmul.f32 %v9023_v42, %v8275_v48  ;;  %v7113_v48 = vld [vmem:[%s11675_s5 + $0x6c] sm:$0x1] }
0x1137   : > { %v8276_v6 = vpop.f32.mrb[122].mxu0  ;;  %v5043_v17 = vmul.f32 %v9021_v37, %v5006_v39 }
0x1138   : > { %v5046_v63 = vmul.f32 %v9025_v25, %v8276_v6  ;;  %v5009_v33 = vpop.f32.mrb[123].mxu0 }
0x1139   : > { %v5044_v21 = vmul.f32 %v9027_v0, %v5009_v33 }
0x113a   : > { %v5051_v5 = vpack.c.bf16 %v5046_v63, %v5045_v50  ;;  %v5255_v50 = vunpack.c.l.bf16 %v7113_v48 }
0x113b   : > { %v5050_v52 = vpack.c.bf16 %v5044_v21, %v5043_v17 }
0x113d   : > { %v8279_v58 = vpop.f32.mrb[124].mxu0  ;;  %8283 = vmatprep.mubr.msk.bf16.mxu0 %vm401_vm1, %v5050_v52 }
0x113e   : > { %v5022_v24 = vpop.f32.mrb[125].mxu0  ;;  %8284 = vmatmul.mubr.msk.bf16.vlgmr.msra.gmra.mrb[96].mxu0 %vm401_vm1, %v5051_v5  ;;  %v5049_v54 = vmul.f32 %v9031_v41, %v8279_v58 }
0x113f   : > { %8304 = vmatpush3.bf16.xpose.msra.mxu0 %v5281_v62  ;;  %v8280_v29 = vpop.f32.mrb[126].mxu0  ;;  %v5047_v7 = vmul.f32 %v9033_v47, %v5022_v24 }
0x1140   : > { %8656 = vmatprep.subr.msk.bf16.mxu0 %vm401_vm1, %v5263_v36  ;;  %v5025_v44 = vpop.f32.mrb[127].mxu0  ;;  %v5053_v31 = vpack.c.bf16 %v5049_v54, %v5049_v54 }
0x1141   : > { %v5048_v14 = vmul.f32 %v9029_v19, %v5025_v44 }
0x1143   : > { %v5052_v13 = vpack.c.bf16 %v5048_v14, %v5047_v7 }
0x1145   : > { %8287 = vmatprep.mubr.msk.bf16.mxu0 %vm401_vm1, %v5052_v13 }
0x1146   : > { %8288 = vmatmul.mubr.msk.bf16.gmra.mrb[100].mxu0 %vm401_vm1, %v5053_v31 }
0x1147   : > { %8306 = vmatpush3.bf16.xpose.msra.mxu0 %v5284_v1  ;;  %8311 = vmatprep.mubr.msk.bf16.mxu0 %vm401_vm1, %v10956_v12 }
0x1148   : > { %8657 = vmatprep.subr.msk.bf16.mxu0 %vm401_vm1, %v11115_v16 }
0x114f   : > { %8308 = vmatpush3.bf16.xpose.msra.mxu0 %v5287_v59 }
0x1150   : > { %8658 = vmatprep.subr.msk.bf16.mxu0 %vm401_vm1, %v11117_v3 }
0x1157   : > { %8310 = vmatpush3.bf16.xpose.msra.mxu0 %v5290_v26 }
0x1158   : > { %8660 = vmatprep.subr.msk.bf16.mxu0 %vm401_vm1, %v5642_v8  ;;  %v7107_v8 = vld [vmem:[%s11675_s5 + $0x54] ss:$20 sps:$4 sm:$0xff]  }
0x1159   : > { %v5254_v52 = vunpack.c.h.bf16 %v7107_v8 }
0x115e   : > { %8312 = vmatmul.mubr.msk.bf16.vlgmr.msra.gmra.mrb[128].mxu0 %vm401_vm1, %v10952_v2 }
0x115f   : > { %8315 = vmatprep.mubr.msk.bf16.mxu0 %vm401_vm1, %v10986_v28  ;;  %8346 = vmatpush3.bf16.xpose.msra.mxu0 %v5662_v61 }
0x1160   : > { %8661 = vmatprep.subr.msk.bf16.mxu0 %vm401_vm1, %v11119_v11 }
0x1166   : > { %8316 = vmatmul.mubr.msk.bf16.gmra.mrb[132].mxu0 %vm401_vm1, %v11061_v57 }
0x1167   : > { %8348 = vmatpush3.bf16.xpose.msra.mxu0 %v5665_v23  ;;  %8353 = vmatprep.mubr.msk.bf16.mxu0 %vm401_vm1, %v11127_v51 }
0x1168   : > { %8662 = vmatprep.subr.msk.bf16.mxu0 %vm401_vm1, %v11123_v55 }
0x116f   : > { %8350 = vmatpush3.bf16.xpose.msra.mxu0 %v5668_v18  ;;  %v7385_v18 = vld [vmem:[%s11675_s5 + $0xc8] sm:$0xff]  }
0x1170   : > { %8663 = vmatprep.subr.msk.bf16.mxu0 %vm401_vm1, %v11121_v4  ;;  %v7383_v4 = vld [vmem:[%s11675_s5 + $0x58] sm:$0xff]  }
0x1171   : > { %v7323_v55 = vunpack.c.h.bf16 %v7383_v4 }
0x1177   : > { %8352 = vmatpush3.bf16.xpose.msra.mxu0 %v5671_v9  ;;  %v7386_v9 = vld [vmem:[%s11675_s5 + $0xd0] sm:$0xff]  }
0x117e   : > { %8354 = vmatmul.mubr.msk.bf16.vlgmr.msra.gmra.mrb[136].mxu0 %vm401_vm1, %v11125_v22  ;;  %v5249_v22 = vunpack.c.l.bf16 %v7107_v8 }
0x117f   : > { %8357 = vmatprep.mubr.msk.bf16.mxu0 %vm401_vm1, %v11131_v53  ;;  %v7322_v53 = vunpack.c.l.bf16 %v7383_v4 }
0x1186   : > { %8358 = vmatmul.mubr.msk.bf16.gmra.mrb[140].mxu0 %vm401_vm1, %v11129_v46  ;;  %v7384_v46 = vld [vmem:[%s11675_s5 + $0x60] sm:$0xff]  }
0x1187   : > { %v7326_v39 = vunpack.c.l.bf16 %v7384_v46  ;;  %v7327_v21 = vunpack.c.h.bf16 %v7384_v46 }
0x1211   : > { %v8285_v32 = vpop.f32.mrb[96].mxu0 }
0x1212   : > { %v8485_v49 = vadd.f32 %v9154_v43, %v8285_v32  ;;  %v5104_v10 = vpop.f32.mrb[97].mxu0  ;;  %v7331_v32 = vunpack.c.h.bf16 %v7385_v18 }
0x1213   : > { %v8486_v56 = vadd.f32 %v9154_v43, %v5104_v10  ;;  %v8286_v45 = vpop.f32.mrb[98].mxu0 }
0x1214   : > { %7091 = vst.msk [vmem:[%s9932_s20 + $0x80] sm:$0xff] %vm294_vm0, %v8485_v49  ;;  %v8487_v35 = vadd.f32 %v9154_v43, %v8286_v45  ;;  %v5107_v60 = vpop.f32.mrb[99].mxu0  ;;  %v7126_v49 = vld [vmem:[%s11675_s5 + $0xc4] ss:$20 sps:$4 sm:$0xff]  }
0x1215   : > { %7089 = vst.msk [vmem:[%s9932_s20 + $0x70] sm:$0xff] %vm294_vm0, %v8486_v56  ;;  %v8488_v16 = vadd.f32 %v9154_v43, %v5107_v60  ;;  %v5626_v56 = vunpack.c.l.bf16 %v7126_v49  ;;  %v7132_v60 = vld [vmem:[%s11675_s5 + $0xdc] sm:$0x1] }
0x1216   : > { %7092 = vst.msk [vmem:[%s9932_s20 + $0x88] sm:$0xff] %vm294_vm0, %v8487_v35  ;;  %v7330_v35 = vunpack.c.l.bf16 %v7385_v18 }
0x1217   : > { %7090 = vst.msk [vmem:[%s9932_s20 + $0x78] sm:$0xff] %vm294_vm0, %v8488_v16  ;;  %v5632_v16 = vunpack.c.l.bf16 %v7132_v60 }
0x1219   : > { %v8289_v15 = vpop.f32.mrb[100].mxu0 }
0x121a   : > { %v8489_v20 = vadd.f32 %v9154_v43, %v8289_v15  ;;  %v5120_v30 = vpop.f32.mrb[101].mxu0  ;;  %v5631_v15 = vunpack.c.h.bf16 %v7126_v49 }
0x121b   : > { %v8490_v3 = vadd.f32 %v9154_v43, %v5120_v30  ;;  %v8290_v40 = vpop.f32.mrb[102].mxu0 }
0x121c   : > { %7095 = vst.msk [vmem:[%s9932_s20 + $0xa0] sm:$0x1] %vm1907_vm6, %v8489_v20  ;;  %v5123_v11 = vpop.f32.mrb[103].mxu0 }
0x121d   : > { %7093 = vst.msk [vmem:[%s9932_s20 + $0x90] sm:$0xff] %vm294_vm0, %v8490_v3  ;;  %v8491_v36 = vadd.f32 %v9154_v43, %v5123_v11  ;;  %v7334_v43 = vunpack.c.l.bf16 %v7386_v9  ;;  %v7335_v11 = vunpack.c.h.bf16 %v7386_v9 }
0x121f   : > { %7094 = vst.msk [vmem:[%s9932_s20 + $0x98] sm:$0xff] %vm294_vm0, %v8491_v36 }
0x1231   : > { %v8313_v51 = vpop.f32.mrb[128].mxu0 }
0x1232   : > { %v11204_v34 = vadd.f32 %v8313_v51, %v7323_v55  ;;  %v5326_v38 = vpop.f32.mrb[129].mxu0 }
0x1233   : > { %v8314_v37 = vpop.f32.mrb[130].mxu0  ;;  %v11209_v42 = vadd.f32 %v5326_v38, %v5249_v22 }
0x1234   : > { %v5329_v25 = vpop.f32.mrb[131].mxu0  ;;  %v5362_v6 = vsel %vm490_vm2, %v11204_v34, -inf  ;;  %v11217_v33 = vadd.f32 %v8314_v37, %v7326_v39 }
0x1235   : > { %v11213_v0 = vadd.f32 %v7322_v53, %v5329_v25  ;;  %5363 = vmax.xlane.f32.xlu0 %v5362_v6  ;;  %v5356_v17 = vsel %vm490_vm2, %v11209_v42, -inf }
0x1236   : > { %v5365_v47 = vsel %vm490_vm2, %v11217_v33, -inf }
0x1237   : > { %v5359_v63 = vsel %vm490_vm2, %v11213_v0, -inf }
0x1238   : > { %5360 = vmax.xlane.f32.xlu1 %v5359_v63 }
0x1239   : > { %v8317_v5 = vpop.f32.mrb[132].mxu0  ;;  %5357 = vmax.xlane.f32.xlu0 %v5356_v17 }
0x123a   : > { %v11221_v58 = vadd.f32 %v8317_v5, %v5255_v50  ;;  %v5342_v19 = vpop.f32.mrb[133].mxu0 }
0x123b   : > { %v8318_v24 = vpop.f32.mrb[134].mxu0  ;;  %v11223_v62 = vadd.f32 %v7327_v21, %v5342_v19 }
0x123c   : > { %v5345_v41 = vpop.f32.mrb[135].mxu0  ;;  %v5374_v29 = vsel %vm509_vm3, %v11221_v58, -inf }
0x123d   : > { %v11229_v54 = vadd.f32 %v5345_v41, %v5254_v52  ;;  %5375 = vmax.xlane.f32.xlu1 %v5374_v29  ;;  %5366 = vmax.xlane.f32.xlu0 %v5365_v47  ;;  %v5368_v7 = vsel %vm490_vm2, %v11223_v62, -inf }
0x123f   : > { %v5371_v44 = vsel %vm490_vm2, %v11229_v54, -inf }
0x1241   : > { %5369 = vmax.xlane.f32.xlu1 %v5368_v7  ;;  %5372 = vmax.xlane.f32.xlu0 %v5371_v44 }
0x1251   : > { %v8355_v14 = vpop.f32.mrb[136].mxu0 }
0x1252   : > { %5427 = vrot.lane.b32.xlu1 %v10986_v28, %s9167_s12  ;;  %v5707_v13 = vpop.f32.mrb[137].mxu0  ;;  %v11264_v10 = vadd.f32 %v8355_v14, %v7331_v32 }
0x1253   : > { %v8356_v31 = vpop.f32.mrb[138].mxu0  ;;  %v11271_v20 = vadd.f32 %v5707_v13, %v5626_v56 }
0x1254   : > { %v5710_v1 = vpop.f32.mrb[139].mxu0  ;;  %v11266_v45 = vadd.f32 %v8356_v31, %v7334_v43  ;;  %v5743_v3 = vsel %vm490_vm2, %v11264_v10, -inf }
0x1255   : > { %v11273_v30 = vadd.f32 %v7330_v35, %v5710_v1  ;;  %v5737_v55 = vsel %vm490_vm2, %v11271_v20, -inf }
0x1256   : > { %6022 = vrot.lane.b32.xlu1 %v10956_v12, %s9168_s23  ;;  %v5746_v40 = vsel %vm490_vm2, %v11266_v45, -inf }
0x1257   : > { %5429 = vrot.lane.b32.xlu0 %v11061_v57, %s9167_s12  ;;  %v5740_v8 = vsel %vm490_vm2, %v11273_v30, -inf }
0x1259   : > { %v8359_v59 = vpop.f32.mrb[140].mxu0 }
0x125a   : > { %6026 = vrot.lane.b32.xlu1 %v10986_v28, %s9168_s23  ;;  %v5723_v26 = vpop.f32.mrb[141].mxu0  ;;  %v11279_v36 = vadd.f32 %v8359_v59, %v5632_v16 }
0x125b   : > { %6024 = vrot.lane.b32.xlu0 %v10952_v2, %s9168_s23  ;;  %v8360_v61 = vpop.f32.mrb[142].mxu0  ;;  %v11287_v22 = vadd.f32 %v7335_v11, %v5723_v26 }
0x125c   : > { %v5726_v23 = vpop.f32.mrb[143].mxu0  ;;  %v5755_v51 = vsel %vm509_vm3, %v11279_v36, -inf }
0x125d   : > { %v11281_v4 = vadd.f32 %v5726_v23, %v5631_v15  ;;  %v5749_v53 = vsel %vm490_vm2, %v11287_v22, -inf }
0x125e   : > { %6014 = vrot.lane.b32.xlu1 %v10956_v12, %s9169_s24 }
0x125f   : > { %6028 = vrot.lane.b32.xlu0 %v11061_v57, %s9168_s23  ;;  %v5752_v46 = vsel %vm490_vm2, %v11281_v4, -inf }
0x1262   : > { %6018 = vrot.lane.b32.xlu1 %v10986_v28, %s9169_s24 }
0x1263   : > { %6016 = vrot.lane.b32.xlu0 %v10952_v2, %s9169_s24 }
0x1267   : > { %6020 = vrot.lane.b32.xlu0 %v11061_v57, %s9169_s24 }
0x1286   : > { %5744 = vmax.xlane.f32.xlu1 %v5743_v3  ;;  %5747 = vmax.xlane.f32.xlu0 %v5746_v40 }
0x128a   : > { %5741 = vmax.xlane.f32.xlu0 %v5740_v8  ;;  %5738 = vmax.xlane.f32.xlu1 %v5737_v55 }
0x128e   : > { %5756 = vmax.xlane.f32.xlu1 %v5755_v51  ;;  %5753 = vmax.xlane.f32.xlu0 %v5752_v46  ;;  %v5531_v51 = vld [vmem:[%s11673_s3] sm:$0xf] }
0x128f   : > { %v5545_v46 = vsel %vm683_vm5, %v5531_v51, 0 }
0x1292   : > { %5750 = vmax.xlane.f32.xlu1 %v5749_v53 }
0x12c2   : > { %v5364_v38 = vpop.xlane.xlu0 %5363 }
0x12c3   : > { %v5379_v37 = vsub.f32 %v11204_v34, %v5364_v38 }
0x12c5   : > { %v5388_v48 = vmul.f32 1.442695, %v5379_v37  ;;  %v5361_v39 = vpop.xlane.xlu1 %5360 }
0x12c6   : > { %v5378_v25 = vsub.f32 %v11213_v0, %v5361_v39  ;;  %v5358_v6 = vpop.xlane.xlu0 %5357 }
0x12c7   : > { %9034 = vpow2.f32 %v5388_v48  ;;  %v5377_v50 = vsub.f32 %v11209_v42, %v5358_v6 }
0x12c8   : > { %v5386_v63 = vmul.f32 1.442695, %v5378_v25 }
0x12c9   : > { %v5384_v17 = vmul.f32 1.442695, %v5377_v50 }
0x12ca   : > { %9036 = vpow2.f32 %v5386_v63  ;;  %v5376_v21 = vpop.xlane.xlu1 %5375  ;;  %v5367_v5 = vpop.xlane.xlu0 %5366 }
0x12cb   : > { %9038 = vpow2.f32 %v5384_v17  ;;  %v5383_v52 = vsub.f32 %v11221_v58, %v5376_v21  ;;  %v5380_v19 = vsub.f32 %v11217_v33, %v5367_v5 }
0x12cd   : > { %v5396_v24 = vmul.f32 1.442695, %v5383_v52  ;;  %v5390_v34 = vmul.f32 1.442695, %v5380_v19 }
0x12ce   : > { %v5370_v41 = vpop.xlane.xlu1 %5369  ;;  %v5373_v29 = vpop.xlane.xlu0 %5372 }
0x12cf   : > { %9040 = vpow2.f32 %v5396_v24  ;;  %v5381_v0 = vsub.f32 %v11223_v62, %v5370_v41  ;;  %v5382_v47 = vsub.f32 %v11229_v54, %v5373_v29 }
0x12d0   : > { %9042 = vpow2.f32 %v5390_v34 }
0x12d1   : > { %v9035_v42 = vpop.eup %9034  ;;  %v5392_v44 = vmul.f32 1.442695, %v5381_v0  ;;  %v5394_v7 = vmul.f32 1.442695, %v5382_v47 }
0x12d2   : > { %v5428_v14 = vpop.permute.xlu1 %5427  ;;  %v5430_v13 = vpop.permute.xlu0 %5429  ;;  %v5404_v31 = vsel %vm490_vm2, %v9035_v42, 0.0 }
0x12d3   : > { %9044 = vpow2.f32 %v5392_v44  ;;  %v5447_v33 = vand.u32 %v5430_v13, %v9428_v27  ;;  %8323 = vmatprep.subr.bf16.mxu1 %v5428_v14  ;;  %5405 = vadd.xlane.f32.xlu0 %v5404_v31 }
0x12d4   : > { %v9037_v58 = vpop.eup %9036  ;;  %9046 = vpow2.f32 %v5394_v7  ;;  %8324 = vmatpush3.bf16.msra.mxu1 %v5428_v14 }
0x12d5   : > { %v9039_v1 = vpop.eup %9038  ;;  %8325 = vmatprep.subr.bf16.mxu1 %v5447_v33  ;;  %v5401_v62 = vsel %vm490_vm2, %v9037_v58, 0.0 }
0x12d6   : > { %v6023_v54 = vpop.permute.xlu1 %6022  ;;  %v5398_v59 = vsel %vm490_vm2, %v9039_v1, 0.0  ;;  %v5419_v26 = vpack.c.bf16 %v9037_v58, %v9039_v1  ;;  %v6025_v18 = vpop.permute.xlu0 %6024 }
0x12d7   : > { %v6043_v61 = vsel %vm401_vm1, %v6023_v54, 0  ;;  %8665 = vmatprep.subr.msk.bf16.mxu0 %vm401_vm1, %v6023_v54  ;;  %5402 = vadd.xlane.f32.xlu0 %v5401_v62  ;;  %v6046_v40 = vsel %vm401_vm1, %v6025_v18, 0 }
0x12d8   : > { %5399 = vadd.xlane.f32.xlu1 %v5398_v59  ;;  %8326 = vmatpush3.bf16.msra.mxu1 %v5447_v33 }
0x12d9   : > { %v9041_v23 = vpop.eup %9040  ;;  %8327 = vmatprep.mubr.msk.bf16.mxu1 %vm490_vm2, %v5419_v26  ;;  %8388 = vmatpush3.bf16.xpose.msra.mxu0 %v6043_v61 }
0x12da   : > { %v9043_v9 = vpop.eup %9042  ;;  %8666 = vmatprep.subr.msk.bf16.mxu0 %vm401_vm1, %v6025_v18  ;;  %v6027_v32 = vpop.permute.xlu1 %6026  ;;  %v5416_v43 = vsel %vm509_vm3, %v9041_v23, 0.0  ;;  %v5422_v11 = vpack.c.bf16 %v9041_v23, %v9041_v23  ;;  %8659 = vmatprep.subr.msk.bf16.mxu1 %vm683_vm5, %v5531_v51 }
0x12db   : > { %v5420_v49 = vpack.c.bf16 %v9043_v9, %v9035_v42  ;;  %5417 = vadd.xlane.f32.xlu0 %v5416_v43  ;;  %v5407_v56 = vsel %vm490_vm2, %v9043_v9, 0.0  ;;  %v6049_v8 = vsel %vm401_vm1, %v6027_v32, 0  ;;  %v6029_v55 = vpop.permute.xlu0 %6028 }
0x12dc   : > { %5408 = vadd.xlane.f32.xlu1 %v5407_v56  ;;  %v6052_v53 = vsel %vm401_vm1, %v6029_v55, 0 }
0x12dd   : > { %v9045_v35 = vpop.eup %9044  ;;  %8328 = vmatmul.mubr.msk.bf16.vlgmr.msra.gmra.mrb[120].mxu1 %vm490_vm2, %v5420_v49 }
0x12de   : > { %v9047_v60 = vpop.eup %9046  ;;  %v6015_v16 = vpop.permute.xlu1 %6014  ;;  %v5410_v15 = vsel %vm490_vm2, %v9045_v35, 0.0  ;;  %8336 = vmatpush3.bf16.msra.mxu1 %v5545_v46 }
0x12df   : > { %8395 = vmatprep.mubr.msk.bf16.mxu0 %vm401_vm1, %v6015_v16  ;;  %5411 = vadd.xlane.f32.xlu0 %v5410_v15  ;;  %v5421_v3 = vpack.c.bf16 %v9047_v60, %v9045_v35  ;;  %v6017_v38 = vpop.permute.xlu0 %6016  ;;  %v5413_v39 = vsel %vm490_vm2, %v9047_v60, 0.0 }
0x12e1   : > { %8331 = vmatprep.mubr.msk.bf16.mxu1 %vm490_vm2, %v5421_v3  ;;  %8390 = vmatpush3.bf16.xpose.msra.mxu0 %v6046_v40 }
0x12e2   : > { %8667 = vmatprep.subr.msk.bf16.mxu0 %vm401_vm1, %v6027_v32  ;;  %v6019_v37 = vpop.permute.xlu1 %6018 }
0x12e3   : > { %v6021_v48 = vpop.permute.xlu0 %6020 }
0x12e5   : > { %8332 = vmatmul.mubr.msk.bf16.gmra.mrb[124].mxu1 %vm490_vm2, %v5422_v11 }
0x12e9   : > { %8392 = vmatpush3.bf16.xpose.msra.mxu0 %v6049_v8 }
0x12ea   : > { %8668 = vmatprep.subr.msk.bf16.mxu0 %vm401_vm1, %v6029_v55 }
0x12ed   : > { %5806 = vrot.lane.b32.xlu1 %v10952_v2, %s9171_s15 }
0x12f1   : > { %8394 = vmatpush3.bf16.xpose.msra.mxu0 %v6052_v53 }
0x12f5   : > { %5804 = vrot.lane.b32.xlu0 %v10956_v12, %s9171_s15 }
0x12f8   : > { %8396 = vmatmul.mubr.msk.bf16.vlgmr.msra.gmra.mrb[144].mxu0 %vm401_vm1, %v6017_v38 }
0x12f9   : > { %8399 = vmatprep.mubr.msk.bf16.mxu0 %vm401_vm1, %v6019_v37  ;;  %5810 = vrot.lane.b32.xlu0 %v11061_v57, %s9171_s15 }
0x12fd   : > { %6405 = vrot.lane.b32.xlu0 %v10952_v2, %s9172_s18 }
0x1300   : > { %8400 = vmatmul.mubr.msk.bf16.gmra.mrb[148].mxu0 %vm401_vm1, %v6021_v48 }
0x1301   : > { %6409 = vrot.lane.b32.xlu0 %v11061_v57, %s9172_s18 }
0x1305   : > { %6397 = vrot.lane.b32.xlu0 %v10952_v2, %s9173_s19 }
0x1309   : > { %6401 = vrot.lane.b32.xlu0 %v11061_v57, %s9173_s19 }
0x1311   : > { %5414 = vadd.xlane.f32.xlu1 %v5413_v39 }
0x1313   : > { %v5748_v25 = vpop.xlane.xlu0 %5747  ;;  %v5745_v19 = vpop.xlane.xlu1 %5744 }
0x1314   : > { %v5760_v9 = vsub.f32 %v11264_v10, %v5745_v19  ;;  %v5761_v43 = vsub.f32 %v11266_v45, %v5748_v25 }
0x1316   : > { %v5769_v40 = vmul.f32 1.442695, %v5760_v9  ;;  %v5771_v8 = vmul.f32 1.442695, %v5761_v43 }
0x1317   : > { %v5742_v6 = vpop.xlane.xlu0 %5741  ;;  %v5739_v24 = vpop.xlane.xlu1 %5738 }
0x1318   : > { %v5758_v33 = vsub.f32 %v11271_v20, %v5739_v24  ;;  %v5759_v1 = vsub.f32 %v11273_v30, %v5742_v6 }
0x131a   : > { %v5765_v62 = vmul.f32 1.442695, %v5758_v33  ;;  %v5767_v59 = vmul.f32 1.442695, %v5759_v1  ;;  %v7387_v33 = vld [vmem:[%s11675_s5 + $0x138] sm:$0xff]   ;;  %v7388_v1 = vld [vmem:[%s11675_s5 + $0x140] sm:$0xff]  }
0x131b   : > { %v11355_v50 = vpop.xlane.xlu0 %5753  ;;  %v11360_v34 = vpop.xlane.xlu1 %5756 }
0x131c   : > { %v5763_v10 = vsub.f32 %v11281_v4, %v11355_v50  ;;  %v5764_v4 = vsub.f32 %v11279_v36, %v11360_v34 }
0x131e   : > { %v5775_v37 = vmul.f32 1.442695, %v5763_v10  ;;  %v5777_v19 = vmul.f32 1.442695, %v5764_v4 }
0x131f   : > { %v5751_v41 = vpop.xlane.xlu1 %5750 }
0x1320   : > { %v5762_v35 = vsub.f32 %v11287_v22, %v5751_v41 }
0x1322   : > { %5808 = vrot.lane.b32.xlu1 %v10986_v28, %s9171_s15  ;;  %v5773_v51 = vmul.f32 1.442695, %v5762_v35  ;;  %v7151_v35 = vld [vmem:[%s11675_s5 + $0x14c] sm:$0x1] }
0x1326   : > { %6403 = vrot.lane.b32.xlu1 %v10956_v12, %s9172_s18 }
0x132a   : > { %6407 = vrot.lane.b32.xlu1 %v10986_v28, %s9172_s18 }
0x132e   : > { %6395 = vrot.lane.b32.xlu1 %v10956_v12, %s9173_s19 }
0x1332   : > { %6399 = vrot.lane.b32.xlu1 %v10986_v28, %s9173_s19 }
0x1360   : > { %v5406_v63 = vpop.xlane.xlu0 %5405 }
0x1361   : > { %9048 = vrcp.f32 %v5406_v63 }
0x1364   : > { %v5403_v17 = vpop.xlane.xlu0 %5402 }
0x1365   : > { %v5400_v29 = vpop.xlane.xlu1 %5399  ;;  %9050 = vrcp.f32 %v5403_v17 }
0x1368   : > { %v5418_v21 = vpop.xlane.xlu0 %5417 }
0x1369   : > { %v5409_v0 = vpop.xlane.xlu1 %5408 }
0x136a   : > { %9052 = vrcp.f32 %v5409_v0 }
0x136b   : > { %9054 = vrcp.f32 %v5400_v29  ;;  %v9049_v61 = vpop.eup %9048 }
0x136c   : > { %v5412_v5 = vpop.xlane.xlu0 %5411  ;;  %9056 = vrcp.f32 %v5418_v21 }
0x136d   : > { %v11362_v47 = vpop.permute.xlu1 %5806  ;;  %9058 = vrcp.f32 %v5412_v5 }
0x136f   : > { %v9051_v18 = vpop.eup %9050 }
0x1370   : > { %v11357_v52 = vpop.permute.xlu0 %5804 }
0x1371   : > { %8361 = vmatprep.subr.bf16.mxu1 %v11357_v52 }
0x1374   : > { %v11364_v44 = vpop.permute.xlu0 %5810  ;;  %v9053_v30 = vpop.eup %9052 }
0x1375   : > { %v9055_v56 = vpop.eup %9054  ;;  %v5828_v41 = vand.u32 %v11364_v44, %v9428_v27 }
0x1376   : > { %v9057_v46 = vpop.eup %9056 }
0x1377   : > { %v9059_v22 = vpop.eup %9058 }
0x1378   : > { %v6406_v31 = vpop.permute.xlu0 %6405 }
0x1379   : > { %v6427_v26 = vsel %vm401_vm1, %v6406_v31, 0 }
0x137c   : > { %v6410_v53 = vpop.permute.xlu0 %6409 }
0x137d   : > { %v6433_v36 = vsel %vm401_vm1, %v6410_v53, 0 }
0x139e   : > { %v5415_v42 = vpop.xlane.xlu1 %5414 }
0x139f   : > { %9060 = vrcp.f32 %v5415_v42  ;;  %v6398_v42 = vpop.permute.xlu0 %6397 }
0x13a0   : > { %9062 = vpow2.f32 %v5765_v62  ;;  %v7339_v62 = vunpack.c.h.bf16 %v7387_v33 }
0x13a1   : > { %9064 = vpow2.f32 %v5767_v59  ;;  %v7338_v59 = vunpack.c.l.bf16 %v7387_v33 }
0x13a2   : > { %v11366_v7 = vpop.permute.xlu1 %5808  ;;  %9066 = vpow2.f32 %v5769_v40 }
0x13a3   : > { %9068 = vpow2.f32 %v5771_v8 }
0x13a4   : > { %9070 = vpow2.f32 %v5773_v51 }
0x13a5   : > { %9072 = vpow2.f32 %v5775_v37 }
0x13a6   : > { %v6404_v14 = vpop.permute.xlu1 %6403  ;;  %9074 = vpow2.f32 %v5777_v19 }
0x13a7   : > { %v6424_v13 = vsel %vm401_vm1, %v6404_v14, 0  ;;  %8670 = vmatprep.subr.msk.bf16.mxu0 %vm401_vm1, %v6404_v14  ;;  %v7145_v14 = vld [vmem:[%s11675_s5 + $0x134] ss:$20 sps:$4 sm:$0xff]  }
0x13a8   : > { %8430 = vmatpush3.bf16.xpose.msra.mxu0 %v6424_v13 }
0x13a9   : > { %8671 = vmatprep.subr.msk.bf16.mxu0 %vm401_vm1, %v6406_v31  ;;  %v9061_v50 = vpop.eup %9060 }
0x13aa   : > { %v6408_v58 = vpop.permute.xlu1 %6407  ;;  %v11389_v17 = vpop.eup %9062 }
0x13ab   : > { %v6430_v45 = vsel %vm401_vm1, %v6408_v58, 0  ;;  %v11391_v5 = vpop.eup %9064  ;;  %v5779_v4 = vsel %vm490_vm2, %v11389_v17, 0.0 }
0x13ac   : > { %v9067_v29 = vpop.eup %9066 }
0x13ad   : > { %v11404_v0 = vpop.eup %9068 }
0x13ae   : > { %v6396_v54 = vpop.permute.xlu1 %6395  ;;  %v5801_v13 = vpack.c.bf16 %v11404_v0, %v9067_v29 }
0x13af   : > { %8437 = vmatprep.mubr.msk.bf16.mxu0 %vm401_vm1, %v6396_v54 }
0x13b0   : > { %v8329_v23 = vpop.f32.mrb[120].mxu1  ;;  %8432 = vmatpush3.bf16.xpose.msra.mxu0 %v6427_v26 }
0x13b1   : > { %v5522_v20 = vmul.f32 %v9049_v61, %v8329_v23  ;;  %v5483_v32 = vpop.f32.mrb[121].mxu1  ;;  %8672 = vmatprep.subr.msk.bf16.mxu0 %vm401_vm1, %v6408_v58  ;;  %v6007_v58 = vunpack.c.l.bf16 %v7145_v14 }
0x13b2   : > { %v8330_v49 = vpop.f32.mrb[122].mxu1  ;;  %v5520_v15 = vmul.f32 %v9055_v56, %v5483_v32  ;;  %v6400_v31 = vpop.permute.xlu1 %6399 }
0x13b3   : > { %v5523_v60 = vmul.f32 %v9053_v30, %v8330_v49  ;;  %v5486_v16 = vpop.f32.mrb[123].mxu1 }
0x13b4   : > { %v5521_v3 = vmul.f32 %v9051_v18, %v5486_v16  ;;  %v7342_v18 = vunpack.c.l.bf16 %v7388_v1 }
0x13b5   : > { %v5528_v11 = vpack.c.bf16 %v5523_v60, %v5522_v20  ;;  %v6402_v20 = vpop.permute.xlu0 %6401 }
0x13b6   : > { %v5527_v55 = vpack.c.bf16 %v5521_v3, %v5520_v15  ;;  %v7343_v15 = vunpack.c.h.bf16 %v7388_v1  ;;  %v6013_v3 = vunpack.c.l.bf16 %v7151_v35 }
0x13b8   : > { %v8333_v38 = vpop.f32.mrb[124].mxu1  ;;  %8337 = vmatprep.mubr.msk.bf16.mxu1 %vm401_vm1, %v5527_v55  ;;  %8434 = vmatpush3.bf16.xpose.msra.mxu0 %v6430_v45 }
0x13b9   : > { %v5526_v48 = vmul.f32 %v9057_v46, %v8333_v38  ;;  %v5499_v39 = vpop.f32.mrb[125].mxu1  ;;  %8338 = vmatmul.mubr.msk.bf16.vlgmr.msra.gmra.mrb[128].mxu1 %vm401_vm1, %v5528_v11  ;;  %8673 = vmatprep.subr.msk.bf16.mxu0 %vm401_vm1, %v6410_v53  ;;  %v6012_v11 = vunpack.c.h.bf16 %v7145_v14 }
0x13ba   : > { %v5524_v25 = vmul.f32 %v9059_v22, %v5499_v39  ;;  %8362 = vmatpush3.bf16.msra.mxu1 %v11357_v52  ;;  %v8334_v6 = vpop.f32.mrb[126].mxu1  ;;  %v5800_v52 = vpack.c.bf16 %v11391_v5, %v11389_v17  ;;  %v5785_v39 = vsel %vm490_vm2, %v9067_v29, 0.0  ;;  %v5912_v17 = vld [vmem:[%s11673_s3 + $0x4] sm:$0xf] }
0x13bb   : > { %8363 = vmatprep.subr.bf16.mxu1 %v11362_v47  ;;  %v5502_v63 = vpop.f32.mrb[127].mxu1  ;;  %v5530_v34 = vpack.c.bf16 %v5526_v48, %v5526_v48  ;;  %v5788_v6 = vsel %vm490_vm2, %v11404_v0, 0.0 }
0x13bc   : > { %v5525_v21 = vmul.f32 %v9061_v50, %v5502_v63 }
0x13be   : > { %v5529_v24 = vpack.c.bf16 %v5525_v21, %v5524_v25  ;;  %8364 = vmatpush3.bf16.msra.mxu1 %v11362_v47  ;;  %v11406_v47 = vpop.eup %9070  ;;  %v5782_v25 = vsel %vm490_vm2, %v11391_v5, 0.0  ;;  %v5926_v21 = vsel %vm683_vm5, %v5912_v17, 0 }
0x13bf   : > { %8365 = vmatprep.subr.bf16.mxu1 %v11366_v7  ;;  %v11411_v44 = vpop.eup %9072  ;;  %v5791_v63 = vsel %vm490_vm2, %v11406_v47, 0.0 }
0x13c0   : > { %8341 = vmatprep.mubr.msk.bf16.mxu1 %vm401_vm1, %v5529_v24  ;;  %8436 = vmatpush3.bf16.xpose.msra.mxu0 %v6433_v36  ;;  %v9075_v26 = vpop.eup %9074  ;;  %v5794_v5 = vsel %vm490_vm2, %v11411_v44, 0.0 }
0x13c1   : > { %8342 = vmatmul.mubr.msk.bf16.gmra.mrb[132].mxu1 %vm401_vm1, %v5530_v34  ;;  %v5803_v56 = vpack.c.bf16 %v9075_v26, %v9075_v26  ;;  %v5797_v50 = vsel %vm509_vm3, %v9075_v26, 0.0 }
0x13c2   : > { %8366 = vmatpush3.bf16.msra.mxu1 %v11366_v7  ;;  %8369 = vmatprep.mubr.msk.bf16.mxu1 %vm490_vm2, %v5800_v52  ;;  %v5802_v7 = vpack.c.bf16 %v11411_v44, %v11406_v47 }
0x13c3   : > { %8367 = vmatprep.subr.bf16.mxu1 %v5828_v41 }
0x13c6   : > { %8368 = vmatpush3.bf16.msra.mxu1 %v5828_v41 }
0x13c7   : > { %8438 = vmatmul.mubr.msk.bf16.vlgmr.msra.gmra.mrb[152].mxu0 %vm401_vm1, %v6398_v42  ;;  %8664 = vmatprep.subr.msk.bf16.mxu1 %vm683_vm5, %v5912_v17 }
0x13c8   : > { %8441 = vmatprep.mubr.msk.bf16.mxu0 %vm401_vm1, %v6400_v31 }
0x13c9   : > { %8370 = vmatmul.mubr.msk.bf16.vlgmr.msra.gmra.mrb[136].mxu1 %vm490_vm2, %v5801_v13 }
0x13ca   : > { %8373 = vmatprep.mubr.msk.bf16.mxu1 %vm490_vm2, %v5802_v7  ;;  %8378 = vmatpush3.bf16.msra.mxu1 %v5926_v21  ;;  %v11498_v7 = vld [vmem:[%s11675_s5 + $0x1a4] ss:$20 sps:$4 sm:$0xff]  }
0x13cb   : > { %v8397_v54 = vpop.f32.mrb[144].mxu0  ;;  %v6388_v1 = vunpack.c.l.bf16 %v11498_v7 }
0x13cc   : > { %v6088_v61 = vpop.f32.mrb[145].mxu0  ;;  %v11428_v30 = vadd.f32 %v8397_v54, %v7339_v62 }
0x13cd   : > { %v11426_v23 = vadd.f32 %v6088_v61, %v6007_v58  ;;  %v8398_v9 = vpop.f32.mrb[146].mxu0  ;;  %v7389_v58 = vld [vmem:[%s11675_s5 + $0x1a8] sm:$0xff]  }
0x13ce   : > { %v6091_v32 = vpop.f32.mrb[147].mxu0  ;;  %v11438_v60 = vadd.f32 %v8398_v9, %v7342_v18  ;;  %v6124_v10 = vsel %vm490_vm2, %v11428_v30, -inf  ;;  %v7347_v61 = vunpack.c.h.bf16 %v7389_v58  ;;  %v7346_v9 = vunpack.c.l.bf16 %v7389_v58 }
0x13cf   : > { %v11430_v43 = vadd.f32 %v7338_v59, %v6091_v32  ;;  %8442 = vmatmul.mubr.msk.bf16.gmra.mrb[156].mxu0 %vm401_vm1, %v6402_v20  ;;  %v6118_v49 = vsel %vm490_vm2, %v11426_v23, -inf  ;;  %v7390_v59 = vld [vmem:[%s11675_s5 + $0x1b0] sm:$0xff]  }
0x13d0   : > { %6119 = vmax.xlane.f32.xlu1 %v6118_v49  ;;  %v6127_v45 = vsel %vm490_vm2, %v11438_v60, -inf }
0x13d1   : > { %8374 = vmatmul.mubr.msk.bf16.gmra.mrb[140].mxu1 %vm490_vm2, %v5803_v56  ;;  %v6121_v16 = vsel %vm490_vm2, %v11430_v43, -inf }
0x13d2   : > { %6122 = vmax.xlane.f32.xlu0 %v6121_v16 }
0x13d3   : > { %v8401_v40 = vpop.f32.mrb[148].mxu0 }
0x13d4   : > { %6125 = vmax.xlane.f32.xlu1 %v6124_v10  ;;  %v6104_v8 = vpop.f32.mrb[149].mxu0  ;;  %v11449_v53 = vadd.f32 %v8401_v40, %v6013_v3 }
0x13d5   : > { %v11445_v55 = vadd.f32 %v7343_v15, %v6104_v8  ;;  %v8402_v51 = vpop.f32.mrb[150].mxu0 }
0x13d6   : > { %6128 = vmax.xlane.f32.xlu0 %v6127_v45  ;;  %v6107_v46 = vpop.f32.mrb[151].mxu0  ;;  %v6136_v48 = vsel %vm509_vm3, %v11449_v53, -inf }
0x13d7   : > { %v11451_v38 = vadd.f32 %v6107_v46, %v6012_v11  ;;  %v6130_v22 = vsel %vm490_vm2, %v11445_v55, -inf  ;;  %v7351_v11 = vunpack.c.h.bf16 %v7390_v59 }
0x13d8   : > { %6131 = vmax.xlane.f32.xlu1 %v6130_v22 }
0x13d9   : > { %v6133_v37 = vsel %vm490_vm2, %v11451_v38, -inf }
0x13da   : > { %6134 = vmax.xlane.f32.xlu0 %v6133_v37 }
0x13dc   : > { %6137 = vmax.xlane.f32.xlu1 %v6136_v48 }
0x13de   : > { %5786 = vadd.xlane.f32.xlu0 %v5785_v39 }
0x13e0   : > { %5780 = vadd.xlane.f32.xlu1 %v5779_v4 }
0x13e2   : > { %5783 = vadd.xlane.f32.xlu0 %v5782_v25 }
0x13e4   : > { %5789 = vadd.xlane.f32.xlu1 %v5788_v6 }
0x13e6   : > { %5798 = vadd.xlane.f32.xlu0 %v5797_v50 }
0x13ea   : > { %5792 = vadd.xlane.f32.xlu0 %v5791_v63 }
0x13f5   : > { %6187 = vrot.lane.b32.xlu1 %v10952_v2, %s9174_s14 }
0x1400   : > { %6185 = vrot.lane.b32.xlu0 %v10956_v12, %s9174_s14 }
0x1404   : > { %6191 = vrot.lane.b32.xlu0 %v11061_v57, %s9174_s14 }
0x1419   : > { %5795 = vadd.xlane.f32.xlu1 %v5794_v5 }
0x142a   : > { %6189 = vrot.lane.b32.xlu1 %v10986_v28, %s9174_s14 }
0x145d   : > { %v6120_v41 = vpop.xlane.xlu1 %6119 }
0x145e   : > { %v6139_v62 = vsub.f32 %v11426_v23, %v6120_v41  ;;  %v7350_v23 = vunpack.c.l.bf16 %v7390_v59  ;;  %v6393_v41 = vunpack.c.h.bf16 %v11498_v7 }
0x145f   : > { %v6123_v19 = vpop.xlane.xlu0 %6122 }
0x1460   : > { %v6140_v54 = vsub.f32 %v11430_v43, %v6123_v19  ;;  %v6146_v15 = vmul.f32 1.442695, %v6139_v62 }
0x1461   : > { %v6126_v47 = vpop.xlane.xlu1 %6125 }
0x1462   : > { %v6141_v33 = vsub.f32 %v11428_v30, %v6126_v47  ;;  %v6148_v3 = vmul.f32 1.442695, %v6140_v54 }
0x1463   : > { %v6129_v24 = vpop.xlane.xlu0 %6128 }
0x1464   : > { %v6150_v26 = vmul.f32 1.442695, %v6141_v33  ;;  %v6142_v20 = vsub.f32 %v11438_v60, %v6129_v24 }
0x1465   : > { %v11493_v14 = vpop.xlane.xlu1 %6131 }
0x1466   : > { %v6152_v37 = vmul.f32 1.442695, %v6142_v20  ;;  %v6143_v47 = vsub.f32 %v11445_v55, %v11493_v14 }
0x1467   : > { %v11484_v36 = vpop.xlane.xlu0 %6134 }
0x1469   : > { %v6138_v44 = vpop.xlane.xlu1 %6137 }
0x146a   : > { %v6145_v32 = vsub.f32 %v11449_v53, %v6138_v44  ;;  %v7170_v53 = vld [vmem:[%s11675_s5 + $0x1bc] sm:$0x1] }
0x146b   : > { %v5787_v34 = vpop.xlane.xlu0 %5786  ;;  %v6394_v5 = vunpack.c.l.bf16 %v7170_v53 }
0x146c   : > { %9076 = vrcp.f32 %v5787_v34  ;;  %v6158_v48 = vmul.f32 1.442695, %v6145_v32 }
0x146d   : > { %v5781_v13 = vpop.xlane.xlu1 %5780 }
0x146e   : > { %9078 = vrcp.f32 %v5781_v13 }
0x146f   : > { %v5784_v52 = vpop.xlane.xlu0 %5783 }
0x1471   : > { %v5790_v31 = vpop.xlane.xlu1 %5789 }
0x1472   : > { %9080 = vrcp.f32 %v5790_v31 }
0x1473   : > { %v11486_v29 = vpop.xlane.xlu0 %5798  ;;  %9082 = vrcp.f32 %v5784_v52 }
0x1474   : > { %9084 = vpow2.f32 %v6150_v26  ;;  %v6154_v26 = vmul.f32 1.442695, %v6143_v47 }
0x1475   : > { %9086 = vpow2.f32 %v6146_v15  ;;  %v6188_v19 = vpop.permute.xlu1 %6187 }
0x1476   : > { %v9077_v49 = vpop.eup %9076  ;;  %9088 = vpow2.f32 %v6148_v3 }
0x1477   : > { %v11488_v0 = vpop.xlane.xlu0 %5792  ;;  %9090 = vpow2.f32 %v6152_v37 }
0x1478   : > { %v9079_v43 = vpop.eup %9078  ;;  %9092 = vpow2.f32 %v6158_v48 }
0x1479   : > { %9094 = vrcp.f32 %v11486_v29 }
0x147a   : > { %9096 = vrcp.f32 %v11488_v0 }
0x147b   : > { %v11490_v42 = vpop.permute.xlu0 %6185 }
0x147c   : > { %8403 = vmatprep.subr.bf16.mxu1 %v11490_v42  ;;  %v9081_v8 = vpop.eup %9080 }
0x147d   : > { %v9083_v22 = vpop.eup %9082 }
0x149a   : > { %v8439_v18 = vpop.f32.mrb[152].mxu0 }
0x149b   : > { %v6469_v30 = vpop.f32.mrb[153].mxu0  ;;  %v11514_v51 = vadd.f32 %v8439_v18, %v7347_v61  ;;  %v9085_v61 = vpop.eup %9084  ;;  %v6144_v18 = vsub.f32 %v11451_v38, %v11484_v36 }
0x149c   : > { %v11512_v56 = vadd.f32 %v6469_v30, %v6388_v1  ;;  %v8371_v35 = vpop.f32.mrb[136].mxu1  ;;  %v8440_v16 = vpop.f32.mrb[154].mxu0 }
0x149d   : > { %v5864_v40 = vpop.f32.mrb[137].mxu1  ;;  %v6472_v10 = vpop.f32.mrb[155].mxu0  ;;  %v5903_v39 = vmul.f32 %v9077_v49, %v8371_v35  ;;  %v11523_v6 = vadd.f32 %v8440_v16, %v7350_v23  ;;  %v6505_v52 = vsel %vm490_vm2, %v11514_v51, -inf  ;;  %v6166_v49 = vsel %vm490_vm2, %v9085_v61, 0.0 }
0x149e   : > { %v11516_v60 = vadd.f32 %v7346_v9, %v6472_v10  ;;  %v8372_v45 = vpop.f32.mrb[138].mxu1  ;;  %v6499_v46 = vsel %vm490_vm2, %v11512_v56, -inf  ;;  %v5901_v50 = vmul.f32 %v9079_v43, %v5864_v40  ;;  %v9087_v32 = vpop.eup %9086  ;;  %v6156_v23 = vmul.f32 1.442695, %v6144_v18 }
0x149f   : > { %v5904_v4 = vmul.f32 %v9081_v8, %v8372_v45  ;;  %v5867_v25 = vpop.f32.mrb[139].mxu1  ;;  %6500 = vmax.xlane.f32.xlu1 %v6499_v46  ;;  %v6508_v58 = vsel %vm490_vm2, %v11523_v6, -inf  ;;  %v9089_v30 = vpop.eup %9088  ;;  %v6160_v36 = vsel %vm490_vm2, %v9087_v32, 0.0 }
0x14a0   : > { %v5902_v63 = vmul.f32 %v9083_v22, %v5867_v25  ;;  %v6502_v17 = vsel %vm490_vm2, %v11516_v60, -inf  ;;  %v9091_v35 = vpop.eup %9090  ;;  %v6163_v3 = vsel %vm490_vm2, %v9089_v30, 0.0  ;;  %v6181_v48 = vpack.c.bf16 %v9089_v30, %v9087_v32 }
0x14a1   : > { %v5909_v21 = vpack.c.bf16 %v5904_v4, %v5903_v39  ;;  %6503 = vmax.xlane.f32.xlu0 %v6502_v17  ;;  %v9093_v38 = vpop.eup %9092  ;;  %v6169_v45 = vsel %vm490_vm2, %v9091_v35, 0.0  ;;  %v6182_v25 = vpack.c.bf16 %v9091_v35, %v9085_v61  ;;  %v6293_v17 = vld [vmem:[%s11673_s3 + $0x8] sm:$0xf] }
0x14a2   : > { %v5908_v24 = vpack.c.bf16 %v5902_v63, %v5901_v50  ;;  %v8443_v34 = vpop.f32.mrb[156].mxu0  ;;  %v9095_v43 = vpop.eup %9094  ;;  %v6178_v53 = vsel %vm509_vm3, %v9093_v38, 0.0  ;;  %v6184_v63 = vpack.c.bf16 %v9093_v38, %v9093_v38 }
0x14a3   : > { %6506 = vmax.xlane.f32.xlu1 %v6505_v52  ;;  %v6485_v44 = vpop.f32.mrb[157].mxu0  ;;  %v11540_v55 = vadd.f32 %v8443_v34, %v6394_v5  ;;  %v9097_v15 = vpop.eup %9096 }
0x14a4   : > { %v11532_v13 = vadd.f32 %v7351_v11, %v6485_v44  ;;  %v8375_v31 = vpop.f32.mrb[140].mxu1  ;;  %8379 = vmatprep.mubr.msk.bf16.mxu1 %vm401_vm1, %v5908_v24  ;;  %v8444_v33 = vpop.f32.mrb[158].mxu0 }
0x14a5   : > { %v5880_v1 = vpop.f32.mrb[141].mxu1  ;;  %6509 = vmax.xlane.f32.xlu0 %v6508_v58  ;;  %8380 = vmatmul.mubr.msk.bf16.vlgmr.msra.gmra.mrb[128].mxu1 %vm401_vm1, %v5909_v21  ;;  %v6488_v7 = vpop.f32.mrb[159].mxu0  ;;  %v6517_v20 = vsel %vm509_vm3, %v11540_v55, -inf  ;;  %v5907_v10 = vmul.f32 %v9095_v43, %v8375_v31  ;;  %v6307_v21 = vsel %vm683_vm5, %v6293_v17, 0 }
0x14a6   : > { %8404 = vmatpush3.bf16.msra.mxu1 %v11490_v42  ;;  %v11543_v14 = vadd.f32 %v6488_v7, %v6393_v41  ;;  %v5796_v62 = vpop.xlane.xlu1 %5795  ;;  %v8376_v54 = vpop.f32.mrb[142].mxu1  ;;  %v6511_v59 = vsel %vm490_vm2, %v11532_v13, -inf  ;;  %v5905_v11 = vmul.f32 %v9097_v15, %v5880_v1 }
0x14a7   : > { %9098 = vrcp.f32 %v5796_v62  ;;  %8405 = vmatprep.subr.bf16.mxu1 %v6188_v19  ;;  %v5883_v29 = vpop.f32.mrb[143].mxu1  ;;  %6512 = vmax.xlane.f32.xlu1 %v6511_v59  ;;  %v6192_v42 = vpop.permute.xlu0 %6191  ;;  %v5911_v37 = vpack.c.bf16 %v5907_v10, %v5907_v10 }
0x14a8   : > { %v6514_v0 = vsel %vm490_vm2, %v11543_v14, -inf  ;;  %9100 = vpow2.f32 %v6154_v26  ;;  %v6209_v16 = vand.u32 %v6192_v42, %v9428_v27 }
0x14a9   : > { %6515 = vmax.xlane.f32.xlu0 %v6514_v0  ;;  %9102 = vpow2.f32 %v6156_v23 }
0x14aa   : > { %8406 = vmatpush3.bf16.msra.mxu1 %v6188_v19  ;;  %v6190_v9 = vpop.permute.xlu1 %6189 }
0x14ab   : > { %6518 = vmax.xlane.f32.xlu1 %v6517_v20  ;;  %8407 = vmatprep.subr.bf16.mxu1 %v6190_v9 }
0x14ad   : > { %6167 = vadd.xlane.f32.xlu0 %v6166_v49 }
0x14ae   : > { %8408 = vmatpush3.bf16.msra.mxu1 %v6190_v9 }
0x14af   : > { %8409 = vmatprep.subr.bf16.mxu1 %v6209_v16  ;;  %6161 = vadd.xlane.f32.xlu1 %v6160_v36 }
0x14b1   : > { %v9099_v40 = vpop.eup %9098  ;;  %6164 = vadd.xlane.f32.xlu0 %v6163_v3 }
0x14b2   : > { %v5906_v8 = vmul.f32 %v9099_v40, %v5883_v29  ;;  %8410 = vmatpush3.bf16.msra.mxu1 %v6209_v16  ;;  %v9101_v22 = vpop.eup %9100 }
0x14b3   : > { %6170 = vadd.xlane.f32.xlu1 %v6169_v45  ;;  %v6172_v39 = vsel %vm490_vm2, %v9101_v22, 0.0  ;;  %v9103_v4 = vpop.eup %9102  ;;  %8669 = vmatprep.subr.msk.bf16.mxu1 %vm683_vm5, %v6293_v17 }
0x14b4   : > { %v5910_v46 = vpack.c.bf16 %v5906_v8, %v5905_v11  ;;  %v6183_v50 = vpack.c.bf16 %v9103_v4, %v9101_v22 }
0x14b5   : > { %6179 = vadd.xlane.f32.xlu0 %v6178_v53 }
0x14b6   : > { %8383 = vmatprep.mubr.msk.bf16.mxu1 %vm401_vm1, %v5910_v46 }
0x14b7   : > { %8384 = vmatmul.mubr.msk.bf16.gmra.mrb[132].mxu1 %vm401_vm1, %v5911_v37 }
0x14b8   : > { %8411 = vmatprep.mubr.msk.bf16.mxu1 %vm490_vm2, %v6181_v48 }
0x14b9   : > { %6173 = vadd.xlane.f32.xlu0 %v6172_v39 }
0x14bf   : > { %8412 = vmatmul.mubr.msk.bf16.vlgmr.msra.gmra.mrb[144].mxu1 %vm490_vm2, %v6182_v25 }
0x14c0   : > { %8415 = vmatprep.mubr.msk.bf16.mxu1 %vm490_vm2, %v6183_v50  ;;  %8420 = vmatpush3.bf16.msra.mxu1 %v6307_v21 }
0x14c4   : > { %6568 = vrot.lane.b32.xlu1 %v10952_v2, %s9175_s16  ;;  %v6175_v2 = vsel %vm490_vm2, %v9103_v4, 0.0 }
0x14c7   : > { %8416 = vmatmul.mubr.msk.bf16.gmra.mrb[148].mxu1 %vm490_vm2, %v6184_v63 }
0x14cf   : > { %6566 = vrot.lane.b32.xlu0 %v10956_v12, %s9175_s16 }
0x14d3   : > { %6572 = vrot.lane.b32.xlu0 %v11061_v57, %s9175_s16 }
0x14e8   : > { %6176 = vadd.xlane.f32.xlu1 %v6175_v2 }
0x14f9   : > { %6570 = vrot.lane.b32.xlu1 %v10986_v28, %s9175_s16 }
0x152c   : > { %v6501_v5 = vpop.xlane.xlu1 %6500 }
0x152d   : > { %v6520_v19 = vsub.f32 %v11512_v56, %v6501_v5 }
0x152e   : > { %v6504_v24 = vpop.xlane.xlu0 %6503 }
0x152f   : > { %v6527_v34 = vmul.f32 1.442695, %v6520_v19  ;;  %v6521_v52 = vsub.f32 %v11516_v60, %v6504_v24 }
0x1530   : > { %v6507_v41 = vpop.xlane.xlu1 %6506 }
0x1531   : > { %9104 = vpow2.f32 %v6527_v34  ;;  %v6529_v47 = vmul.f32 1.442695, %v6521_v52  ;;  %v6522_v12 = vsub.f32 %v11514_v51, %v6507_v41 }
0x1532   : > { %v6510_v44 = vpop.xlane.xlu0 %6509 }
0x1533   : > { %9106 = vpow2.f32 %v6529_v47  ;;  %v6531_v57 = vmul.f32 1.442695, %v6522_v12  ;;  %v6523_v31 = vsub.f32 %v11523_v6, %v6510_v44 }
0x1534   : > { %v6513_v33 = vpop.xlane.xlu1 %6512 }
0x1535   : > { %9108 = vpow2.f32 %v6531_v57  ;;  %v6533_v28 = vmul.f32 1.442695, %v6523_v31  ;;  %v6524_v58 = vsub.f32 %v11532_v13, %v6513_v33 }
0x1536   : > { %v6516_v56 = vpop.xlane.xlu0 %6515 }
0x1537   : > { %9110 = vpow2.f32 %v6533_v28  ;;  %v6535_v1 = vmul.f32 1.442695, %v6524_v58  ;;  %v6525_v60 = vsub.f32 %v11543_v14, %v6516_v56  ;;  %v6674_v58 = vld [vmem:[%s11673_s3 + $0xc] sm:$0xf] }
0x1538   : > { %v6519_v7 = vpop.xlane.xlu1 %6518  ;;  %v6688_v56 = vsel %vm683_vm5, %v6674_v58, 0 }
0x1539   : > { %9112 = vpow2.f32 %v6535_v1  ;;  %v6537_v62 = vmul.f32 1.442695, %v6525_v60  ;;  %v6526_v51 = vsub.f32 %v11540_v55, %v6519_v7 }
0x153a   : > { %v6168_v54 = vpop.xlane.xlu0 %6167 }
0x153b   : > { %v11587_v59 = vpop.eup %9104  ;;  %9114 = vpow2.f32 %v6537_v62  ;;  %v6539_v6 = vmul.f32 1.442695, %v6526_v51 }
0x153c   : > { %v6541_v26 = vsel %vm490_vm2, %v11587_v59, 0.0  ;;  %v6162_v15 = vpop.xlane.xlu1 %6161 }
0x153d   : > { %v11591_v29 = vpop.eup %9106  ;;  %9116 = vpow2.f32 %v6539_v6  ;;  %6542 = vadd.xlane.f32.xlu1 %v6541_v26 }
0x153e   : > { %v6165_v13 = vpop.xlane.xlu0 %6164  ;;  %v6544_v14 = vsel %vm490_vm2, %v11591_v29, 0.0  ;;  %v6562_v61 = vpack.c.bf16 %v11591_v29, %v11587_v59  ;;  %9118 = vrcp.f32 %v6168_v54 }
0x153f   : > { %v11597_v55 = vpop.eup %9108  ;;  %6545 = vadd.xlane.f32.xlu0 %v6544_v14  ;;  %9120 = vrcp.f32 %v6162_v15 }
0x1540   : > { %v6547_v9 = vsel %vm490_vm2, %v11597_v55, 0.0  ;;  %v6171_v3 = vpop.xlane.xlu1 %6170 }
0x1541   : > { %v11599_v0 = vpop.eup %9110  ;;  %9122 = vrcp.f32 %v6171_v3 }
0x1542   : > { %v6563_v18 = vpack.c.bf16 %v11599_v0, %v11597_v55  ;;  %v6180_v42 = vpop.xlane.xlu0 %6179  ;;  %v6550_v20 = vsel %vm490_vm2, %v11599_v0, 0.0  ;;  %9124 = vrcp.f32 %v6165_v13 }
0x1543   : > { %v11607_v32 = vpop.eup %9112  ;;  %6548 = vadd.xlane.f32.xlu0 %v6547_v9  ;;  %6551 = vadd.xlane.f32.xlu1 %v6550_v20  ;;  %9126 = vrcp.f32 %v6180_v42 }
0x1544   : > { %v6553_v35 = vsel %vm490_vm2, %v11607_v32, 0.0  ;;  %v6569_v40 = vpop.permute.xlu1 %6568 }
0x1545   : > { %v11609_v30 = vpop.eup %9114 }
0x1546   : > { %v6174_v49 = vpop.xlane.xlu0 %6173  ;;  %v6556_v23 = vsel %vm490_vm2, %v11609_v30, 0.0  ;;  %v6564_v16 = vpack.c.bf16 %v11609_v30, %v11607_v32 }
0x1547   : > { %v11617_v38 = vpop.eup %9116  ;;  %6554 = vadd.xlane.f32.xlu0 %v6553_v35  ;;  %6557 = vadd.xlane.f32.xlu1 %v6556_v23  ;;  %9128 = vrcp.f32 %v6174_v49 }
0x1548   : > { %v6559_v43 = vsel %vm509_vm3, %v11617_v38, 0.0  ;;  %v9119_v11 = vpop.eup %9118 }
0x1549   : > { %v9121_v45 = vpop.eup %9120 }
0x154a   : > { %v6567_v36 = vpop.permute.xlu0 %6566 }
0x154b   : > { %6560 = vadd.xlane.f32.xlu0 %v6559_v43  ;;  %8445 = vmatprep.subr.bf16.mxu1 %v6567_v36  ;;  %v9123_v22 = vpop.eup %9122 }
0x154c   : > { %v9125_v48 = vpop.eup %9124 }
0x154d   : > { %v9127_v21 = vpop.eup %9126 }
0x154e   : > { %v6573_v44 = vpop.permute.xlu0 %6572 }
0x154f   : > { %v6590_v28 = vand.u32 %v6573_v44, %v9428_v27  ;;  %v6565_v27 = vpack.c.bf16 %v11617_v38, %v11617_v38 }
0x1551   : > { %v9129_v5 = vpop.eup %9128 }
0x1575   : > { %v6177_v10 = vpop.xlane.xlu1 %6176 }
0x1576   : > { %9130 = vrcp.f32 %v6177_v10 }
0x1579   : > { %v6571_v57 = vpop.permute.xlu1 %6570 }
0x1580   : > { %v9131_v41 = vpop.eup %9130 }
0x1592   : > { %v8413_v8 = vpop.f32.mrb[144].mxu1 }
0x1593   : > { %v6284_v46 = vmul.f32 %v9119_v11, %v8413_v8  ;;  %v6245_v53 = vpop.f32.mrb[145].mxu1 }
0x1594   : > { %v8414_v37 = vpop.f32.mrb[146].mxu1  ;;  %v6282_v25 = vmul.f32 %v9121_v45, %v6245_v53  ;;  %v9155_v45 = vld [vmem:[%s11674_s4] ss:$0 sm:$0xff] }
0x1595   : > { %v6285_v39 = vmul.f32 %v9123_v22, %v8414_v37  ;;  %v6248_v4 = vpop.f32.mrb[147].mxu1 }
0x1596   : > { %v6283_v50 = vmul.f32 %v9125_v48, %v6248_v4 }
0x1597   : > { %v6290_v63 = vpack.c.bf16 %v6285_v39, %v6284_v46 }
0x1598   : > { %v6289_v17 = vpack.c.bf16 %v6283_v50, %v6282_v25 }
0x159a   : > { %v8417_v2 = vpop.f32.mrb[148].mxu1  ;;  %8421 = vmatprep.mubr.msk.bf16.mxu1 %vm401_vm1, %v6289_v17 }
0x159b   : > { %v6288_v19 = vmul.f32 %v9127_v21, %v8417_v2  ;;  %v6261_v24 = vpop.f32.mrb[149].mxu1  ;;  %8422 = vmatmul.mubr.msk.bf16.vlgmr.msra.gmra.mrb[128].mxu1 %vm401_vm1, %v6290_v63 }
0x159c   : > { %v6286_v34 = vmul.f32 %v9129_v5, %v6261_v24  ;;  %8446 = vmatpush3.bf16.msra.mxu1 %v6567_v36  ;;  %v8418_v52 = vpop.f32.mrb[150].mxu1 }
0x159d   : > { %8447 = vmatprep.subr.bf16.mxu1 %v6569_v40  ;;  %v6264_v47 = vpop.f32.mrb[151].mxu1  ;;  %v6292_v33 = vpack.c.bf16 %v6288_v19, %v6288_v19 }
0x159e   : > { %v6287_v12 = vmul.f32 %v9131_v41, %v6264_v47 }
0x15a0   : > { %v6291_v31 = vpack.c.bf16 %v6287_v12, %v6286_v34  ;;  %8448 = vmatpush3.bf16.msra.mxu1 %v6569_v40 }
0x15a1   : > { %8449 = vmatprep.subr.bf16.mxu1 %v6571_v57 }
0x15a2   : > { %8425 = vmatprep.mubr.msk.bf16.mxu1 %vm401_vm1, %v6291_v31 }
0x15a3   : > { %8426 = vmatmul.mubr.msk.bf16.gmra.mrb[132].mxu1 %vm401_vm1, %v6292_v33 }
0x15a4   : > { %8450 = vmatpush3.bf16.msra.mxu1 %v6571_v57  ;;  %8453 = vmatprep.mubr.msk.bf16.mxu1 %vm490_vm2, %v6562_v61 }
0x15a5   : > { %8451 = vmatprep.subr.bf16.mxu1 %v6590_v28 }
0x15a8   : > { %8452 = vmatpush3.bf16.msra.mxu1 %v6590_v28 }
0x15a9   : > { %8674 = vmatprep.subr.msk.bf16.mxu1 %vm683_vm5, %v6674_v58 }
0x15ab   : > { %8454 = vmatmul.mubr.msk.bf16.vlgmr.msra.gmra.mrb[152].mxu1 %vm490_vm2, %v6563_v18 }
0x15ac   : > { %8457 = vmatprep.mubr.msk.bf16.mxu1 %vm490_vm2, %v6564_v16  ;;  %8462 = vmatpush3.bf16.msra.mxu1 %v6688_v56 }
0x15b3   : > { %8458 = vmatmul.mubr.msk.bf16.gmra.mrb[156].mxu1 %vm490_vm2, %v6565_v27 }
0x15ca   : > { %v6543_v60 = vpop.xlane.xlu1 %6542 }
0x15cb   : > { %9132 = vrcp.f32 %v6543_v60 }
0x15cc   : > { %v6546_v1 = vpop.xlane.xlu0 %6545 }
0x15d0   : > { %v6549_v7 = vpop.xlane.xlu0 %6548  ;;  %v6552_v62 = vpop.xlane.xlu1 %6551 }
0x15d1   : > { %9134 = vrcp.f32 %v6552_v62 }
0x15d2   : > { %9136 = vrcp.f32 %v6549_v7 }
0x15d3   : > { %9138 = vrcp.f32 %v6546_v1 }
0x15d4   : > { %v6555_v51 = vpop.xlane.xlu0 %6554  ;;  %v6558_v54 = vpop.xlane.xlu1 %6557 }
0x15d5   : > { %9140 = vrcp.f32 %v6558_v54  ;;  %v9133_v6 = vpop.eup %9132 }
0x15d8   : > { %v6561_v59 = vpop.xlane.xlu0 %6560 }
0x15d9   : > { %9142 = vrcp.f32 %v6561_v59 }
0x15da   : > { %9144 = vrcp.f32 %v6555_v51 }
0x15db   : > { %v9135_v29 = vpop.eup %9134 }
0x15dc   : > { %v9137_v14 = vpop.eup %9136 }
0x15dd   : > { %v9139_v55 = vpop.eup %9138 }
0x15df   : > { %v9141_v35 = vpop.eup %9140 }
0x15e3   : > { %v9143_v16 = vpop.eup %9142 }
0x15e4   : > { %v9145_v36 = vpop.eup %9144 }
0x167e   : > { %v8455_v26 = vpop.f32.mrb[152].mxu1 }
0x167f   : > { %v6626_v13 = vpop.f32.mrb[153].mxu1  ;;  %v6665_v0 = vmul.f32 %v9137_v14, %v8455_v26 }
0x1680   : > { %v8456_v61 = vpop.f32.mrb[154].mxu1  ;;  %v6663_v9 = vmul.f32 %v9133_v6, %v6626_v13 }
0x1681   : > { %v6666_v18 = vmul.f32 %v9135_v29, %v8456_v61  ;;  %v6629_v42 = vpop.f32.mrb[155].mxu1 }
0x1682   : > { %v6664_v20 = vmul.f32 %v9139_v55, %v6629_v42 }
0x1683   : > { %v6671_v32 = vpack.c.bf16 %v6666_v18, %v6665_v0 }
0x1684   : > { %v6670_v30 = vpack.c.bf16 %v6664_v20, %v6663_v9 }
0x1686   : > { %v8459_v49 = vpop.f32.mrb[156].mxu1  ;;  %8463 = vmatprep.mubr.msk.bf16.mxu1 %vm401_vm1, %v6670_v30 }
0x1687   : > { %v6642_v23 = vpop.f32.mrb[157].mxu1  ;;  %8464 = vmatmul.mubr.msk.bf16.vlgmr.msra.gmra.mrb[128].mxu1 %vm401_vm1, %v6671_v32  ;;  %v6669_v43 = vmul.f32 %v9143_v16, %v8459_v49 }
0x1688   : > { %v8460_v38 = vpop.f32.mrb[158].mxu1  ;;  %v6667_v3 = vmul.f32 %v9145_v36, %v6642_v23 }
0x1689   : > { %v6645_v15 = vpop.f32.mrb[159].mxu1  ;;  %v6673_v11 = vpack.c.bf16 %v6669_v43, %v6669_v43 }
0x168a   : > { %v6668_v40 = vmul.f32 %v9141_v35, %v6645_v15 }
0x168c   : > { %v6672_v10 = vpack.c.bf16 %v6668_v40, %v6667_v3 }
0x168e   : > { %8467 = vmatprep.mubr.msk.bf16.mxu1 %vm401_vm1, %v6672_v10 }
0x168f   : > { %8468 = vmatmul.mubr.msk.bf16.gmra.mrb[132].mxu1 %vm401_vm1, %v6673_v11 }
0x175a   : > { %v8465_v8 = vpop.f32.mrb[128].mxu1 }
0x175b   : > { %v8492_v46 = vadd.f32 %v9155_v45, %v8465_v8  ;;  %v6724_v53 = vpop.f32.mrb[129].mxu1 }
0x175c   : > { %v8493_v22 = vadd.f32 %v9155_v45, %v6724_v53  ;;  %v8466_v37 = vpop.f32.mrb[130].mxu1 }
0x175d   : > { %7185 = vst.msk [vmem:[%s9932_s20 + $0xb8] sm:$0xff] %vm294_vm0, %v8492_v46  ;;  %v8494_v48 = vadd.f32 %v9155_v45, %v8466_v37  ;;  %v6727_v39 = vpop.f32.mrb[131].mxu1 }
0x175e   : > { %7183 = vst.msk [vmem:[%s9932_s20 + $0xa8] sm:$0xff] %vm294_vm0, %v8493_v22  ;;  %v8495_v4 = vadd.f32 %v9155_v45, %v6727_v39 }
0x175f   : > { %7186 = vst.msk [vmem:[%s9932_s20 + $0xc0] sm:$0xff] %vm294_vm0, %v8494_v48 }
0x1760   : > { %7184 = vst.msk [vmem:[%s9932_s20 + $0xb0] sm:$0xff] %vm294_vm0, %v8495_v4 }
0x1762   : > { %v8469_v25 = vpop.f32.mrb[132].mxu1 }
0x1763   : > { %v8496_v50 = vadd.f32 %v9155_v45, %v8469_v25  ;;  %v6740_v63 = vpop.f32.mrb[133].mxu1 }
0x1764   : > { %v8497_v17 = vadd.f32 %v9155_v45, %v6740_v63  ;;  %v8470_v21 = vpop.f32.mrb[134].mxu1 }
0x1765   : > { %7189 = vst.msk [vmem:[%s9932_s20 + $0xd8] sm:$0x1] %vm1907_vm6, %v8496_v50  ;;  %v6743_v2 = vpop.f32.mrb[135].mxu1 }
0x1766   : > { %7187 = vst.msk [vmem:[%s9932_s20 + $0xc8] sm:$0xff] %vm294_vm0, %v8497_v17  ;;  %v8498_v5 = vadd.f32 %v9155_v45, %v6743_v2 }
0x1768   : > { %7188 = vst.msk [vmem:[%s9932_s20 + $0xd0] sm:$0xff] %vm294_vm0, %v8498_v5 }
0x1769 PF: > { %s16_s21 = sadd.s32 1, %s9162_s21  }
0x176a   : > { %p13_p4 = scmp.ge.s32.totalorder %s16_s21, 4  }
0x176c   :  { %15 = sbr.rel (!%p13_p4) target bundleno = 1 (0x1), region = 95 }

</bundles_post_ra>
